<compile_context>
chip_gen: v7x
topology: tpu7x:2x2x1
jax: 0.10.0
libtpu: 0.0.40
codegen_flags: <defaults>
</compile_context>

<pallas_src>
import math
from functools import partial

import jax
import jax.numpy as jnp
from jax.experimental import pallas as pl
from jax.experimental.pallas import tpu as pltpu


# ----------------------------------------------------------------------------
# Fused kernel: TransformerEncoderLayer(s) -> residual -> InvertedResidual,
# Bt images per grid step.
# ----------------------------------------------------------------------------
def _convformer_kernel(num_layers, nheads, Bt, H, W, mm_dtype,
                       x_ref, wqkv_ref, bqkv_ref, woh_ref, w1_ref, w2_ref,
                       vecc_ref, vecff_ref,
                       wexp_ref, wdw_ref, wpj_ref, vcex_ref, vco_ref,
                       o_ref):
    S = H * W
    C = x_ref.shape[-1]
    hd = C // nheads
    Ho, Wo = H // 2, W // 2
    Ntok = Bt * S

    # (Bt, S, C) flattened NHWC -> (Bt*S, C): batch folded into matmul rows.
    x2d = x_ref[...].reshape(Ntok, C)

    def layer_norm(v, g, b):
        mu = jnp.mean(v, axis=-1, keepdims=True)
        var = jnp.mean((v - mu) ** 2, axis=-1, keepdims=True)
        return (v - mu) * jax.lax.rsqrt(var + 1e-5) * g + b

    def mm(a, w):  # MXU matmul with bf16 operands, f32 accumulation
        return jnp.dot(a.astype(mm_dtype), w, preferred_element_type=jnp.float32)

    # --------------------- transformer encoder layers ------------------------
    xt = x2d
    for l in range(num_layers):
        vc = vecc_ref[l]                          # (6, C) f32
        bo, ln1g, ln1b, b2, ln2g, ln2b = vc[0], vc[1], vc[2], vc[3], vc[4], vc[5]
        b1 = vecff_ref[l]                         # (FF,) f32

        # fused QKV projection: ONE (C, 3C) matmul over all Bt*S tokens.
        qkv = mm(xt, wqkv_ref[l]) + bqkv_ref[l]               # (Bt*S, 3C) f32
        qkv_b = qkv.astype(mm_dtype).reshape(Bt, S, 3 * C)    # single cast site

        attn = None
        for h in range(nheads):
            # per-head q/k/v are lane slices of the fused projection
            q_h = qkv_b[:, :, h * hd:(h + 1) * hd]
            k_h = qkv_b[:, :, C + h * hd:C + (h + 1) * hd]
            v_h = qkv_b[:, :, 2 * C + h * hd:2 * C + (h + 1) * hd]
            s = jnp.einsum('bqd,bkd->bqk', q_h, k_h,
                           preferred_element_type=jnp.float32)     # (Bt, S, S)
            s = s - jnp.max(s, axis=-1, keepdims=True)
            p = jnp.exp(s)
            p = p * pl.reciprocal(jnp.sum(p, axis=-1, keepdims=True), approx=True)
            ctx = jnp.einsum('bqk,bkd->bqd', p.astype(mm_dtype), v_h,
                             preferred_element_type=jnp.float32)    # (Bt, S, hd)
            # output projection accumulated per head (== concat(ctx) @ Wo); avoids
            # an unaligned minor-dim concat.  No zeros-init (head 0 seeds attn).
            part = jnp.dot(ctx.reshape(Ntok, hd).astype(mm_dtype),
                           woh_ref[l * nheads + h],
                           preferred_element_type=jnp.float32)      # (Bt*S, C)
            attn = part if attn is None else attn + part
        attn = attn + bo

        # post-norm residual 1
        x1 = layer_norm(xt + attn, ln1g, ln1b)
        # feed-forward (ReLU)
        hmid = jnp.maximum(mm(x1, w1_ref[l]) + b1, 0.0)
        ffn = mm(hmid, w2_ref[l]) + b2
        # post-norm residual 2
        xt = layer_norm(x1 + ffn, ln2g, ln2b)

    # residual around the transformer path (self.reduce is a Module, so `!= 1` is True)
    xc = x2d + xt                                 # (Bt*S, C) f32

    # ------------------------- InvertedResidual ------------------------------
    s_exp, b_exp = vcex_ref[0], vcex_ref[1]
    s_dw, b_dw = vcex_ref[2], vcex_ref[3]
    s_pj, b_pj = vco_ref[0], vco_ref[1]
    Cexp = wexp_ref.shape[1]
    Cpad = wpj_ref.shape[1]                       # output channels padded to 128-multiple

    # 1x1 expand conv + folded BN + ReLU6
    hid = jnp.clip(mm(xc, wexp_ref[...]) * s_exp + b_exp, 0.0, 6.0)   # (Bt*S, Cexp)

    # 3x3 depthwise, stride 2, pad 1: de-interleave even/odd rows & cols once,
    # then every tap is a contiguous slice (zero-shifted at the -1 border).
    h5 = hid.reshape(Bt, H, Wo, 2, Cexp)
    c_even = h5[:, :, :, 0, :]                    # even input cols  (Bt, H, Wo, Cexp)
    c_odd = h5[:, :, :, 1, :]                     # odd  input cols

    def split_rows(a):
        a5 = a.reshape(Bt, Ho, 2, Wo, Cexp)
        return a5[:, :, 0], a5[:, :, 1]           # even rows, odd rows

    ee, oe = split_rows(c_even)                   # (Bt, Ho, Wo, Cexp)
    eo, oo = split_rows(c_odd)

    def shift_r(a):                               # a'[:, i] = a[:, i-1], zero at row 0
        return jnp.concatenate([jnp.zeros_like(a[:, :1]), a[:, :-1]], axis=1)

    def shift_c(a):                               # a'[:, :, j] = a[:, :, j-1], zero at col 0
        return jnp.concatenate([jnp.zeros_like(a[:, :, :1]), a[:, :, :-1]], axis=2)

    w = wdw_ref[...]                              # (3, 3, Cexp) f32
    acc = (w[0, 0] * shift_r(shift_c(oo)) + w[0, 1] * shift_r(oe) + w[0, 2] * shift_r(oo)
           + w[1, 0] * shift_c(eo) + w[1, 1] * ee + w[1, 2] * eo
           + w[2, 0] * shift_c(oo) + w[2, 1] * oe + w[2, 2] * oo)
    acc = jnp.clip(acc * s_dw + b_dw, 0.0, 6.0)   # (Bt, Ho, Wo, Cexp)

    # 1x1 project conv + folded BN (linear bottleneck), lane-dense (Cpad % 128 == 0) store.
    out = mm(acc.reshape(Bt * Ho * Wo, Cexp), wpj_ref[...]) * s_pj + b_pj
    o_ref[...] = out.reshape(Bt, Ho * Wo, Cpad)


# ----------------------------------------------------------------------------
# Parameter packing: fused QKV, per-head Wo rows, scale folding, bf16 cast,
# vector packing, and lane-dense padding of the project conv.
# ----------------------------------------------------------------------------
def prepare_params(params, num_heads, matmul_dtype=jnp.bfloat16):
    trans = params["trans"]
    C = trans[0]["wq"].shape[0]
    assert C % num_heads == 0
    hd = C // num_heads
    scale = 1.0 / math.sqrt(hd)

    wqkv, bqkv, woh, vec_c, vec_ff, w1s, w2s = [], [], [], [], [], [], []
    for p in trans:
        # fused (C, 3C) QKV weight; softmax scale folded into q columns/bias.
        wqkv.append(jnp.concatenate([p["wq"] * scale, p["wk"], p["wv"]], axis=1))
        bqkv.append(jnp.concatenate([p["bq"][0] * scale, p["bk"][0], p["bv"][0]], axis=0))
        for h in range(num_heads):                # output projection rows split per head
            woh.append(p["wo"][h * hd:(h + 1) * hd, :])
        vec_c.append(jnp.concatenate(
            [p["bo"], p["ln1_g"], p["ln1_b"], p["b2"], p["ln2_g"], p["ln2_b"]], axis=0))
        vec_ff.append(p["b1"][0])
        w1s.append(p["w1"])
        w2s.append(p["w2"])

    conv = params["conv"]
    # pad the 1x1-project output channels up to a multiple of 128 so the kernel's output
    # store is lane-dense (unmasked vst); padded columns produce zeros and are sliced away.
    w_pj, s_pj, b_pj = conv["w_pj"], conv["s_pj"], conv["b_pj"]
    cout = w_pj.shape[1]
    cpad = ((cout + 127) // 128) * 128
    if cpad != cout:
        w_pj = jnp.pad(w_pj, ((0, 0), (0, cpad - cout)))
        s_pj = jnp.pad(s_pj, ((0, 0), (0, cpad - cout)), constant_values=1.0)
        b_pj = jnp.pad(b_pj, ((0, 0), (0, cpad - cout)))

    return dict(
        w_qkv=jnp.stack(wqkv, 0).astype(matmul_dtype),       # (L, C, 3C)
        b_qkv=jnp.stack(bqkv, 0).astype(jnp.float32),        # (L, 3C)
        w_oh=jnp.stack(woh, 0).astype(matmul_dtype),          # (L*nh, hd, C)
        w1=jnp.stack(w1s, 0).astype(matmul_dtype),            # (L, C, FF)
        w2=jnp.stack(w2s, 0).astype(matmul_dtype),            # (L, FF, C)
        vec_c=jnp.stack(vec_c, 0).astype(jnp.float32),        # (L, 6, C)
        vec_ff=jnp.stack(vec_ff, 0).astype(jnp.float32),      # (L, FF)
        w_exp=conv["w_exp"].astype(matmul_dtype),              # (C, Cexp)
        w_dw=conv["w_dw"].astype(jnp.float32),                 # (3, 3, Cexp)
        w_pj=w_pj.astype(matmul_dtype),                        # (Cexp, Cpad)
        vec_cexp=jnp.concatenate([conv["s_exp"], conv["b_exp"],
                                  conv["s_dw"], conv["b_dw"]], 0).astype(jnp.float32),
        vec_cout=jnp.concatenate([s_pj, b_pj], 0).astype(jnp.float32),   # (2, Cpad)
    )


def _auto_batch_tile(B):
    # Fold several images per grid step (amortize ~0.35us/step, widen MXU M-dim) while
    # keeping >=2 grid steps when possible so v7x's two TensorCores both get work.
    if B % 2 == 0 and B >= 2:
        return B // 2
    return B


# ----------------------------------------------------------------------------
# Public forward: NCHW in -> NCHW out (one transpose each way, everything else fused).
# ----------------------------------------------------------------------------
def conv_former_block(x_nchw, packed, num_heads, num_out, batch_tile=None):
    B, C, H, W = x_nchw.shape
    assert H % 2 == 0 and W % 2 == 0
    S = H * W
    Ho, Wo = H // 2, W // 2
    L = packed["vec_c"].shape[0]
    FF = packed["w1"].shape[2]
    Cexp = packed["w_exp"].shape[1]
    Cpad = packed["w_pj"].shape[1]               # num_out padded to a multiple of 128
    hd = C // num_heads
    mm_dtype = packed["w_qkv"].dtype

    Bt = batch_tile if batch_tile is not None else _auto_batch_tile(B)
    assert B % Bt == 0
    nb = B // Bt

    # (B,C,H,W) -> (B, H*W, C): identical to torch `x.flatten(2).transpose(1,2)` and to
    # flattened NHWC, so the kernel needs no further layout changes.
    x_att = jnp.transpose(x_nchw, (0, 2, 3, 1)).reshape(B, S, C).astype(jnp.float32)

    weights = [packed["w_qkv"], packed["b_qkv"], packed["w_oh"],
               packed["w1"], packed["w2"], packed["vec_c"], packed["vec_ff"],
               packed["w_exp"], packed["w_dw"], packed["w_pj"],
               packed["vec_cexp"], packed["vec_cout"]]
    # Weights never change across the grid -> constant index maps.
    w_specs = [pl.BlockSpec(w.shape, lambda b, _n=w.ndim: (0,) * _n) for w in weights]

    # Advisory cost for XLA's scheduler (kernel is launch/latency bound at these sizes).
    Ntok = B * S
    flops = (L * (2 * Ntok * C * 3 * C                 # fused QKV
                  + 4 * B * num_heads * S * S * hd     # scores + P@V
                  + 2 * Ntok * C * C                   # output projection
                  + 4 * Ntok * C * FF)                 # FFN
             + 2 * Ntok * C * Cexp                     # 1x1 expand
             + 18 * B * Ho * Wo * Cexp                 # 3x3 depthwise
             + 2 * B * Ho * Wo * Cexp * Cpad)          # 1x1 project
    transc = L * (B * num_heads * S * S + 2 * Ntok)
    bytes_acc = (x_att.size * 4 + B * Ho * Wo * Cpad * 4
                 + sum(int(w.size) * w.dtype.itemsize for w in weights))

    kernel = partial(_convformer_kernel, L, num_heads, Bt, H, W, mm_dtype)
    out = pl.pallas_call(
        kernel,
        out_shape=jax.ShapeDtypeStruct((B, Ho * Wo, Cpad), jnp.float32),
        grid=(nb,),
        in_specs=[pl.BlockSpec((Bt, S, C), lambda b: (b, 0, 0))] + w_specs,
        out_specs=pl.BlockSpec((Bt, Ho * Wo, Cpad), lambda b: (b, 0, 0)),
        compiler_params=pltpu.CompilerParams(dimension_semantics=("parallel",)),
        cost_estimate=pl.CostEstimate(flops=int(flops), transcendentals=int(transc),
                                      bytes_accessed=int(bytes_acc)),
    )(x_att, *weights)

    # (B, Ho*Wo, Cpad) -> drop lane padding -> NCHW (slice fuses into the transpose).
    out = out[..., :num_out].reshape(B, Ho, Wo, num_out)
    return jnp.transpose(out, (0, 3, 1, 2))


# ----------------------------------------------------------------------------
# Deterministic synthetic parameter init (shapes from the module's __init__).
# Weight convention: kernels compute x @ W with W shaped (in, out); PyTorch checkpoints
# (out, in) must be transposed when porting real weights (and dw weight (Cexp,1,3,3) ->
# (3,3,Cexp)).
# ----------------------------------------------------------------------------
def init_params(key, num_in, num_out, expand_ratio=2, num_encoder=1):
    d = num_in
    ff = expand_ratio * num_in          # transformer dim_feedforward
    cexp = num_in * expand_ratio        # InvertedResidual hidden channels
    keys = iter(jax.random.split(key, 128))

    def nrm(shape, scale=0.05):
        return scale * jax.random.normal(next(keys), shape, dtype=jnp.float32)

    trans = []
    for _ in range(num_encoder):
        trans.append(dict(
            wq=nrm((d, d)), bq=nrm((1, d)),
            wk=nrm((d, d)), bk=nrm((1, d)),
            wv=nrm((d, d)), bv=nrm((1, d)),
            wo=nrm((d, d)), bo=nrm((1, d)),
            ln1_g=1.0 + nrm((1, d)), ln1_b=nrm((1, d)),
            w1=nrm((d, ff)), b1=nrm((1, ff)),
            w2=nrm((ff, d)), b2=nrm((1, d)),
            ln2_g=1.0 + nrm((1, d)), ln2_b=nrm((1, d)),
        ))
    # BatchNorm (eval) folded: s = gamma / sqrt(running_var + eps), b = beta - mean * s
    conv = dict(
        w_exp=nrm((num_in, cexp)),
        s_exp=1.0 + nrm((1, cexp)), b_exp=nrm((1, cexp)),
        w_dw=nrm((3, 3, cexp)),
        s_dw=1.0 + nrm((1, cexp)), b_dw=nrm((1, cexp)),
        w_pj=nrm((cexp, num_out)),
        s_pj=1.0 + nrm((1, num_out)), b_pj=nrm((1, num_out)),
    )
    return {"trans": trans, "conv": conv}


if __name__ == "__main__":
    key = jax.random.PRNGKey(0)
    k_x, k_p = jax.random.split(key)

    # num_in=32, num_out=64, num_heads=4, expand_ratio=2, num_encoder=1, reduce=1, stride=2
    B, C, H, W = 4, 32, 8, 8
    num_heads = 4
    num_out = 64

    x = jax.random.normal(k_x, (B, C, H, W), dtype=jnp.float32)
    params = init_params(k_p, num_in=C, num_out=num_out, expand_ratio=2, num_encoder=1)
    packed = prepare_params(params, num_heads, matmul_dtype=jnp.bfloat16)

    fwd = jax.jit(partial(conv_former_block, num_heads=num_heads, num_out=num_out))
    out = jax.block_until_ready(fwd(x, packed))

    assert out.shape == (B, num_out, H // 2, W // 2), out.shape
    assert bool(jnp.all(jnp.isfinite(out)))
    print("KERNEL_OK")
</pallas_src>

<mosaic_0001>
module attributes {stable_mosaic.version = 11 : i64} {
  func.func @_convformer_kernel(%arg0: i32, %arg1: memref<2x64x32xf32, #tpu.memory_space<vmem>>, %arg2: memref<1x32x96xbf16, #tpu.memory_space<vmem>>, %arg3: memref<1x96xf32, #tpu.memory_space<vmem>>, %arg4: memref<4x8x32xbf16, #tpu.memory_space<vmem>>, %arg5: memref<1x32x64xbf16, #tpu.memory_space<vmem>>, %arg6: memref<1x64x32xbf16, #tpu.memory_space<vmem>>, %arg7: memref<1x6x32xf32, #tpu.memory_space<vmem>>, %arg8: memref<1x64xf32, #tpu.memory_space<vmem>>, %arg9: memref<32x64xbf16, #tpu.memory_space<vmem>>, %arg10: memref<3x3x64xf32, #tpu.memory_space<vmem>>, %arg11: memref<64x128xbf16, #tpu.memory_space<vmem>>, %arg12: memref<4x64xf32, #tpu.memory_space<vmem>>, %arg13: memref<2x128xf32, #tpu.memory_space<vmem>>, %arg14: memref<2x16x128xf32, #tpu.memory_space<vmem>>) attributes {dimension_semantics = [#tpu.dimension_semantics<parallel>], iteration_bounds = array<i64: 2>, scalar_prefetch = 0 : i64, scratch_operands = 0 : i64, tpu.core_type = #tpu.core_type<tc>, window_params = [{transform_indices = @transform_0, window_bounds = array<i64: 2, 64, 32>}, {pipeline_mode = #tpu.pipeline_mode<synchronous>, transform_indices = @transform_1, window_bounds = array<i64: 1, 32, 96>}, {pipeline_mode = #tpu.pipeline_mode<synchronous>, transform_indices = @transform_2, window_bounds = array<i64: 1, 96>}, {pipeline_mode = #tpu.pipeline_mode<synchronous>, transform_indices = @transform_3, window_bounds = array<i64: 4, 8, 32>}, {pipeline_mode = #tpu.pipeline_mode<synchronous>, transform_indices = @transform_4, window_bounds = array<i64: 1, 32, 64>}, {pipeline_mode = #tpu.pipeline_mode<synchronous>, transform_indices = @transform_5, window_bounds = array<i64: 1, 64, 32>}, {pipeline_mode = #tpu.pipeline_mode<synchronous>, transform_indices = @transform_6, window_bounds = array<i64: 1, 6, 32>}, {pipeline_mode = #tpu.pipeline_mode<synchronous>, transform_indices = @transform_7, window_bounds = array<i64: 1, 64>}, {pipeline_mode = #tpu.pipeline_mode<synchronous>, transform_indices = @transform_8, window_bounds = array<i64: 32, 64>}, {pipeline_mode = #tpu.pipeline_mode<synchronous>, transform_indices = @transform_9, window_bounds = array<i64: 3, 3, 64>}, {pipeline_mode = #tpu.pipeline_mode<synchronous>, transform_indices = @transform_10, window_bounds = array<i64: 64, 128>}, {pipeline_mode = #tpu.pipeline_mode<synchronous>, transform_indices = @transform_11, window_bounds = array<i64: 4, 64>}, {pipeline_mode = #tpu.pipeline_mode<synchronous>, transform_indices = @transform_12, window_bounds = array<i64: 2, 128>}, {transform_indices = @transform_13, window_bounds = array<i64: 2, 16, 128>}]} {
    %c0 = arith.constant 0 : index
    %c0_0 = arith.constant 0 : index
    %c0_1 = arith.constant 0 : index
    %0 = vector.load %arg1[%c0, %c0_0, %c0_1] : memref<2x64x32xf32, #tpu.memory_space<vmem>>, vector<2x64x32xf32>
    %1 = vector.shape_cast %0 : vector<2x64x32xf32> to vector<128x32xf32>
    %c0_2 = arith.constant 0 : index
    %c0_3 = arith.constant 0 : index
    %c0_4 = arith.constant 0 : index
    %2 = vector.load %arg7[%c0_2, %c0_3, %c0_4] : memref<1x6x32xf32, #tpu.memory_space<vmem>>, vector<1x6x32xf32>
    %3 = vector.shape_cast %2 : vector<1x6x32xf32> to vector<6x32xf32>
    %4 = vector.extract_strided_slice %3 {offsets = [0, 0], sizes = [1, 32], strides = [1, 1]} : vector<6x32xf32> to vector<1x32xf32>
    %5 = vector.shape_cast %4 : vector<1x32xf32> to vector<32xf32>
    %6 = vector.extract_strided_slice %3 {offsets = [1, 0], sizes = [1, 32], strides = [1, 1]} : vector<6x32xf32> to vector<1x32xf32>
    %7 = vector.shape_cast %6 : vector<1x32xf32> to vector<32xf32>
    %8 = vector.extract_strided_slice %3 {offsets = [2, 0], sizes = [1, 32], strides = [1, 1]} : vector<6x32xf32> to vector<1x32xf32>
    %9 = vector.shape_cast %8 : vector<1x32xf32> to vector<32xf32>
    %10 = vector.extract_strided_slice %3 {offsets = [3, 0], sizes = [1, 32], strides = [1, 1]} : vector<6x32xf32> to vector<1x32xf32>
    %11 = vector.shape_cast %10 : vector<1x32xf32> to vector<32xf32>
    %12 = vector.extract_strided_slice %3 {offsets = [4, 0], sizes = [1, 32], strides = [1, 1]} : vector<6x32xf32> to vector<1x32xf32>
    %13 = vector.shape_cast %12 : vector<1x32xf32> to vector<32xf32>
    %14 = vector.extract_strided_slice %3 {offsets = [5, 0], sizes = [1, 32], strides = [1, 1]} : vector<6x32xf32> to vector<1x32xf32>
    %15 = vector.shape_cast %14 : vector<1x32xf32> to vector<32xf32>
    %c0_5 = arith.constant 0 : index
    %c0_6 = arith.constant 0 : index
    %16 = vector.load %arg8[%c0_5, %c0_6] : memref<1x64xf32, #tpu.memory_space<vmem>>, vector<1x64xf32>
    %17 = vector.shape_cast %16 : vector<1x64xf32> to vector<64xf32>
    %c0_7 = arith.constant 0 : index
    %c0_8 = arith.constant 0 : index
    %c0_9 = arith.constant 0 : index
    %18 = vector.load %arg2[%c0_7, %c0_8, %c0_9] : memref<1x32x96xbf16, #tpu.memory_space<vmem>>, vector<1x32x96xbf16>
    %19 = vector.shape_cast %18 : vector<1x32x96xbf16> to vector<32x96xbf16>
    %20 = arith.truncf %1 : vector<128x32xf32> to vector<128x32xbf16>
    %cst = arith.constant dense<0.000000e+00> : vector<128x96xf32>
    %21 = tpu.matmul %20, %19, %cst {dimension_numbers = #tpu.dot_dimension_numbers<[1], [0], [0], [1], [0, 0, 1, 1], [], []>} : vector<128x32xbf16>, vector<32x96xbf16>, vector<128x96xf32> -> vector<128x96xf32>
    %c0_10 = arith.constant 0 : index
    %c0_11 = arith.constant 0 : index
    %22 = vector.load %arg3[%c0_10, %c0_11] : memref<1x96xf32, #tpu.memory_space<vmem>>, vector<1x96xf32>
    %23 = vector.shape_cast %22 : vector<1x96xf32> to vector<96xf32>
    %24 = vector.shape_cast %23 : vector<96xf32> to vector<1x96xf32>
    %25 = vector.broadcast %24 : vector<1x96xf32> to vector<128x96xf32>
    %26 = arith.addf %21, %25 : vector<128x96xf32>
    %27 = arith.truncf %26 : vector<128x96xf32> to vector<128x96xbf16>
    %28 = vector.shape_cast %27 : vector<128x96xbf16> to vector<2x64x96xbf16>
    %29 = vector.extract_strided_slice %28 {offsets = [0, 0, 0], sizes = [2, 64, 8], strides = [1, 1, 1]} : vector<2x64x96xbf16> to vector<2x64x8xbf16>
    %30 = vector.extract_strided_slice %28 {offsets = [0, 0, 32], sizes = [2, 64, 8], strides = [1, 1, 1]} : vector<2x64x96xbf16> to vector<2x64x8xbf16>
    %31 = vector.extract_strided_slice %28 {offsets = [0, 0, 64], sizes = [2, 64, 8], strides = [1, 1, 1]} : vector<2x64x96xbf16> to vector<2x64x8xbf16>
    "tpu.trace_start"() <{level = 10 : i32, message = "bqd,bkd->bqk"}> : () -> ()
    %cst_12 = arith.constant dense<0.000000e+00> : vector<2x64x64xf32>
    %32 = tpu.matmul %29, %30, %cst_12 {dimension_numbers = #tpu.dot_dimension_numbers<[2], [2], [1], [1], [0, 0, 0, 1, 1, 1], [0], [0]>} : vector<2x64x8xbf16>, vector<2x64x8xbf16>, vector<2x64x64xf32> -> vector<2x64x64xf32>
    "tpu.trace_stop"() : () -> ()
    %cst_13 = arith.constant dense<0xFF800000> : vector<2x64xf32>
    %33 = vector.multi_reduction <maximumf>, %32, %cst_13 [2] : vector<2x64x64xf32> to vector<2x64xf32>
    %34 = vector.shape_cast %33 : vector<2x64xf32> to vector<2x64x1xf32>
    %35 = vector.broadcast %34 : vector<2x64x1xf32> to vector<2x64x64xf32>
    %36 = arith.subf %32, %35 : vector<2x64x64xf32>
    %37 = math.exp %36 : vector<2x64x64xf32>
    %cst_14 = arith.constant dense<0.000000e+00> : vector<2x64xf32>
    %38 = vector.multi_reduction <add>, %37, %cst_14 [2] : vector<2x64x64xf32> to vector<2x64xf32>
    %39 = vector.shape_cast %38 : vector<2x64xf32> to vector<2x64x1xf32>
    %40 = tpu.reciprocal %39 {approx = true} : vector<2x64x1xf32> -> vector<2x64x1xf32>
    %41 = vector.broadcast %40 : vector<2x64x1xf32> to vector<2x64x64xf32>
    %42 = arith.mulf %37, %41 : vector<2x64x64xf32>
    %43 = arith.truncf %42 : vector<2x64x64xf32> to vector<2x64x64xbf16>
    "tpu.trace_start"() <{level = 10 : i32, message = "bqk,bkd->bqd"}> : () -> ()
    %cst_15 = arith.constant dense<0.000000e+00> : vector<2x64x8xf32>
    %44 = tpu.matmul %43, %31, %cst_15 {dimension_numbers = #tpu.dot_dimension_numbers<[2], [1], [1], [2], [0, 0, 0, 1, 1, 2], [0], [0]>} : vector<2x64x64xbf16>, vector<2x64x8xbf16>, vector<2x64x8xf32> -> vector<2x64x8xf32>
    "tpu.trace_stop"() : () -> ()
    %45 = vector.shape_cast %44 : vector<2x64x8xf32> to vector<128x8xf32>
    %46 = arith.truncf %45 : vector<128x8xf32> to vector<128x8xbf16>
    %c0_16 = arith.constant 0 : index
    %c0_17 = arith.constant 0 : index
    %c0_18 = arith.constant 0 : index
    %47 = vector.load %arg4[%c0_16, %c0_17, %c0_18] : memref<4x8x32xbf16, #tpu.memory_space<vmem>>, vector<1x8x32xbf16>
    %48 = vector.shape_cast %47 : vector<1x8x32xbf16> to vector<8x32xbf16>
    %cst_19 = arith.constant dense<0.000000e+00> : vector<128x32xf32>
    %49 = tpu.matmul %46, %48, %cst_19 {dimension_numbers = #tpu.dot_dimension_numbers<[1], [0], [0], [1], [0, 0, 1, 1], [], []>} : vector<128x8xbf16>, vector<8x32xbf16>, vector<128x32xf32> -> vector<128x32xf32>
    %50 = vector.extract_strided_slice %28 {offsets = [0, 0, 8], sizes = [2, 64, 8], strides = [1, 1, 1]} : vector<2x64x96xbf16> to vector<2x64x8xbf16>
    %51 = vector.extract_strided_slice %28 {offsets = [0, 0, 40], sizes = [2, 64, 8], strides = [1, 1, 1]} : vector<2x64x96xbf16> to vector<2x64x8xbf16>
    %52 = vector.extract_strided_slice %28 {offsets = [0, 0, 72], sizes = [2, 64, 8], strides = [1, 1, 1]} : vector<2x64x96xbf16> to vector<2x64x8xbf16>
    "tpu.trace_start"() <{level = 10 : i32, message = "bqd,bkd->bqk"}> : () -> ()
    %cst_20 = arith.constant dense<0.000000e+00> : vector<2x64x64xf32>
    %53 = tpu.matmul %50, %51, %cst_20 {dimension_numbers = #tpu.dot_dimension_numbers<[2], [2], [1], [1], [0, 0, 0, 1, 1, 1], [0], [0]>} : vector<2x64x8xbf16>, vector<2x64x8xbf16>, vector<2x64x64xf32> -> vector<2x64x64xf32>
    "tpu.trace_stop"() : () -> ()
    %cst_21 = arith.constant dense<0xFF800000> : vector<2x64xf32>
    %54 = vector.multi_reduction <maximumf>, %53, %cst_21 [2] : vector<2x64x64xf32> to vector<2x64xf32>
    %55 = vector.shape_cast %54 : vector<2x64xf32> to vector<2x64x1xf32>
    %56 = vector.broadcast %55 : vector<2x64x1xf32> to vector<2x64x64xf32>
    %57 = arith.subf %53, %56 : vector<2x64x64xf32>
    %58 = math.exp %57 : vector<2x64x64xf32>
    %cst_22 = arith.constant dense<0.000000e+00> : vector<2x64xf32>
    %59 = vector.multi_reduction <add>, %58, %cst_22 [2] : vector<2x64x64xf32> to vector<2x64xf32>
    %60 = vector.shape_cast %59 : vector<2x64xf32> to vector<2x64x1xf32>
    %61 = tpu.reciprocal %60 {approx = true} : vector<2x64x1xf32> -> vector<2x64x1xf32>
    %62 = vector.broadcast %61 : vector<2x64x1xf32> to vector<2x64x64xf32>
    %63 = arith.mulf %58, %62 : vector<2x64x64xf32>
    %64 = arith.truncf %63 : vector<2x64x64xf32> to vector<2x64x64xbf16>
    "tpu.trace_start"() <{level = 10 : i32, message = "bqk,bkd->bqd"}> : () -> ()
    %cst_23 = arith.constant dense<0.000000e+00> : vector<2x64x8xf32>
    %65 = tpu.matmul %64, %52, %cst_23 {dimension_numbers = #tpu.dot_dimension_numbers<[2], [1], [1], [2], [0, 0, 0, 1, 1, 2], [0], [0]>} : vector<2x64x64xbf16>, vector<2x64x8xbf16>, vector<2x64x8xf32> -> vector<2x64x8xf32>
    "tpu.trace_stop"() : () -> ()
    %66 = vector.shape_cast %65 : vector<2x64x8xf32> to vector<128x8xf32>
    %67 = arith.truncf %66 : vector<128x8xf32> to vector<128x8xbf16>
    %c1 = arith.constant 1 : index
    %c0_24 = arith.constant 0 : index
    %c0_25 = arith.constant 0 : index
    %68 = vector.load %arg4[%c1, %c0_24, %c0_25] : memref<4x8x32xbf16, #tpu.memory_space<vmem>>, vector<1x8x32xbf16>
    %69 = vector.shape_cast %68 : vector<1x8x32xbf16> to vector<8x32xbf16>
    %cst_26 = arith.constant dense<0.000000e+00> : vector<128x32xf32>
    %70 = tpu.matmul %67, %69, %cst_26 {dimension_numbers = #tpu.dot_dimension_numbers<[1], [0], [0], [1], [0, 0, 1, 1], [], []>} : vector<128x8xbf16>, vector<8x32xbf16>, vector<128x32xf32> -> vector<128x32xf32>
    %71 = arith.addf %49, %70 : vector<128x32xf32>
    %72 = vector.extract_strided_slice %28 {offsets = [0, 0, 16], sizes = [2, 64, 8], strides = [1, 1, 1]} : vector<2x64x96xbf16> to vector<2x64x8xbf16>
    %73 = vector.extract_strided_slice %28 {offsets = [0, 0, 48], sizes = [2, 64, 8], strides = [1, 1, 1]} : vector<2x64x96xbf16> to vector<2x64x8xbf16>
    %74 = vector.extract_strided_slice %28 {offsets = [0, 0, 80], sizes = [2, 64, 8], strides = [1, 1, 1]} : vector<2x64x96xbf16> to vector<2x64x8xbf16>
    "tpu.trace_start"() <{level = 10 : i32, message = "bqd,bkd->bqk"}> : () -> ()
    %cst_27 = arith.constant dense<0.000000e+00> : vector<2x64x64xf32>
    %75 = tpu.matmul %72, %73, %cst_27 {dimension_numbers = #tpu.dot_dimension_numbers<[2], [2], [1], [1], [0, 0, 0, 1, 1, 1], [0], [0]>} : vector<2x64x8xbf16>, vector<2x64x8xbf16>, vector<2x64x64xf32> -> vector<2x64x64xf32>
    "tpu.trace_stop"() : () -> ()
    %cst_28 = arith.constant dense<0xFF800000> : vector<2x64xf32>
    %76 = vector.multi_reduction <maximumf>, %75, %cst_28 [2] : vector<2x64x64xf32> to vector<2x64xf32>
    %77 = vector.shape_cast %76 : vector<2x64xf32> to vector<2x64x1xf32>
    %78 = vector.broadcast %77 : vector<2x64x1xf32> to vector<2x64x64xf32>
    %79 = arith.subf %75, %78 : vector<2x64x64xf32>
    %80 = math.exp %79 : vector<2x64x64xf32>
    %cst_29 = arith.constant dense<0.000000e+00> : vector<2x64xf32>
    %81 = vector.multi_reduction <add>, %80, %cst_29 [2] : vector<2x64x64xf32> to vector<2x64xf32>
    %82 = vector.shape_cast %81 : vector<2x64xf32> to vector<2x64x1xf32>
    %83 = tpu.reciprocal %82 {approx = true} : vector<2x64x1xf32> -> vector<2x64x1xf32>
    %84 = vector.broadcast %83 : vector<2x64x1xf32> to vector<2x64x64xf32>
    %85 = arith.mulf %80, %84 : vector<2x64x64xf32>
    %86 = arith.truncf %85 : vector<2x64x64xf32> to vector<2x64x64xbf16>
    "tpu.trace_start"() <{level = 10 : i32, message = "bqk,bkd->bqd"}> : () -> ()
    %cst_30 = arith.constant dense<0.000000e+00> : vector<2x64x8xf32>
    %87 = tpu.matmul %86, %74, %cst_30 {dimension_numbers = #tpu.dot_dimension_numbers<[2], [1], [1], [2], [0, 0, 0, 1, 1, 2], [0], [0]>} : vector<2x64x64xbf16>, vector<2x64x8xbf16>, vector<2x64x8xf32> -> vector<2x64x8xf32>
    "tpu.trace_stop"() : () -> ()
    %88 = vector.shape_cast %87 : vector<2x64x8xf32> to vector<128x8xf32>
    %89 = arith.truncf %88 : vector<128x8xf32> to vector<128x8xbf16>
    %c2 = arith.constant 2 : index
    %c0_31 = arith.constant 0 : index
    %c0_32 = arith.constant 0 : index
    %90 = vector.load %arg4[%c2, %c0_31, %c0_32] : memref<4x8x32xbf16, #tpu.memory_space<vmem>>, vector<1x8x32xbf16>
    %91 = vector.shape_cast %90 : vector<1x8x32xbf16> to vector<8x32xbf16>
    %cst_33 = arith.constant dense<0.000000e+00> : vector<128x32xf32>
    %92 = tpu.matmul %89, %91, %cst_33 {dimension_numbers = #tpu.dot_dimension_numbers<[1], [0], [0], [1], [0, 0, 1, 1], [], []>} : vector<128x8xbf16>, vector<8x32xbf16>, vector<128x32xf32> -> vector<128x32xf32>
    %93 = arith.addf %71, %92 : vector<128x32xf32>
    %94 = vector.extract_strided_slice %28 {offsets = [0, 0, 24], sizes = [2, 64, 8], strides = [1, 1, 1]} : vector<2x64x96xbf16> to vector<2x64x8xbf16>
    %95 = vector.extract_strided_slice %28 {offsets = [0, 0, 56], sizes = [2, 64, 8], strides = [1, 1, 1]} : vector<2x64x96xbf16> to vector<2x64x8xbf16>
    %96 = vector.extract_strided_slice %28 {offsets = [0, 0, 88], sizes = [2, 64, 8], strides = [1, 1, 1]} : vector<2x64x96xbf16> to vector<2x64x8xbf16>
    "tpu.trace_start"() <{level = 10 : i32, message = "bqd,bkd->bqk"}> : () -> ()
    %cst_34 = arith.constant dense<0.000000e+00> : vector<2x64x64xf32>
    %97 = tpu.matmul %94, %95, %cst_34 {dimension_numbers = #tpu.dot_dimension_numbers<[2], [2], [1], [1], [0, 0, 0, 1, 1, 1], [0], [0]>} : vector<2x64x8xbf16>, vector<2x64x8xbf16>, vector<2x64x64xf32> -> vector<2x64x64xf32>
    "tpu.trace_stop"() : () -> ()
    %cst_35 = arith.constant dense<0xFF800000> : vector<2x64xf32>
    %98 = vector.multi_reduction <maximumf>, %97, %cst_35 [2] : vector<2x64x64xf32> to vector<2x64xf32>
    %99 = vector.shape_cast %98 : vector<2x64xf32> to vector<2x64x1xf32>
    %100 = vector.broadcast %99 : vector<2x64x1xf32> to vector<2x64x64xf32>
    %101 = arith.subf %97, %100 : vector<2x64x64xf32>
    %102 = math.exp %101 : vector<2x64x64xf32>
    %cst_36 = arith.constant dense<0.000000e+00> : vector<2x64xf32>
    %103 = vector.multi_reduction <add>, %102, %cst_36 [2] : vector<2x64x64xf32> to vector<2x64xf32>
    %104 = vector.shape_cast %103 : vector<2x64xf32> to vector<2x64x1xf32>
    %105 = tpu.reciprocal %104 {approx = true} : vector<2x64x1xf32> -> vector<2x64x1xf32>
    %106 = vector.broadcast %105 : vector<2x64x1xf32> to vector<2x64x64xf32>
    %107 = arith.mulf %102, %106 : vector<2x64x64xf32>
    %108 = arith.truncf %107 : vector<2x64x64xf32> to vector<2x64x64xbf16>
    "tpu.trace_start"() <{level = 10 : i32, message = "bqk,bkd->bqd"}> : () -> ()
    %cst_37 = arith.constant dense<0.000000e+00> : vector<2x64x8xf32>
    %109 = tpu.matmul %108, %96, %cst_37 {dimension_numbers = #tpu.dot_dimension_numbers<[2], [1], [1], [2], [0, 0, 0, 1, 1, 2], [0], [0]>} : vector<2x64x64xbf16>, vector<2x64x8xbf16>, vector<2x64x8xf32> -> vector<2x64x8xf32>
    "tpu.trace_stop"() : () -> ()
    %110 = vector.shape_cast %109 : vector<2x64x8xf32> to vector<128x8xf32>
    %111 = arith.truncf %110 : vector<128x8xf32> to vector<128x8xbf16>
    %c3 = arith.constant 3 : index
    %c0_38 = arith.constant 0 : index
    %c0_39 = arith.constant 0 : index
    %112 = vector.load %arg4[%c3, %c0_38, %c0_39] : memref<4x8x32xbf16, #tpu.memory_space<vmem>>, vector<1x8x32xbf16>
    %113 = vector.shape_cast %112 : vector<1x8x32xbf16> to vector<8x32xbf16>
    %cst_40 = arith.constant dense<0.000000e+00> : vector<128x32xf32>
    %114 = tpu.matmul %111, %113, %cst_40 {dimension_numbers = #tpu.dot_dimension_numbers<[1], [0], [0], [1], [0, 0, 1, 1], [], []>} : vector<128x8xbf16>, vector<8x32xbf16>, vector<128x32xf32> -> vector<128x32xf32>
    %115 = arith.addf %93, %114 : vector<128x32xf32>
    %116 = vector.shape_cast %5 : vector<32xf32> to vector<1x32xf32>
    %117 = vector.broadcast %116 : vector<1x32xf32> to vector<128x32xf32>
    %118 = arith.addf %115, %117 : vector<128x32xf32>
    %119 = arith.addf %1, %118 : vector<128x32xf32>
    %cst_41 = arith.constant dense<0.000000e+00> : vector<128xf32>
    %120 = vector.multi_reduction <add>, %119, %cst_41 [1] : vector<128x32xf32> to vector<128xf32>
    %121 = vector.shape_cast %120 : vector<128xf32> to vector<128x1xf32>
    %cst_42 = arith.constant 3.200000e+01 : f32
    %122 = vector.broadcast %cst_42 : f32 to vector<128x1xf32>
    %123 = arith.divf %121, %122 : vector<128x1xf32>
    %124 = vector.broadcast %123 : vector<128x1xf32> to vector<128x32xf32>
    %125 = arith.subf %119, %124 : vector<128x32xf32>
    %126 = arith.mulf %125, %125 : vector<128x32xf32>
    %cst_43 = arith.constant dense<0.000000e+00> : vector<128xf32>
    %127 = vector.multi_reduction <add>, %126, %cst_43 [1] : vector<128x32xf32> to vector<128xf32>
    %128 = vector.shape_cast %127 : vector<128xf32> to vector<128x1xf32>
    %cst_44 = arith.constant 3.200000e+01 : f32
    %129 = vector.broadcast %cst_44 : f32 to vector<128x1xf32>
    %130 = arith.divf %128, %129 : vector<128x1xf32>
    %131 = vector.broadcast %123 : vector<128x1xf32> to vector<128x32xf32>
    %132 = arith.subf %119, %131 : vector<128x32xf32>
    %cst_45 = arith.constant 9.99999974E-6 : f32
    %133 = vector.broadcast %cst_45 : f32 to vector<128x1xf32>
    %134 = arith.addf %130, %133 : vector<128x1xf32>
    %135 = math.rsqrt %134 : vector<128x1xf32>
    %136 = vector.broadcast %135 : vector<128x1xf32> to vector<128x32xf32>
    %137 = arith.mulf %132, %136 : vector<128x32xf32>
    %138 = vector.shape_cast %7 : vector<32xf32> to vector<1x32xf32>
    %139 = vector.broadcast %138 : vector<1x32xf32> to vector<128x32xf32>
    %140 = arith.mulf %137, %139 : vector<128x32xf32>
    %141 = vector.shape_cast %9 : vector<32xf32> to vector<1x32xf32>
    %142 = vector.broadcast %141 : vector<1x32xf32> to vector<128x32xf32>
    %143 = arith.addf %140, %142 : vector<128x32xf32>
    %c0_46 = arith.constant 0 : index
    %c0_47 = arith.constant 0 : index
    %c0_48 = arith.constant 0 : index
    %144 = vector.load %arg5[%c0_46, %c0_47, %c0_48] : memref<1x32x64xbf16, #tpu.memory_space<vmem>>, vector<1x32x64xbf16>
    %145 = vector.shape_cast %144 : vector<1x32x64xbf16> to vector<32x64xbf16>
    %146 = arith.truncf %143 : vector<128x32xf32> to vector<128x32xbf16>
    %cst_49 = arith.constant dense<0.000000e+00> : vector<128x64xf32>
    %147 = tpu.matmul %146, %145, %cst_49 {dimension_numbers = #tpu.dot_dimension_numbers<[1], [0], [0], [1], [0, 0, 1, 1], [], []>} : vector<128x32xbf16>, vector<32x64xbf16>, vector<128x64xf32> -> vector<128x64xf32>
    %148 = vector.shape_cast %17 : vector<64xf32> to vector<1x64xf32>
    %149 = vector.broadcast %148 : vector<1x64xf32> to vector<128x64xf32>
    %150 = arith.addf %147, %149 : vector<128x64xf32>
    %cst_50 = arith.constant 0.000000e+00 : f32
    %151 = vector.broadcast %cst_50 : f32 to vector<128x64xf32>
    %152 = arith.maximumf %150, %151 : vector<128x64xf32>
    %c0_51 = arith.constant 0 : index
    %c0_52 = arith.constant 0 : index
    %c0_53 = arith.constant 0 : index
    %153 = vector.load %arg6[%c0_51, %c0_52, %c0_53] : memref<1x64x32xbf16, #tpu.memory_space<vmem>>, vector<1x64x32xbf16>
    %154 = vector.shape_cast %153 : vector<1x64x32xbf16> to vector<64x32xbf16>
    %155 = arith.truncf %152 : vector<128x64xf32> to vector<128x64xbf16>
    %cst_54 = arith.constant dense<0.000000e+00> : vector<128x32xf32>
    %156 = tpu.matmul %155, %154, %cst_54 {dimension_numbers = #tpu.dot_dimension_numbers<[1], [0], [0], [1], [0, 0, 1, 1], [], []>} : vector<128x64xbf16>, vector<64x32xbf16>, vector<128x32xf32> -> vector<128x32xf32>
    %157 = vector.shape_cast %11 : vector<32xf32> to vector<1x32xf32>
    %158 = vector.broadcast %157 : vector<1x32xf32> to vector<128x32xf32>
    %159 = arith.addf %156, %158 : vector<128x32xf32>
    %160 = arith.addf %143, %159 : vector<128x32xf32>
    %cst_55 = arith.constant dense<0.000000e+00> : vector<128xf32>
    %161 = vector.multi_reduction <add>, %160, %cst_55 [1] : vector<128x32xf32> to vector<128xf32>
    %162 = vector.shape_cast %161 : vector<128xf32> to vector<128x1xf32>
    %cst_56 = arith.constant 3.200000e+01 : f32
    %163 = vector.broadcast %cst_56 : f32 to vector<128x1xf32>
    %164 = arith.divf %162, %163 : vector<128x1xf32>
    %165 = vector.broadcast %164 : vector<128x1xf32> to vector<128x32xf32>
    %166 = arith.subf %160, %165 : vector<128x32xf32>
    %167 = arith.mulf %166, %166 : vector<128x32xf32>
    %cst_57 = arith.constant dense<0.000000e+00> : vector<128xf32>
    %168 = vector.multi_reduction <add>, %167, %cst_57 [1] : vector<128x32xf32> to vector<128xf32>
    %169 = vector.shape_cast %168 : vector<128xf32> to vector<128x1xf32>
    %cst_58 = arith.constant 3.200000e+01 : f32
    %170 = vector.broadcast %cst_58 : f32 to vector<128x1xf32>
    %171 = arith.divf %169, %170 : vector<128x1xf32>
    %172 = vector.broadcast %164 : vector<128x1xf32> to vector<128x32xf32>
    %173 = arith.subf %160, %172 : vector<128x32xf32>
    %cst_59 = arith.constant 9.99999974E-6 : f32
    %174 = vector.broadcast %cst_59 : f32 to vector<128x1xf32>
    %175 = arith.addf %171, %174 : vector<128x1xf32>
    %176 = math.rsqrt %175 : vector<128x1xf32>
    %177 = vector.broadcast %176 : vector<128x1xf32> to vector<128x32xf32>
    %178 = arith.mulf %173, %177 : vector<128x32xf32>
    %179 = vector.shape_cast %13 : vector<32xf32> to vector<1x32xf32>
    %180 = vector.broadcast %179 : vector<1x32xf32> to vector<128x32xf32>
    %181 = arith.mulf %178, %180 : vector<128x32xf32>
    %182 = vector.shape_cast %15 : vector<32xf32> to vector<1x32xf32>
    %183 = vector.broadcast %182 : vector<1x32xf32> to vector<128x32xf32>
    %184 = arith.addf %181, %183 : vector<128x32xf32>
    %185 = arith.addf %1, %184 : vector<128x32xf32>
    %c0_60 = arith.constant 0 : index
    %c0_61 = arith.constant 0 : index
    %186 = vector.load %arg12[%c0_60, %c0_61] : memref<4x64xf32, #tpu.memory_space<vmem>>, vector<1x64xf32>
    %187 = vector.shape_cast %186 : vector<1x64xf32> to vector<64xf32>
    %c1_62 = arith.constant 1 : index
    %c0_63 = arith.constant 0 : index
    %188 = vector.load %arg12[%c1_62, %c0_63] : memref<4x64xf32, #tpu.memory_space<vmem>>, vector<1x64xf32>
    %189 = vector.shape_cast %188 : vector<1x64xf32> to vector<64xf32>
    %c2_64 = arith.constant 2 : index
    %c0_65 = arith.constant 0 : index
    %190 = vector.load %arg12[%c2_64, %c0_65] : memref<4x64xf32, #tpu.memory_space<vmem>>, vector<1x64xf32>
    %191 = vector.shape_cast %190 : vector<1x64xf32> to vector<64xf32>
    %c3_66 = arith.constant 3 : index
    %c0_67 = arith.constant 0 : index
    %192 = vector.load %arg12[%c3_66, %c0_67] : memref<4x64xf32, #tpu.memory_space<vmem>>, vector<1x64xf32>
    %193 = vector.shape_cast %192 : vector<1x64xf32> to vector<64xf32>
    %c0_68 = arith.constant 0 : index
    %c0_69 = arith.constant 0 : index
    %194 = vector.load %arg13[%c0_68, %c0_69] : memref<2x128xf32, #tpu.memory_space<vmem>>, vector<1x128xf32>
    %195 = vector.shape_cast %194 : vector<1x128xf32> to vector<128xf32>
    %c1_70 = arith.constant 1 : index
    %c0_71 = arith.constant 0 : index
    %196 = vector.load %arg13[%c1_70, %c0_71] : memref<2x128xf32, #tpu.memory_space<vmem>>, vector<1x128xf32>
    %197 = vector.shape_cast %196 : vector<1x128xf32> to vector<128xf32>
    %c0_72 = arith.constant 0 : index
    %c0_73 = arith.constant 0 : index
    %198 = vector.load %arg9[%c0_72, %c0_73] : memref<32x64xbf16, #tpu.memory_space<vmem>>, vector<32x64xbf16>
    %199 = arith.truncf %185 : vector<128x32xf32> to vector<128x32xbf16>
    %cst_74 = arith.constant dense<0.000000e+00> : vector<128x64xf32>
    %200 = tpu.matmul %199, %198, %cst_74 {dimension_numbers = #tpu.dot_dimension_numbers<[1], [0], [0], [1], [0, 0, 1, 1], [], []>} : vector<128x32xbf16>, vector<32x64xbf16>, vector<128x64xf32> -> vector<128x64xf32>
    %201 = vector.shape_cast %187 : vector<64xf32> to vector<1x64xf32>
    %202 = vector.broadcast %201 : vector<1x64xf32> to vector<128x64xf32>
    %203 = arith.mulf %200, %202 : vector<128x64xf32>
    %204 = vector.shape_cast %189 : vector<64xf32> to vector<1x64xf32>
    %205 = vector.broadcast %204 : vector<1x64xf32> to vector<128x64xf32>
    %206 = arith.addf %203, %205 : vector<128x64xf32>
    %cst_75 = arith.constant 0.000000e+00 : f32
    %cst_76 = arith.constant 6.000000e+00 : f32
    %207 = vector.broadcast %cst_75 : f32 to vector<128x64xf32>
    %208 = arith.maximumf %207, %206 : vector<128x64xf32>
    %209 = vector.broadcast %cst_76 : f32 to vector<128x64xf32>
    %210 = arith.minimumf %209, %208 : vector<128x64xf32>
    %211 = vector.shape_cast %210 : vector<128x64xf32> to vector<2x8x4x2x64xf32>
    %212 = vector.extract_strided_slice %211 {offsets = [0, 0, 0, 0, 0], sizes = [2, 8, 4, 1, 64], strides = [1, 1, 1, 1, 1]} : vector<2x8x4x2x64xf32> to vector<2x8x4x1x64xf32>
    %213 = vector.shape_cast %212 : vector<2x8x4x1x64xf32> to vector<2x8x4x64xf32>
    %214 = vector.extract_strided_slice %211 {offsets = [0, 0, 0, 1, 0], sizes = [2, 8, 4, 1, 64], strides = [1, 1, 1, 1, 1]} : vector<2x8x4x2x64xf32> to vector<2x8x4x1x64xf32>
    %215 = vector.shape_cast %214 : vector<2x8x4x1x64xf32> to vector<2x8x4x64xf32>
    %216 = vector.shape_cast %213 : vector<2x8x4x64xf32> to vector<2x4x2x4x64xf32>
    %217 = vector.extract_strided_slice %216 {offsets = [0, 0, 0, 0, 0], sizes = [2, 4, 1, 4, 64], strides = [1, 1, 1, 1, 1]} : vector<2x4x2x4x64xf32> to vector<2x4x1x4x64xf32>
    %218 = vector.shape_cast %217 : vector<2x4x1x4x64xf32> to vector<2x4x4x64xf32>
    %219 = vector.extract_strided_slice %216 {offsets = [0, 0, 1, 0, 0], sizes = [2, 4, 1, 4, 64], strides = [1, 1, 1, 1, 1]} : vector<2x4x2x4x64xf32> to vector<2x4x1x4x64xf32>
    %220 = vector.shape_cast %219 : vector<2x4x1x4x64xf32> to vector<2x4x4x64xf32>
    %221 = vector.shape_cast %215 : vector<2x8x4x64xf32> to vector<2x4x2x4x64xf32>
    %222 = vector.extract_strided_slice %221 {offsets = [0, 0, 0, 0, 0], sizes = [2, 4, 1, 4, 64], strides = [1, 1, 1, 1, 1]} : vector<2x4x2x4x64xf32> to vector<2x4x1x4x64xf32>
    %223 = vector.shape_cast %222 : vector<2x4x1x4x64xf32> to vector<2x4x4x64xf32>
    %224 = vector.extract_strided_slice %221 {offsets = [0, 0, 1, 0, 0], sizes = [2, 4, 1, 4, 64], strides = [1, 1, 1, 1, 1]} : vector<2x4x2x4x64xf32> to vector<2x4x1x4x64xf32>
    %225 = vector.shape_cast %224 : vector<2x4x1x4x64xf32> to vector<2x4x4x64xf32>
    %c0_77 = arith.constant 0 : index
    %c0_78 = arith.constant 0 : index
    %c0_79 = arith.constant 0 : index
    %226 = vector.load %arg10[%c0_77, %c0_78, %c0_79] : memref<3x3x64xf32, #tpu.memory_space<vmem>>, vector<3x3x64xf32>
    %227 = vector.extract_strided_slice %226 {offsets = [0, 0, 0], sizes = [1, 1, 64], strides = [1, 1, 1]} : vector<3x3x64xf32> to vector<1x1x64xf32>
    %228 = vector.shape_cast %227 : vector<1x1x64xf32> to vector<64xf32>
    %cst_80 = arith.constant 0.000000e+00 : f32
    %229 = vector.broadcast %cst_80 : f32 to vector<2x4x1x64xf32>
    %230 = vector.extract_strided_slice %225 {offsets = [0, 0, 0, 0], sizes = [2, 4, 3, 64], strides = [1, 1, 1, 1]} : vector<2x4x4x64xf32> to vector<2x4x3x64xf32>
    %231 = tpu.concatenate %229, %230 in 2 : vector<2x4x1x64xf32>, vector<2x4x3x64xf32> -> vector<2x4x4x64xf32>
    %cst_81 = arith.constant 0.000000e+00 : f32
    %232 = vector.broadcast %cst_81 : f32 to vector<2x1x4x64xf32>
    %233 = vector.extract_strided_slice %231 {offsets = [0, 0, 0, 0], sizes = [2, 3, 4, 64], strides = [1, 1, 1, 1]} : vector<2x4x4x64xf32> to vector<2x3x4x64xf32>
    %234 = tpu.concatenate %232, %233 in 1 : vector<2x1x4x64xf32>, vector<2x3x4x64xf32> -> vector<2x4x4x64xf32>
    %235 = vector.shape_cast %228 : vector<64xf32> to vector<1x1x1x64xf32>
    %236 = vector.broadcast %235 : vector<1x1x1x64xf32> to vector<2x4x4x64xf32>
    %237 = arith.mulf %236, %234 : vector<2x4x4x64xf32>
    %238 = vector.extract_strided_slice %226 {offsets = [0, 1, 0], sizes = [1, 1, 64], strides = [1, 1, 1]} : vector<3x3x64xf32> to vector<1x1x64xf32>
    %239 = vector.shape_cast %238 : vector<1x1x64xf32> to vector<64xf32>
    %cst_82 = arith.constant 0.000000e+00 : f32
    %240 = vector.broadcast %cst_82 : f32 to vector<2x1x4x64xf32>
    %241 = vector.extract_strided_slice %220 {offsets = [0, 0, 0, 0], sizes = [2, 3, 4, 64], strides = [1, 1, 1, 1]} : vector<2x4x4x64xf32> to vector<2x3x4x64xf32>
    %242 = tpu.concatenate %240, %241 in 1 : vector<2x1x4x64xf32>, vector<2x3x4x64xf32> -> vector<2x4x4x64xf32>
    %243 = vector.shape_cast %239 : vector<64xf32> to vector<1x1x1x64xf32>
    %244 = vector.broadcast %243 : vector<1x1x1x64xf32> to vector<2x4x4x64xf32>
    %245 = arith.mulf %244, %242 : vector<2x4x4x64xf32>
    %246 = arith.addf %237, %245 : vector<2x4x4x64xf32>
    %247 = vector.extract_strided_slice %226 {offsets = [0, 2, 0], sizes = [1, 1, 64], strides = [1, 1, 1]} : vector<3x3x64xf32> to vector<1x1x64xf32>
    %248 = vector.shape_cast %247 : vector<1x1x64xf32> to vector<64xf32>
    %cst_83 = arith.constant 0.000000e+00 : f32
    %249 = vector.broadcast %cst_83 : f32 to vector<2x1x4x64xf32>
    %250 = vector.extract_strided_slice %225 {offsets = [0, 0, 0, 0], sizes = [2, 3, 4, 64], strides = [1, 1, 1, 1]} : vector<2x4x4x64xf32> to vector<2x3x4x64xf32>
    %251 = tpu.concatenate %249, %250 in 1 : vector<2x1x4x64xf32>, vector<2x3x4x64xf32> -> vector<2x4x4x64xf32>
    %252 = vector.shape_cast %248 : vector<64xf32> to vector<1x1x1x64xf32>
    %253 = vector.broadcast %252 : vector<1x1x1x64xf32> to vector<2x4x4x64xf32>
    %254 = arith.mulf %253, %251 : vector<2x4x4x64xf32>
    %255 = arith.addf %246, %254 : vector<2x4x4x64xf32>
    %256 = vector.extract_strided_slice %226 {offsets = [1, 0, 0], sizes = [1, 1, 64], strides = [1, 1, 1]} : vector<3x3x64xf32> to vector<1x1x64xf32>
    %257 = vector.shape_cast %256 : vector<1x1x64xf32> to vector<64xf32>
    %cst_84 = arith.constant 0.000000e+00 : f32
    %258 = vector.broadcast %cst_84 : f32 to vector<2x4x1x64xf32>
    %259 = vector.extract_strided_slice %223 {offsets = [0, 0, 0, 0], sizes = [2, 4, 3, 64], strides = [1, 1, 1, 1]} : vector<2x4x4x64xf32> to vector<2x4x3x64xf32>
    %260 = tpu.concatenate %258, %259 in 2 : vector<2x4x1x64xf32>, vector<2x4x3x64xf32> -> vector<2x4x4x64xf32>
    %261 = vector.shape_cast %257 : vector<64xf32> to vector<1x1x1x64xf32>
    %262 = vector.broadcast %261 : vector<1x1x1x64xf32> to vector<2x4x4x64xf32>
    %263 = arith.mulf %262, %260 : vector<2x4x4x64xf32>
    %264 = arith.addf %255, %263 : vector<2x4x4x64xf32>
    %265 = vector.extract_strided_slice %226 {offsets = [1, 1, 0], sizes = [1, 1, 64], strides = [1, 1, 1]} : vector<3x3x64xf32> to vector<1x1x64xf32>
    %266 = vector.shape_cast %265 : vector<1x1x64xf32> to vector<64xf32>
    %267 = vector.shape_cast %266 : vector<64xf32> to vector<1x1x1x64xf32>
    %268 = vector.broadcast %267 : vector<1x1x1x64xf32> to vector<2x4x4x64xf32>
    %269 = arith.mulf %268, %218 : vector<2x4x4x64xf32>
    %270 = arith.addf %264, %269 : vector<2x4x4x64xf32>
    %271 = vector.extract_strided_slice %226 {offsets = [1, 2, 0], sizes = [1, 1, 64], strides = [1, 1, 1]} : vector<3x3x64xf32> to vector<1x1x64xf32>
    %272 = vector.shape_cast %271 : vector<1x1x64xf32> to vector<64xf32>
    %273 = vector.shape_cast %272 : vector<64xf32> to vector<1x1x1x64xf32>
    %274 = vector.broadcast %273 : vector<1x1x1x64xf32> to vector<2x4x4x64xf32>
    %275 = arith.mulf %274, %223 : vector<2x4x4x64xf32>
    %276 = arith.addf %270, %275 : vector<2x4x4x64xf32>
    %277 = vector.extract_strided_slice %226 {offsets = [2, 0, 0], sizes = [1, 1, 64], strides = [1, 1, 1]} : vector<3x3x64xf32> to vector<1x1x64xf32>
    %278 = vector.shape_cast %277 : vector<1x1x64xf32> to vector<64xf32>
    %cst_85 = arith.constant 0.000000e+00 : f32
    %279 = vector.broadcast %cst_85 : f32 to vector<2x4x1x64xf32>
    %280 = vector.extract_strided_slice %225 {offsets = [0, 0, 0, 0], sizes = [2, 4, 3, 64], strides = [1, 1, 1, 1]} : vector<2x4x4x64xf32> to vector<2x4x3x64xf32>
    %281 = tpu.concatenate %279, %280 in 2 : vector<2x4x1x64xf32>, vector<2x4x3x64xf32> -> vector<2x4x4x64xf32>
    %282 = vector.shape_cast %278 : vector<64xf32> to vector<1x1x1x64xf32>
    %283 = vector.broadcast %282 : vector<1x1x1x64xf32> to vector<2x4x4x64xf32>
    %284 = arith.mulf %283, %281 : vector<2x4x4x64xf32>
    %285 = arith.addf %276, %284 : vector<2x4x4x64xf32>
    %286 = vector.extract_strided_slice %226 {offsets = [2, 1, 0], sizes = [1, 1, 64], strides = [1, 1, 1]} : vector<3x3x64xf32> to vector<1x1x64xf32>
    %287 = vector.shape_cast %286 : vector<1x1x64xf32> to vector<64xf32>
    %288 = vector.shape_cast %287 : vector<64xf32> to vector<1x1x1x64xf32>
    %289 = vector.broadcast %288 : vector<1x1x1x64xf32> to vector<2x4x4x64xf32>
    %290 = arith.mulf %289, %220 : vector<2x4x4x64xf32>
    %291 = arith.addf %285, %290 : vector<2x4x4x64xf32>
    %292 = vector.extract_strided_slice %226 {offsets = [2, 2, 0], sizes = [1, 1, 64], strides = [1, 1, 1]} : vector<3x3x64xf32> to vector<1x1x64xf32>
    %293 = vector.shape_cast %292 : vector<1x1x64xf32> to vector<64xf32>
    %294 = vector.shape_cast %293 : vector<64xf32> to vector<1x1x1x64xf32>
    %295 = vector.broadcast %294 : vector<1x1x1x64xf32> to vector<2x4x4x64xf32>
    %296 = arith.mulf %295, %225 : vector<2x4x4x64xf32>
    %297 = arith.addf %291, %296 : vector<2x4x4x64xf32>
    %298 = vector.shape_cast %191 : vector<64xf32> to vector<1x1x1x64xf32>
    %299 = vector.broadcast %298 : vector<1x1x1x64xf32> to vector<2x4x4x64xf32>
    %300 = arith.mulf %297, %299 : vector<2x4x4x64xf32>
    %301 = vector.shape_cast %193 : vector<64xf32> to vector<1x1x1x64xf32>
    %302 = vector.broadcast %301 : vector<1x1x1x64xf32> to vector<2x4x4x64xf32>
    %303 = arith.addf %300, %302 : vector<2x4x4x64xf32>
    %cst_86 = arith.constant 0.000000e+00 : f32
    %cst_87 = arith.constant 6.000000e+00 : f32
    %304 = vector.broadcast %cst_86 : f32 to vector<2x4x4x64xf32>
    %305 = arith.maximumf %304, %303 : vector<2x4x4x64xf32>
    %306 = vector.broadcast %cst_87 : f32 to vector<2x4x4x64xf32>
    %307 = arith.minimumf %306, %305 : vector<2x4x4x64xf32>
    %308 = vector.shape_cast %307 : vector<2x4x4x64xf32> to vector<32x64xf32>
    %c0_88 = arith.constant 0 : index
    %c0_89 = arith.constant 0 : index
    %309 = vector.load %arg11[%c0_88, %c0_89] : memref<64x128xbf16, #tpu.memory_space<vmem>>, vector<64x128xbf16>
    %310 = arith.truncf %308 : vector<32x64xf32> to vector<32x64xbf16>
    %cst_90 = arith.constant dense<0.000000e+00> : vector<32x128xf32>
    %311 = tpu.matmul %310, %309, %cst_90 {dimension_numbers = #tpu.dot_dimension_numbers<[1], [0], [0], [1], [0, 0, 1, 1], [], []>} : vector<32x64xbf16>, vector<64x128xbf16>, vector<32x128xf32> -> vector<32x128xf32>
    %312 = vector.shape_cast %195 : vector<128xf32> to vector<1x128xf32>
    %313 = vector.broadcast %312 : vector<1x128xf32> to vector<32x128xf32>
    %314 = arith.mulf %311, %313 : vector<32x128xf32>
    %315 = vector.shape_cast %197 : vector<128xf32> to vector<1x128xf32>
    %316 = vector.broadcast %315 : vector<1x128xf32> to vector<32x128xf32>
    %317 = arith.addf %314, %316 : vector<32x128xf32>
    %318 = vector.shape_cast %317 : vector<32x128xf32> to vector<2x16x128xf32>
    %c0_91 = arith.constant 0 : index
    %c0_92 = arith.constant 0 : index
    %c0_93 = arith.constant 0 : index
    %319 = vector.load %arg14[%c0_91, %c0_92, %c0_93] : memref<2x16x128xf32, #tpu.memory_space<vmem>>, vector<2x16x128xf32>
    tpu.vector_store %arg14[%c0_91, %c0_92, %c0_93], %318 {strides = array<i32>} : memref<2x16x128xf32, #tpu.memory_space<vmem>>, vector<2x16x128xf32>,
    return
  }
  func.func @transform_0(%arg0: i32) -> (i32, i32, i32) {
    %c0_i32 = arith.constant 0 : i32
    %c0_i32_0 = arith.constant 0 : i32
    %c0_i32_1 = arith.constant 0 : i32
    return %arg0, %c0_i32, %c0_i32_0 : i32, i32, i32
  }
  func.func @transform_1(%arg0: i32) -> (i32, i32, i32) {
    %c0_i32 = arith.constant 0 : i32
    %c0_i32_0 = arith.constant 0 : i32
    %c0_i32_1 = arith.constant 0 : i32
    %c0_i32_2 = arith.constant 0 : i32
    return %c0_i32, %c0_i32_0, %c0_i32_1 : i32, i32, i32
  }
  func.func @transform_2(%arg0: i32) -> (i32, i32) {
    %c0_i32 = arith.constant 0 : i32
    %c0_i32_0 = arith.constant 0 : i32
    %c0_i32_1 = arith.constant 0 : i32
    return %c0_i32, %c0_i32_0 : i32, i32
  }
  func.func @transform_3(%arg0: i32) -> (i32, i32, i32) {
    %c0_i32 = arith.constant 0 : i32
    %c0_i32_0 = arith.constant 0 : i32
    %c0_i32_1 = arith.constant 0 : i32
    %c0_i32_2 = arith.constant 0 : i32
    return %c0_i32, %c0_i32_0, %c0_i32_1 : i32, i32, i32
  }
  func.func @transform_4(%arg0: i32) -> (i32, i32, i32) {
    %c0_i32 = arith.constant 0 : i32
    %c0_i32_0 = arith.constant 0 : i32
    %c0_i32_1 = arith.constant 0 : i32
    %c0_i32_2 = arith.constant 0 : i32
    return %c0_i32, %c0_i32_0, %c0_i32_1 : i32, i32, i32
  }
  func.func @transform_5(%arg0: i32) -> (i32, i32, i32) {
    %c0_i32 = arith.constant 0 : i32
    %c0_i32_0 = arith.constant 0 : i32
    %c0_i32_1 = arith.constant 0 : i32
    %c0_i32_2 = arith.constant 0 : i32
    return %c0_i32, %c0_i32_0, %c0_i32_1 : i32, i32, i32
  }
  func.func @transform_6(%arg0: i32) -> (i32, i32, i32) {
    %c0_i32 = arith.constant 0 : i32
    %c0_i32_0 = arith.constant 0 : i32
    %c0_i32_1 = arith.constant 0 : i32
    %c0_i32_2 = arith.constant 0 : i32
    return %c0_i32, %c0_i32_0, %c0_i32_1 : i32, i32, i32
  }
  func.func @transform_7(%arg0: i32) -> (i32, i32) {
    %c0_i32 = arith.constant 0 : i32
    %c0_i32_0 = arith.constant 0 : i32
    %c0_i32_1 = arith.constant 0 : i32
    return %c0_i32, %c0_i32_0 : i32, i32
  }
  func.func @transform_8(%arg0: i32) -> (i32, i32) {
    %c0_i32 = arith.constant 0 : i32
    %c0_i32_0 = arith.constant 0 : i32
    %c0_i32_1 = arith.constant 0 : i32
    return %c0_i32, %c0_i32_0 : i32, i32
  }
  func.func @transform_9(%arg0: i32) -> (i32, i32, i32) {
    %c0_i32 = arith.constant 0 : i32
    %c0_i32_0 = arith.constant 0 : i32
    %c0_i32_1 = arith.constant 0 : i32
    %c0_i32_2 = arith.constant 0 : i32
    return %c0_i32, %c0_i32_0, %c0_i32_1 : i32, i32, i32
  }
  func.func @transform_10(%arg0: i32) -> (i32, i32) {
    %c0_i32 = arith.constant 0 : i32
    %c0_i32_0 = arith.constant 0 : i32
    %c0_i32_1 = arith.constant 0 : i32
    return %c0_i32, %c0_i32_0 : i32, i32
  }
  func.func @transform_11(%arg0: i32) -> (i32, i32) {
    %c0_i32 = arith.constant 0 : i32
    %c0_i32_0 = arith.constant 0 : i32
    %c0_i32_1 = arith.constant 0 : i32
    return %c0_i32, %c0_i32_0 : i32, i32
  }
  func.func @transform_12(%arg0: i32) -> (i32, i32) {
    %c0_i32 = arith.constant 0 : i32
    %c0_i32_0 = arith.constant 0 : i32
    %c0_i32_1 = arith.constant 0 : i32
    return %c0_i32, %c0_i32_0 : i32, i32
  }
  func.func @transform_13(%arg0: i32) -> (i32, i32, i32) {
    %c0_i32 = arith.constant 0 : i32
    %c0_i32_0 = arith.constant 0 : i32
    %c0_i32_1 = arith.constant 0 : i32
    return %arg0, %c0_i32, %c0_i32_0 : i32, i32, i32
  }
}

</mosaic_0001>

<bundles_post_ra>
// kernel: conv_former_block.1
= control target key start
LH: loop header
LB: loop body
LE: loop exit
PB: predicated region body
PF: predicated region fallthrough
CT: control target
= control target key end

     0   :  { %s10568_s0 = inlined_call_operand.hbm [shape: f32[4,64,32], index: 0, kind: input, shape index: {}]   ;;  %s10569_s1 = inlined_call_operand.vmem [shape: bf16[1,32,96], index: 1, kind: input, shape index: {}]   ;;  %s10570_s2 = inlined_call_operand.hbm [shape: f32[1,96], index: 2, kind: input, shape index: {}]   ;;  %s10571_s3 = inlined_call_operand.vmem [shape: bf16[4,8,32], index: 3, kind: input, shape index: {}]   ;;  %s10572_s4 = inlined_call_operand.hbm [shape: bf16[1,32,64], index: 4, kind: input, shape index: {}]   ;;  %s10573_s5 = inlined_call_operand.vmem [shape: bf16[1,64,32], index: 5, kind: input, shape index: {}]   ;;  %s10574_s6 = inlined_call_operand.vmem [shape: f32[1,6,32], index: 6, kind: input, shape index: {}]   ;;  %s10575_s7 = inlined_call_operand.hbm [shape: f32[1,64], index: 7, kind: input, shape index: {}]   ;;  %s10576_s8 = inlined_call_operand.vmem [shape: bf16[32,64], index: 8, kind: input, shape index: {}]   ;;  %s10577_s9 = inlined_call_operand.hbm [shape: f32[3,3,64], index: 9, kind: input, shape index: {}]   ;;  %s10578_s10 = inlined_call_operand.vmem [shape: bf16[64,128], index: 10, kind: input, shape index: {}]   ;;  %s10579_s11 = inlined_call_operand.hbm [shape: f32[4,64], index: 11, kind: input, shape index: {}]   ;;  %s10580_s12 = inlined_call_operand.hbm [shape: f32[2,128], index: 12, kind: input, shape index: {}]   ;;  %s10581_s13 = inlined_call_operand.hbm [shape: f32[4,16,128], index: 13, kind: output, shape index: {}]  }
   0x1   :  { %10589 = sst [smem:[#allocation20_spill]] %s10568_s0 }
   0x2   :  { %10590 = sst [smem:[#allocation21_spill]] %s10569_s1 }
   0x3   :  { %10591 = sst [smem:[#allocation22_spill]] %s10570_s2 }
   0x4   :  { %10592 = sst [smem:[#allocation23_spill]] %s10573_s5 }
   0x5   :  { %10593 = sst [smem:[#allocation24_spill]] %s10576_s8 }
   0x6   :  { %10594 = sst [smem:[#allocation25_spill]] %s10578_s10 }
   0x7   :  { %10595 = sst [smem:[#allocation26_spill]] %s10581_s13 }
   0x8   :  { %18 = vsyncpa [#allocation3], 0 }
   0x9   :  { %20 = vsyncpa [#allocation3 + $0x1], 0 }
   0xa   :  { %21 = vsyncpa [#allocation6], 0 }
   0xb   :  { %22 = vsyncpa [#allocation9], 0 }
   0xc   :  { %23 = vsyncpa [#allocation12], 0 }
   0xd   :  { %24 = vsyncpa [#allocation4], 0 }
   0xe   :  { %26 = vsyncpa [#allocation4 + $0x1], 0  ;;  %s7940_s25 = smov 0   ;;  %s7942_s26 = smov 0  }
   0xf   :  { %s7944_s27 = smov 0   ;;  %s7946_s28 = smov 0  }
  0x10 LB: > { %s7844_s29 = smov [#allocation5]   ;;  %s7961_s14 = sadd.s32 4294967295, %s7842_s28   ;;  %s7842_s28 = sphi %s7946_s28, %s10637_s28   ;;  %s7838_s27 = sphi %s7944_s27, %s10636_s27   ;;  %s7834_s26 = sphi %s7942_s26, %s10635_s26   ;;  %s7830_s25 = sphi %s7940_s25, %s10634_s25  }
  0x11   : > { %s357_s30 = sshll.u32 %s7844_s29, 4  ;;  %p6168_p0 = scmp.ge.s32.totalorder %s7842_s28, 1  ;;  %s7966_s30 = int_to_ptr.vmem [resolvable:$true] %s357_s30 }
  0x12   : > { %p10586_p1 = scmp.eq.s32.totalorder %s7961_s14, 0  ;;  %p341_p2 = scmp.lt.s32.totalorder %s7842_s28, 3 }
  0x13   : > { %s7845_s16 = smov [#allocation8]   ;;  %s7846_s18 = smov [#allocation11]  }
  0x14   : > { %p7968_p3 = pnand %p6168_p0, %p341_p2  ;;  %s390_s17 = sshll.u32 %s7845_s16, 4  ;;  %s7975_s17 = int_to_ptr.vmem [resolvable:$true] %s390_s17 }
  0x15   : > { %s420_s19 = sshll.u32 %s7846_s18, 4  ;;  %s7847_s21 = smov [#allocation7]   ;;  %s7983_s19 = int_to_ptr.vmem [resolvable:$true] %s420_s19 }
  0x16   : > { %s10596_s15 = scalar_select %p7968_p3, 1, 0 }
  0x17   : > { %p7102_p5 = pneg %p7968_p3  ;;  %s7985_s22 = sshll.u32 %s7847_s21, 4  ;;  %s371_s22 = int_to_ptr.vmem [resolvable:$true] %s7985_s22 }
  0x18   : > { %s10598_s2 = sld [smem:[#allocation22_spill]] }
  0x19   : > { %p7979_p6 = pnand %p7102_p5, %p10586_p1 }
  0x1b   : > { %p7995_p8 = pneg %p7979_p6 }
  0x1e   : > { %s7566_s29 = scalar_lea.hbm %s10598_s2, 16 }
  0x1f   : > { %p7567_p7 = scmp.ne.s32.totalorder %s10598_s2, %s7566_s29  ;;  %p7573_p11 = scmp.lt.u32.totalorder %s7566_s29, %s10598_s2 }
  0x21   : > { %p7569_p9 = pnand %p7995_p8, %p7567_p7 }
  0x23   : > { %p7570_p10 = pneg %p7569_p9 }
  0x25   : > { %p7575_p12 = pnand %p7573_p11, %p7570_p10 }
  0x27   : > { %7578 = shalt.err (!%p7575_p12)
}
  0x28   : > { %s7579_s13 = scalar_lea.vmem %s7966_s30, 16  ;;  %s7586_s23 = scalar_lea.vmem %s7966_s30, 32 }
  0x29   : > { %p7580_p13 = scmp.ne.s32.totalorder %s7966_s30, %s7579_s13  ;;  %p7587_p5 = scmp.lt.s32.totalorder %s7966_s30, %s7966_s30 }
  0x2a   : > { %p7588_p7 = scmp.lt.s32.totalorder %s7586_s23, %s7579_s13 }
  0x2b   : > { %p7582_p0 = pnand %p7580_p13, %p7995_p8 }
  0x2c   : > { %p7589_p9 = por %p7588_p7, %p7587_p5 }
  0x2d   : > { %p7583_p2 = pneg %p7582_p0 }
  0x2f   : > { %p7590_p4 = pnand %p7589_p9, %p7583_p2 }
  0x31   : > { %7593 = shalt.err (!%p7590_p4)
}
  0x32   : > { %7105 = dma.hbm_to_vmem [thread:$0]  (!%p7979_p6), %s10598_s2, 16, %s7966_s30, [#allocation6]  }
  0x33   : > { %s7594_s21 = scalar_lea.hbm %s10575_s7, 16 }
  0x34   : > { %p7595_p10 = scmp.ne.s32.totalorder %s10575_s7, %s7594_s21  ;;  %p7601_p4 = scmp.lt.u32.totalorder %s7594_s21, %s10575_s7 }
  0x36   : > { %p7597_p11 = pnand %p7595_p10, %p7995_p8 }
  0x38   : > { %p7598_p12 = pneg %p7597_p11 }
  0x3a   : > { %p7603_p13 = pnand %p7601_p4, %p7598_p12 }
  0x3c   : > { %7606 = shalt.err (!%p7603_p13)
}
  0x3d   : > { %s7607_s30 = scalar_lea.vmem %s7975_s17, 16  ;;  %s7614_s5 = scalar_lea.vmem %s7975_s17, 32 }
  0x3e   : > { %p7608_p0 = scmp.ne.s32.totalorder %s7975_s17, %s7607_s30  ;;  %p7615_p7 = scmp.lt.s32.totalorder %s7975_s17, %s7975_s17 }
  0x3f   : > { %p7616_p9 = scmp.lt.s32.totalorder %s7614_s5, %s7607_s30 }
  0x40   : > { %p7610_p2 = pnand %p7608_p0, %p7995_p8 }
  0x41   : > { %p7617_p10 = por %p7616_p9, %p7615_p7 }
  0x42   : > { %p7611_p5 = pneg %p7610_p2 }
  0x44   : > { %p7618_p11 = pnand %p7617_p10, %p7611_p5 }
  0x46   : > { %7621 = shalt.err (!%p7618_p11)
}
  0x47   : > { %7111 = dma.hbm_to_vmem [thread:$0]  (!%p7979_p6), %s10575_s7, 16, %s7975_s17, [#allocation9]  }
  0x48   : > { %s7622_s16 = scalar_lea.hbm %s10579_s11, 64 }
  0x49   : > { %p7623_p12 = scmp.ne.s32.totalorder %s10579_s11, %s7622_s16  ;;  %p7629_p0 = scmp.lt.u32.totalorder %s7622_s16, %s10579_s11 }
  0x4b   : > { %p7625_p4 = pnand %p7623_p12, %p7995_p8 }
  0x4d   : > { %p7626_p13 = pneg %p7625_p4 }
  0x4f   : > { %p7631_p2 = pnand %p7629_p0, %p7626_p13 }
  0x51   : > { %7634 = shalt.err (!%p7631_p2)
}
  0x52   : > { %s7635_s17 = scalar_lea.vmem %s7983_s19, 64  ;;  %p7643_p10 = scmp.lt.s32.totalorder %s7983_s19, %s7983_s19 }
  0x53   : > { %p7636_p5 = scmp.ne.s32.totalorder %s7983_s19, %s7635_s17  ;;  %p7644_p11 = scmp.lt.s32.totalorder %s7635_s17, %s7635_s17 }
  0x55   : > { %p7638_p7 = pnand %p7636_p5, %p7995_p8  ;;  %p7645_p12 = por %p7644_p11, %p7643_p10 }
  0x57   : > { %p7639_p9 = pneg %p7638_p7 }
  0x59   : > { %p7646_p4 = pnand %p7645_p12, %p7639_p9 }
  0x5b   : > { %7649 = shalt.err (!%p7646_p4)
}
  0x5c   : > { %7117 = dma.hbm_to_vmem [thread:$0]  (!%p7979_p6), %s10579_s11, 64, %s7983_s19, [#allocation12]  }
  0x5d   : > { %s7650_s29 = scalar_lea.hbm %s10572_s4, 256 }
  0x5e   : > { %p7651_p13 = scmp.ne.s32.totalorder %s10572_s4, %s7650_s29  ;;  %p7657_p5 = scmp.lt.u32.totalorder %s7650_s29, %s10572_s4 }
  0x60   : > { %p7653_p0 = pnand %p7651_p13, %p7995_p8 }
  0x62   : > { %p7654_p2 = pneg %p7653_p0 }
  0x64   : > { %p7659_p7 = pnand %p7657_p5, %p7654_p2 }
  0x66   : > { %7662 = shalt.err (!%p7659_p7)
}
  0x67   : > { %s7663_s30 = scalar_lea.vmem %s371_s22, 256  ;;  %p7671_p12 = scmp.lt.s32.totalorder %s371_s22, %s371_s22 }
  0x68   : > { %p7664_p9 = scmp.ne.s32.totalorder %s371_s22, %s7663_s30  ;;  %p7672_p4 = scmp.lt.s32.totalorder %s7663_s30, %s7663_s30 }
  0x6a   : > { %p7666_p10 = pnand %p7664_p9, %p7995_p8  ;;  %p7673_p1 = por %p7672_p4, %p7671_p12 }
  0x6c   : > { %p7667_p11 = pneg %p7666_p10 }
  0x6e   : > { %p7674_p3 = pnand %p7673_p1, %p7667_p11 }
  0x70   : > { %7677 = shalt.err (!%p7674_p3)
}
  0x71   : > { %s7848_s19 = smov 64   ;;  %s7849_s17 = smov 4  }
  0x72   : > { %7108 = dma.hbm_to_vmem [thread:$0]  (!%p7979_p6), %s10572_s4, 256, %s371_s22, [#allocation6], %s7848_s19, %s7848_s19, %s7849_s17  }
  0x73   : > { %s7850_s10 = smov [#allocation10]   ;;  %s7851_s29 = smov [#allocation13]  }
  0x74   : > { %s403_s24 = sshll.u32 %s7850_s10, 4  ;;  %s431_s16 = sshll.u32 %s7851_s29, 4  ;;  %s404_s24 = int_to_ptr.vmem [resolvable:$true] %s403_s24  ;;  %s8083_s16 = int_to_ptr.vmem [resolvable:$true] %s431_s16 }
  0x75   : > { %s7678_s23 = scalar_lea.hbm %s10577_s9, 192 }
  0x76   : > { %p7679_p1 = scmp.ne.s32.totalorder %s10577_s9, %s7678_s23  ;;  %p7685_p0 = scmp.lt.u32.totalorder %s7678_s23, %s10577_s9 }
  0x78   : > { %p7681_p3 = pnand %p7679_p1, %p7995_p8 }
  0x7a   : > { %p7682_p13 = pneg %p7681_p3 }
  0x7c   : > { %p7687_p2 = pnand %p7685_p0, %p7682_p13 }
  0x7e   : > { %7690 = shalt.err (!%p7687_p2)
}
  0x7f   : > { %s7691_s8 = scalar_lea.vmem %s404_s24, 192  ;;  %p7699_p10 = scmp.lt.s32.totalorder %s404_s24, %s404_s24 }
  0x80   : > { %p7692_p5 = scmp.ne.s32.totalorder %s404_s24, %s7691_s8  ;;  %p7700_p11 = scmp.lt.s32.totalorder %s7691_s8, %s7691_s8 }
  0x82   : > { %p7694_p7 = pnand %p7692_p5, %p7995_p8  ;;  %p7701_p12 = por %p7700_p11, %p7699_p10 }
  0x84   : > { %p7695_p9 = pneg %p7694_p7 }
  0x86   : > { %p7702_p4 = pnand %p7701_p12, %p7695_p9 }
  0x88   : > { %7705 = shalt.err (!%p7702_p4)
}
  0x89   : > { %7114 = dma.hbm_to_vmem [thread:$0]  (!%p7979_p6), %s10577_s9, 192, %s404_s24, [#allocation9], %s7848_s19, %s7848_s19, %s7849_s17  }
  0x8a   : > { %s7706_s13 = scalar_lea.hbm %s10580_s12, 32 }
  0x8b   : > { %p7707_p1 = scmp.ne.s32.totalorder %s10580_s12, %s7706_s13  ;;  %p7713_p0 = scmp.lt.u32.totalorder %s7706_s13, %s10580_s12 }
  0x8d   : > { %p7709_p3 = pnand %p7707_p1, %p7995_p8 }
  0x8f   : > { %p7710_p13 = pneg %p7709_p3 }
  0x91   : > { %p7715_p2 = pnand %p7713_p0, %p7710_p13 }
  0x93   : > { %7718 = shalt.err (!%p7715_p2)
}
  0x94   : > { %s7719_s19 = scalar_lea.vmem %s8083_s16, 32  ;;  %p7727_p10 = scmp.lt.s32.totalorder %s8083_s16, %s8083_s16 }
  0x95   : > { %p7720_p5 = scmp.ne.s32.totalorder %s8083_s16, %s7719_s19  ;;  %p7728_p11 = scmp.lt.s32.totalorder %s7719_s19, %s7719_s19 }
  0x97   : > { %p7722_p7 = pnand %p7720_p5, %p7995_p8  ;;  %p7729_p12 = por %p7728_p11, %p7727_p10 }
  0x99   : > { %p7723_p9 = pneg %p7722_p7 }
  0x9b   : > { %p7730_p4 = pnand %p7729_p12, %p7723_p9 }
  0x9d   : > { %7733 = shalt.err (!%p7730_p4)
}
  0x9e   : > { %7120 = dma.hbm_to_vmem [thread:$0]  (!%p7979_p6), %s10580_s12, 32, %s8083_s16, [#allocation12]  }
  0x9f   : > { %s6167_s20 = sadd.s32 4294967294, %s7842_s28   ;;  %s8128_s18 = sadd.s32 1, %s7842_s28  }
  0xa0   : > { %s36_s8 = ssub.s32 %s7842_s28, %s8128_s18  ;;  %s39_s2 = sadd.s32 1, %s7838_s27 }
  0xa1   : > { %p37_p8 = scmp.eq.s32.totalorder %s36_s8, 0  ;;  %p46_p1 = scmp.ne.s32.totalorder %s7838_s27, %s7834_s26 }
  0xa2   : > { %p47_p3 = scmp.eq.s32.totalorder %s7842_s28, 0  ;;  %p52_p13 = scmp.ne.s32.totalorder %s7834_s26, %s7830_s25 }
  0xa3   : > { %s8139_s10 = scalar_select %p37_p8, %s7838_s27, %s39_s2  }
  0xa4   : > { %p8141_p0 = por %p47_p3, %p46_p1  ;;  %p10601_p2 = scmp.eq.s32.totalorder %s7961_s14, 0 }
  0xa5   : > { %p328_p5 = scmp.eq.s32.totalorder %s7961_s14, 1  ;;  %p334_p7 = scmp.eq.s32.totalorder %s6167_s20, 1 }
  0xa6   : > { %p8147_p6 = por %p10601_p2, %p52_p13  ;;  %p7135_p9 = scmp.lt.s32.totalorder %s7842_s28, 2 }
  0xa7   : > { %s442_s21 = sand.u32 1, %s7838_s27   ;;  %p8154_p10 = por %p328_p5, %p46_p1 }
  0xa8   : > { %p8158_p11 = por %p334_p7, %p52_p13  ;;  %s6176_s30 = sshll.u32 %s442_s21, 7 }
  0xa9   : > { %s10603_s13 = scalar_select %p8154_p10, 1, 0 }
  0xaa   : > { %s10604_s23 = scalar_select %p8158_p11, 1, 0 }
  0xab   : > { %s6351_s5 = sshll.u32 %s7842_s28, 11  ;;  %s10605_s0 = sld [smem:[#allocation20_spill]] }
  0xac   : > { %s446_s24 = scalar_lea.vmem [#allocation2], %s6176_s30  ;;  %p8172_p12 = pnand %p7135_p9, %p8141_p0 }
  0xad   : > { %s454_s20 = sshll.u32 %s446_s24, 4  ;;  %s8176_s2 = scalar_lea.sflag [#allocation3], %s442_s21  ;;  %s8168_s20 = int_to_ptr.vmem [resolvable:$true] %s454_s20 }
  0xae   : > { %p7736_p8 = pneg %p8172_p12 }
  0xb1   : > { %s8166_s17 = scalar_lea.hbm %s10605_s0, %s6351_s5  ;;  %s7739_s29 = scalar_lea.hbm %s10605_s0, 4096 }
  0xb2   : > { %s7734_s22 = scalar_lea.hbm %s8166_s17, 2048  ;;  %p7740_p13 = scmp.lt.u32.totalorder %s8166_s17, %s10605_s0 }
  0xb3   : > { %p7735_p4 = scmp.ne.s32.totalorder %s8166_s17, %s7734_s22  ;;  %p7741_p0 = scmp.lt.u32.totalorder %s7739_s29, %s7734_s22 }
  0xb4   : > { %p7743_p5 = scmp.lt.u32.totalorder %s7734_s22, %s8166_s17 }
  0xb5   : > { %p7737_p1 = pnand %p7736_p8, %p7735_p4  ;;  %p7742_p2 = por %p7741_p0, %p7740_p13 }
  0xb7   : > { %p7738_p3 = pneg %p7737_p1  ;;  %p7744_p7 = por %p7743_p5, %p7742_p2 }
  0xb9   : > { %p7745_p9 = pnand %p7744_p7, %p7738_p3 }
  0xbb   : > { %7748 = shalt.err (!%p7745_p9)
}
  0xbc   : > { %s7749_s21 = scalar_lea.vmem %s8168_s20, 2048  ;;  %s7852_s30 = smov [#allocation2]  }
  0xbd   : > { %p7750_p4 = scmp.ne.s32.totalorder %s8168_s20, %s7749_s21  ;;  %s7754_s5 = sshll.u32 %s7852_s30, 4  ;;  %s7755_s5 = int_to_ptr.vmem [resolvable:$false] %s7754_s5 }
  0xbe   : > { %s7756_s19 = scalar_lea.vmem %s7755_s5, 4096  ;;  %p7757_p10 = scmp.lt.s32.totalorder %s8168_s20, %s7755_s5 }
  0xbf   : > { %p7752_p1 = pnand %p7750_p4, %p7736_p8  ;;  %p7758_p13 = scmp.lt.s32.totalorder %s7756_s19, %s7749_s21 }
  0xc1   : > { %p7753_p11 = pneg %p7752_p1  ;;  %p7759_p0 = por %p7758_p13, %p7757_p10 }
  0xc3   : > { %p7760_p2 = pnand %p7759_p0, %p7753_p11 }
  0xc5   : > { %7763 = shalt.err (!%p7760_p2)
}
  0xc6   : > { %s7853_s22 = smov 128   ;;  %s7854_s29 = smov 8  }
  0xc7   : > { %7124 = dma.hbm_to_vmem [thread:$0]  (!%p8172_p12), %s8166_s17, 2048, %s8168_s20, %s8176_s2, %s7853_s22, %s7853_s22, %s7854_s29  }
  0xc8   : > { %p10607_p8 = scmp.ne.s32.totalorder %s10596_s15, 0 }
  0xc9   : > { %s8207_s24 = sand.u32 (!%p10607_p8), 1, %s7834_s26  }
  0xca   : > { %466 = sbr.rel (%p10607_p8) target bundleno = 5309 (0x14bd), region = 72  ;;  %s6181_s21 = sshll.u32 (!%p10607_p8), %s8207_s24, 7 }
  0xcb   : > { %s469_s30 = scalar_lea.sflag (!%p10607_p8), [#allocation3], %s8207_s24  ;;  %s8211_s5 = scalar_lea.vmem (!%p10607_p8), [#allocation2], %s6181_s21 }
  0xd1   : > { %7809 = dma.done.wait (%p8147_p6), %s469_s30, 2048  }
  0xd2   : > { %7811 = vsyncadd (%p8147_p6), %s469_s30, 4294965248  ;;  %p10608_p10 = scmp.eq.s32.totalorder %s7961_s14, 0 }
  0xd4   : > { %7813 = dma.done.wait (%p10608_p10), [#allocation6], 272   ;;  %p10609_p11 = pmov %p10608_p10 }
  0xd5   : > { %p10610_p12 = pmov %p10608_p10 }
  0xd6   : > { %7815 = vsyncadd (%p10609_p11), [#allocation6], 4294967024 }
  0xd7   : > { %7817 = dma.done.wait (%p10610_p12), [#allocation9], 208   ;;  %p10611_p3 = pmov %p10608_p10 }
  0xd9   : > { %7819 = vsyncadd (%p10611_p3), [#allocation9], 4294967088  ;;  %p10612_p5 = pmov %p10611_p3 }
  0xda   : > { %p10613_p7 = pmov %p10611_p3 }
  0xdb   : > { %7821 = dma.done.wait (%p10612_p5), [#allocation12], 96  }
  0xdc   : > { %7823 = vsyncadd (%p10613_p7), [#allocation12], 4294967200  ;;  %s10614_s1 = sld [smem:[#allocation21_spill]]  ;;  %v542_v2 = vld [vmem:[%s8211_s5] sm:$0xff]  ;;  %v543_v3 = vld [vmem:[%s8211_s5 + $0x8] sm:$0xff]  ;;  %vm591_vm0 = vcmask 261120  }
  0xdd   : > { %v564_v4 = vpack.c.bf16 %v543_v3, %v542_v2  ;;  %v544_v5 = vld [vmem:[%s8211_s5 + $0x10] sm:$0xff]  ;;  %v545_v6 = vld [vmem:[%s8211_s5 + $0x18] sm:$0xff]  ;;  %v546_v7 = vld [vmem:[%s8211_s5 + $0x20] sm:$0xff]  ;;  %vm733_vm1 = vcmask 64512   ;;  %s7855_s8 = smov 96   ;;  %s7856_s2 = smov 64  }
  0xde   : > { %v547_v8 = vld [vmem:[%s8211_s5 + $0x28] sm:$0xff]  ;;  %v565_v9 = vpack.c.bf16 %v545_v6, %v544_v5  ;;  %v548_v11 = vld [vmem:[%s8211_s5 + $0x30] sm:$0xff]  ;;  %v549_v12 = vld [vmem:[%s8211_s5 + $0x38] sm:$0xff]  ;;  %s7857_s19 = smov 88   ;;  %vm924_vm2 = vcmask 523264   ;;  %s7858_s22 = smov 120  }
  0xdf   : > { %6570 = vmatprep.mubr.msk.bf16.mxu0 %vm591_vm0, %v564_v4  ;;  %v566_v10 = vpack.c.bf16 %v547_v8, %v546_v7  ;;  %v550_v13 = vld [vmem:[%s8211_s5 + $0x40] sm:$0xff]  ;;  %v551_v14 = vld [vmem:[%s8211_s5 + $0x48] sm:$0xff]  ;;  %v567_v15 = vpack.c.bf16 %v549_v12, %v548_v11  ;;  %v552_v17 = vld [vmem:[%s8211_s5 + $0x50] sm:$0xff]  ;;  %s7859_s29 = smov 56   ;;  %s7860_s21 = smov 80   ;;  %vm1902_vm3 = vcmask 1043456  }
  0xe0   : > { %v568_v16 = vpack.c.bf16 %v551_v14, %v550_v13  ;;  %v553_v18 = vld [vmem:[%s8211_s5 + $0x58] sm:$0xff]  ;;  %v554_v19 = vld [vmem:[%s8211_s5 + $0x60] sm:$0xff]  ;;  %v555_v20 = vld [vmem:[%s8211_s5 + $0x68] sm:$0xff]  ;;  %s7861_s30 = smov 112   ;;  %s7862_s15 = smov 48   ;;  %vm5078_vm4 = vcmask 1042434  }
  0xe1   : > { %v569_v21 = vpack.c.bf16 %v553_v18, %v552_v17  ;;  %v570_v22 = vpack.c.bf16 %v555_v20, %v554_v19  ;;  %v556_v23 = vld [vmem:[%s8211_s5 + $0x70] sm:$0xff]  ;;  %v557_v24 = vld [vmem:[%s8211_s5 + $0x78] sm:$0xff]  ;;  %v6189_v27 = vld [vmem:[#allocation5] ss:$0 sm:$0xff]  ;;  %s10628_s20 = sld [smem:[#allocation24_spill]]  ;;  %vm5080_vm5 = vcmask 1043459  }
  0xe2   : > { %v7199_v0 = vld [vmem:[%s10614_s1] sm:$0xff]   ;;  %v7200_v1 = vld [vmem:[%s10614_s1 + $0x8] sm:$0xff]   ;;  %v571_v25 = vpack.c.bf16 %v557_v24, %v556_v23  ;;  %vm5104_vm6 = vcmask 1040384   ;;  %vm5220_vm7 = vcmask 1041409   ;;  %p10631_p9 = scmp.ne.s32.totalorder %s10603_s13, 0 }
  0xe3   : > { %6566 = vmatprep.subr.bf16.mxu0 %v7199_v0 }
  0xe4   : > { %6567 = vmatpush3.bf16.msra.mxu0 %v7199_v0 }
  0xe5   : > { %6568 = vmatprep.subr.bf16.mxu0 %v7200_v1 }
  0xe8   : > { %6569 = vmatpush3.bf16.msra.mxu0 %v7200_v1 }
  0xeb   : > { %6571 = vmatmul.mubr.msk.bf16.vlgmr.msra.gmra.mrb[0].mxu0 %vm591_vm0, %v565_v9 }
  0xec   : > { %6574 = vmatprep.mubr.msk.bf16.mxu0 %vm591_vm0, %v566_v10 }
  0xf3   : > { %6575 = vmatmul.mubr.msk.bf16.gmra.mrb[4].mxu0 %vm591_vm0, %v567_v15 }
  0xf4   : > { %6578 = vmatprep.mubr.msk.bf16.mxu0 %vm591_vm0, %v568_v16 }
  0xfb   : > { %6579 = vmatmul.mubr.msk.bf16.gmra.mrb[8].mxu0 %vm591_vm0, %v569_v21 }
  0xfc   : > { %6582 = vmatprep.mubr.msk.bf16.mxu0 %vm591_vm0, %v570_v22 }
 0x103   : > { %6583 = vmatmul.mubr.msk.bf16.gmra.mrb[12].mxu0 %vm591_vm0, %v571_v25 }
 0x1be   : > { %v6572_v26 = vpop.f32.mrb[0].mxu0 }
 0x1bf   : > { %v650_v28 = vpop.f32.mrb[1].mxu0  ;;  %v659_v30 = vadd.f32 %v6572_v26, %v6189_v27 }
 0x1c0   : > { %v6573_v29 = vpop.f32.mrb[2].mxu0  ;;  %v651_v33 = vadd.f32 %v6189_v27, %v650_v28 }
 0x1c1   : > { %v662_v31 = vadd.f32 %v6573_v29, %v6189_v27  ;;  %v653_v32 = vpop.f32.mrb[3].mxu0 }
 0x1c2   : > { %v654_v34 = vadd.f32 %v6189_v27, %v653_v32 }
 0x1c3   : > { %v8259_v35 = vpack.c.bf16 %v662_v31, %v659_v30 }
 0x1c4   : > { %v8261_v36 = vpack.c.bf16 %v654_v34, %v651_v33 }
 0x1c6   : > { %v6576_v37 = vpop.f32.mrb[4].mxu0  ;;  %6594 = vmatprep.mubr.msk.bf16.mxu1 %vm733_vm1, %v8261_v36 }
 0x1c7   : > { %v666_v38 = vpop.f32.mrb[5].mxu0  ;;  %v675_v40 = vadd.f32 %v6576_v37, %v6189_v27 }
 0x1c8   : > { %v6577_v39 = vpop.f32.mrb[6].mxu0  ;;  %v667_v43 = vadd.f32 %v6189_v27, %v666_v38 }
 0x1c9   : > { %v678_v41 = vadd.f32 %v6577_v39, %v6189_v27  ;;  %v669_v42 = vpop.f32.mrb[7].mxu0 }
 0x1ca   : > { %v670_v44 = vadd.f32 %v6189_v27, %v669_v42 }
 0x1cb   : > { %v8265_v45 = vpack.c.bf16 %v678_v41, %v675_v40 }
 0x1cc   : > { %v8267_v46 = vpack.c.bf16 %v670_v44, %v667_v43 }
 0x1ce   : > { %v6580_v47 = vpop.f32.mrb[8].mxu0 }
 0x1cf   : > { %v682_v48 = vpop.f32.mrb[9].mxu0  ;;  %v691_v50 = vadd.f32 %v6580_v47, %v6189_v27 }
 0x1d0   : > { %v6581_v49 = vpop.f32.mrb[10].mxu0  ;;  %v683_v53 = vadd.f32 %v6189_v27, %v682_v48 }
 0x1d1   : > { %v694_v51 = vadd.f32 %v6581_v49, %v6189_v27  ;;  %v685_v52 = vpop.f32.mrb[11].mxu0 }
 0x1d2   : > { %v686_v54 = vadd.f32 %v6189_v27, %v685_v52 }
 0x1d3   : > { %v8269_v55 = vpack.c.bf16 %v694_v51, %v691_v50 }
 0x1d4   : > { %v8271_v56 = vpack.c.bf16 %v686_v54, %v683_v53 }
 0x1d6   : > { %v6584_v57 = vpop.f32.mrb[12].mxu0  ;;  %827 = vrot.lane.b32.xlu0 %v8271_v56, %s7855_s8  ;;  %6610 = vmatprep.mubr.msk.bf16.mxu0 %vm733_vm1, %v8271_v56 }
 0x1d7   : > { %v707_v58 = vadd.f32 %v6584_v57, %v6189_v27  ;;  %v698_v59 = vpop.f32.mrb[13].mxu0 }
 0x1d8   : > { %v699_v60 = vadd.f32 %v6189_v27, %v698_v59  ;;  %v6585_v61 = vpop.f32.mrb[14].mxu0 }
 0x1d9   : > { %v710_v62 = vadd.f32 %v6585_v61, %v6189_v27  ;;  %v701_v63 = vpop.f32.mrb[15].mxu0 }
 0x1da   : > { %v702_v0 = vadd.f32 %v6189_v27, %v701_v63  ;;  %829 = vrot.lane.b32.xlu0 %v8269_v55, %s7855_s8 }
 0x1db   : > { %v8277_v1 = vpack.c.bf16 %v710_v62, %v707_v58 }
 0x1dc   : > { %v8279_v2 = vpack.c.bf16 %v702_v0, %v699_v60 }
 0x1de   : > { %831 = vrot.lane.b32.xlu1 %v8279_v2, %s7855_s8  ;;  %725 = vrot.lane.b32.xlu0 %v8261_v36, %s7855_s8 }
 0x1e2   : > { %833 = vrot.lane.b32.xlu1 %v8277_v1, %s7855_s8  ;;  %729 = vrot.lane.b32.xlu0 %v8267_v46, %s7855_s8 }
 0x1e6   : > { %727 = vrot.lane.b32.xlu1 %v8259_v35, %s7855_s8  ;;  %1200 = vrot.lane.b32.xlu0 %v8269_v55, %s7856_s2 }
 0x1ea   : > { %731 = vrot.lane.b32.xlu1 %v8265_v45, %s7855_s8  ;;  %s10630_s8 = sld [smem:[#allocation26_spill]] }
 0x1ee   : > { %1198 = vrot.lane.b32.xlu1 %v8271_v56, %s7856_s2 }
 0x1f2   : > { %1204 = vrot.lane.b32.xlu1 %v8277_v1, %s7856_s2 }
 0x1f6   : > { %1409 = vrot.lane.b32.xlu1 %v8271_v56, %s7857_s19 }
 0x1fa   : > { %1202 = vrot.lane.b32.xlu1 %v8279_v2, %s7856_s2 }
 0x248   : > { %v828_v3 = vpop.permute.xlu0 %827 }
 0x249   : > { %7042 = vmatprep.subr.msk.bf16.mxu0 %vm733_vm1, %v828_v3  ;;  %v848_v4 = vsel %vm733_vm1, %v828_v3, 0 }
 0x24a   : > { %6603 = vmatpush3.bf16.xpose.msra.mxu0 %v848_v4 }
 0x24c   : > { %v830_v5 = vpop.permute.xlu0 %829 }
 0x24d   : > { %7043 = vmatprep.subr.msk.bf16.mxu0 %vm733_vm1, %v830_v5  ;;  %v851_v9 = vsel %vm733_vm1, %v830_v5, 0 }
 0x250   : > { %v832_v6 = vpop.permute.xlu1 %831  ;;  %v726_v7 = vpop.permute.xlu0 %725 }
 0x251   : > { %7038 = vmatprep.subr.msk.bf16.mxu1 %vm733_vm1, %v726_v7  ;;  %v747_v8 = vsel %vm733_vm1, %v726_v7, 0  ;;  %v854_v13 = vsel %vm733_vm1, %v832_v6, 0 }
 0x252   : > { %6587 = vmatpush3.bf16.xpose.msra.mxu1 %v747_v8  ;;  %6605 = vmatpush3.bf16.xpose.msra.mxu0 %v851_v9 }
 0x253   : > { %7044 = vmatprep.subr.msk.bf16.mxu0 %vm733_vm1, %v832_v6 }
 0x254   : > { %v834_v10 = vpop.permute.xlu1 %833  ;;  %v730_v14 = vpop.permute.xlu0 %729 }
 0x255   : > { %v753_v17 = vsel %vm733_vm1, %v730_v14, 0  ;;  %v857_v18 = vsel %vm733_vm1, %v834_v10, 0 }
 0x258   : > { %v728_v11 = vpop.permute.xlu1 %727  ;;  %v1201_v22 = vpop.permute.xlu0 %1200 }
 0x259   : > { %7039 = vmatprep.subr.msk.bf16.mxu1 %vm733_vm1, %v728_v11  ;;  %v750_v12 = vsel %vm733_vm1, %v728_v11, 0 }
 0x25a   : > { %6589 = vmatpush3.bf16.xpose.msra.mxu1 %v750_v12  ;;  %6607 = vmatpush3.bf16.xpose.msra.mxu0 %v854_v13 }
 0x25b   : > { %7040 = vmatprep.subr.msk.bf16.mxu1 %vm733_vm1, %v730_v14  ;;  %7045 = vmatprep.subr.msk.bf16.mxu0 %vm733_vm1, %v834_v10 }
 0x25c   : > { %v732_v15 = vpop.permute.xlu1 %731 }
 0x25d   : > { %v756_v21 = vsel %vm733_vm1, %v732_v15, 0 }
 0x260   : > { %v1199_v16 = vpop.permute.xlu1 %1198 }
 0x262   : > { %6591 = vmatpush3.bf16.xpose.msra.mxu1 %v753_v17  ;;  %6609 = vmatpush3.bf16.xpose.msra.mxu0 %v857_v18 }
 0x263   : > { %7041 = vmatprep.subr.msk.bf16.mxu1 %vm733_vm1, %v732_v15  ;;  %6634 = vmatprep.subr.bf16.mxu0 %v1199_v16 }
 0x264   : > { %v1205_v19 = vpop.permute.xlu1 %1204 }
 0x268   : > { %v8312_v20 = vpop.permute.xlu1 %1409 }
 0x269   : > { %6611 = vmatmul.mubr.msk.bf16.vlgmr.msra.gmra.mrb[16].mxu0 %vm733_vm1, %v8269_v55 }
 0x26a   : > { %6593 = vmatpush3.bf16.xpose.msra.mxu1 %v756_v21  ;;  %6614 = vmatprep.mubr.msk.bf16.mxu0 %vm733_vm1, %v8279_v2 }
 0x26b   : > { %6635 = vmatpush3.bf16.msra.mxu0 %v1199_v16 }
 0x26c   : > { %6636 = vmatprep.subr.bf16.mxu0 %v1201_v22  ;;  %v1203_v23 = vpop.permute.xlu1 %1202 }
 0x26f   : > { %6637 = vmatpush3.bf16.msra.mxu0 %v1201_v22 }
 0x270   : > { %6638 = vmatprep.subr.bf16.mxu0 %v1203_v23 }
 0x271   : > { %6595 = vmatmul.mubr.msk.bf16.vlgmr.msra.gmra.mrb[0].mxu1 %vm733_vm1, %v8259_v35  ;;  %6615 = vmatmul.mubr.msk.bf16.gmra.mrb[20].mxu0 %vm733_vm1, %v8277_v1 }
 0x272   : > { %6598 = vmatprep.mubr.msk.bf16.mxu1 %vm733_vm1, %v8267_v46 }
 0x273   : > { %6639 = vmatpush3.bf16.msra.mxu0 %v1203_v23 }
 0x274   : > { %6640 = vmatprep.subr.bf16.mxu0 %v1205_v19 }
 0x277   : > { %6641 = vmatpush3.bf16.msra.mxu0 %v1205_v19 }
 0x278   : > { %7050 = vmatprep.subr.msk.bf16.mxu0 %vm733_vm1, %v8312_v20 }
 0x279   : > { %6599 = vmatmul.mubr.msk.bf16.gmra.mrb[4].mxu1 %vm733_vm1, %v8265_v45 }
 0x33c   : > { %v6612_v24 = vpop.f32.mrb[16].mxu0 }
 0x33d   : > { %v893_v25 = vpop.f32.mrb[17].mxu0  ;;  %v955_v26 = vsel %vm924_vm2, %v6612_v24, -inf }
 0x33e   : > { %v6613_v27 = vpop.f32.mrb[18].mxu0  ;;  %956 = vmax.xlane.f32.xlu0 %v955_v26  ;;  %v949_v30 = vsel %vm924_vm2, %v893_v25, -inf }
 0x33f   : > { %v896_v28 = vpop.f32.mrb[19].mxu0  ;;  %v958_v38 = vsel %vm924_vm2, %v6613_v27, -inf }
 0x340   : > { %v952_v29 = vsel %vm924_vm2, %v896_v28, -inf }
 0x341   : > { %953 = vmax.xlane.f32.xlu1 %v952_v29 }
 0x342   : > { %950 = vmax.xlane.f32.xlu0 %v949_v30 }
 0x344   : > { %v8332_v31 = vpop.f32.mrb[0].mxu1  ;;  %v8334_v32 = vpop.f32.mrb[20].mxu0 }
 0x345   : > { %v8336_v33 = vpop.f32.mrb[1].mxu1  ;;  %v8338_v34 = vpop.f32.mrb[21].mxu0  ;;  %v967_v37 = vsel %vm924_vm2, %v8334_v32, -inf }
 0x346   : > { %968 = vmax.xlane.f32.xlu1 %v967_v37  ;;  %v8343_v39 = vpop.f32.mrb[22].mxu0  ;;  %959 = vmax.xlane.f32.xlu0 %v958_v38  ;;  %v8345_v40 = vpop.f32.mrb[2].mxu1  ;;  %v961_v43 = vsel %vm924_vm2, %v8338_v34, -inf  ;;  %v925_v38 = vsel %vm924_vm2, %v8336_v33, -inf }
 0x347   : > { %v8347_v41 = vpop.f32.mrb[3].mxu1  ;;  %v912_v42 = vpop.f32.mrb[23].mxu0  ;;  %v970_v44 = vsel %vm924_vm2, %v8343_v39, -inf }
 0x348   : > { %v964_v49 = vsel %vm924_vm2, %v912_v42, -inf }
 0x34a   : > { %962 = vmax.xlane.f32.xlu1 %v961_v43  ;;  %971 = vmax.xlane.f32.xlu0 %v970_v44 }
 0x34c   : > { %v8353_v47 = vpop.f32.mrb[4].mxu1 }
 0x34d   : > { %v8355_v48 = vpop.f32.mrb[5].mxu1  ;;  %v943_v44 = vsel %vm924_vm2, %v8353_v47, -inf }
 0x34e   : > { %965 = vmax.xlane.f32.xlu0 %v964_v49  ;;  %v8358_v50 = vpop.f32.mrb[6].mxu1  ;;  %v937_v43 = vsel %vm924_vm2, %v8355_v48, -inf }
 0x34f   : > { %v8360_v51 = vpop.f32.mrb[7].mxu1 }
 0x35b   : > { %1413 = vrot.lane.b32.xlu1 %v8279_v2, %s7857_s19 }
 0x35f   : > { %1415 = vrot.lane.b32.xlu1 %v8277_v1, %s7857_s19 }
 0x364   : > { %1411 = vrot.lane.b32.xlu0 %v8269_v55, %s7857_s19 }
 0x3cb   : > { %v957_v52 = vpop.xlane.xlu0 %956 }
 0x3cc   : > { %v983_v53 = vsub.f32 %v6612_v24, %v957_v52  ;;  %v940_v52 = vsel %vm924_vm2, %v8360_v51, -inf }
 0x3ce   : > { %v1009_v54 = vmul.f32 1.442695, %v983_v53  ;;  %v954_v58 = vpop.xlane.xlu1 %953 }
 0x3cf   : > { %v951_v57 = vpop.xlane.xlu0 %950  ;;  %v982_v61 = vsub.f32 %v896_v28, %v954_v58 }
 0x3d0   : > { %7213 = vpow2.f32 %v1009_v54  ;;  %v981_v59 = vsub.f32 %v893_v25, %v951_v57  ;;  %v946_v54 = vsel %vm924_vm2, %v8358_v50, -inf }
 0x3d1   : > { %v1007_v3 = vmul.f32 1.442695, %v982_v61 }
 0x3d2   : > { %v1005_v60 = vmul.f32 1.442695, %v981_v59 }
 0x3d3   : > { %v960_v62 = vpop.xlane.xlu0 %959  ;;  %v969_v15 = vpop.xlane.xlu1 %968 }
 0x3d4   : > { %7215 = vpow2.f32 %v1005_v60  ;;  %v984_v63 = vsub.f32 %v6613_v27, %v960_v62  ;;  %v987_v17 = vsub.f32 %v8334_v32, %v969_v15  ;;  %v928_v27 = vsel %vm924_vm2, %v8347_v41, -inf }
 0x3d6   : > { %v1011_v0 = vmul.f32 1.442695, %v984_v63  ;;  %v1017_v19 = vmul.f32 1.442695, %v987_v17 }
 0x3d7   : > { %v972_v12 = vpop.xlane.xlu0 %971  ;;  %v963_v18 = vpop.xlane.xlu1 %962 }
 0x3d8   : > { %7217 = vpow2.f32 %v1011_v0  ;;  %v985_v21 = vsub.f32 %v8338_v34, %v963_v18  ;;  %v988_v23 = vsub.f32 %v8343_v39, %v972_v12  ;;  %v931_v39 = vsel %vm924_vm2, %v8332_v31, -inf }
 0x3d9   : > { %7219 = vpow2.f32 %v1007_v3 }
 0x3da   : > { %v8368_v4 = vpop.eup %7213  ;;  %v1013_v22 = vmul.f32 1.442695, %v985_v21  ;;  %v1019_v25 = vmul.f32 1.442695, %v988_v23 }
 0x3db   : > { %v1051_v5 = vsel %vm924_vm2, %v8368_v4, 0.0  ;;  %v966_v13 = vpop.xlane.xlu0 %965  ;;  %v1414_v49 = vpop.permute.xlu1 %1413 }
 0x3dc   : > { %1052 = vadd.xlane.f32.xlu1 %v1051_v5  ;;  %v986_v14 = vsub.f32 %v912_v42, %v966_v13  ;;  %v934_v42 = vsel %vm924_vm2, %v8345_v40, -inf }
 0x3de   : > { %v8372_v6 = vpop.eup %7215  ;;  %v1015_v16 = vmul.f32 1.442695, %v986_v14  ;;  %v1430_v14 = vsel %vm733_vm1, %v8312_v20, 0 }
 0x3df   : > { %v1045_v7 = vsel %vm924_vm2, %v8372_v6, 0.0  ;;  %v1416_v53 = vpop.permute.xlu1 %1415  ;;  %v1412_v58 = vpop.permute.xlu0 %1411 }
 0x3e0   : > { %1046 = vadd.xlane.f32.xlu1 %v1045_v7  ;;  %7221 = vpow2.f32 %v1015_v16 }
 0x3e1   : > { %7223 = vpow2.f32 %v1017_v19 }
 0x3e2   : > { %v8376_v8 = vpop.eup %7217  ;;  %7225 = vpow2.f32 %v1013_v22 }
 0x3e3   : > { %v1054_v9 = vsel %vm924_vm2, %v8376_v8, 0.0  ;;  %v8380_v10 = vpop.eup %7219  ;;  %7227 = vpow2.f32 %v1019_v25 }
 0x3e4   : > { %1055 = vadd.xlane.f32.xlu0 %v1054_v9  ;;  %v1048_v11 = vsel %vm924_vm2, %v8380_v10, 0.0 }
 0x3e8   : > { %1049 = vadd.xlane.f32.xlu0 %v1048_v11 }
 0x3ea   : > { %v8391_v24 = vpop.eup %7221 }
 0x3eb   : > { %v1060_v26 = vsel %vm924_vm2, %v8391_v24, 0.0  ;;  %v8397_v28 = vpop.eup %7223 }
 0x3ec   : > { %v1063_v29 = vsel %vm924_vm2, %v8397_v28, 0.0  ;;  %v8401_v30 = vpop.eup %7225 }
 0x3ed   : > { %v1057_v32 = vsel %vm924_vm2, %v8401_v30, 0.0  ;;  %v8405_v34 = vpop.eup %7227 }
 0x3ee   : > { %v1066_v37 = vsel %vm924_vm2, %v8405_v34, 0.0 }
 0x3f1   : > { %1403 = vrot.lane.b32.xlu1 %v8269_v55, %s7858_s22 }
 0x3fe   : > { %1401 = vrot.lane.b32.xlu0 %v8271_v56, %s7858_s22 }
 0x415   : > { %1061 = vadd.xlane.f32.xlu1 %v1060_v26 }
 0x419   : > { %929 = vmax.xlane.f32.xlu1 %v928_v27 }
 0x41d   : > { %1064 = vadd.xlane.f32.xlu0 %v1063_v29 }
 0x421   : > { %1058 = vadd.xlane.f32.xlu0 %v1057_v32 }
 0x425   : > { %1067 = vadd.xlane.f32.xlu0 %v1066_v37 }
 0x429   : > { %926 = vmax.xlane.f32.xlu0 %v925_v38 }
 0x42a   : > { %1405 = vrot.lane.b32.xlu1 %v8279_v2, %s7858_s22 }
 0x42d   : > { %932 = vmax.xlane.f32.xlu0 %v931_v39 }
 0x431   : > { %935 = vmax.xlane.f32.xlu0 %v934_v42 }
 0x447   : > { %1407 = vrot.lane.b32.xlu0 %v8277_v1, %s7858_s22 }
 0x44e   : > { %938 = vmax.xlane.f32.xlu1 %v937_v43 }
 0x452   : > { %944 = vmax.xlane.f32.xlu1 %v943_v44 }
 0x466   : > { %941 = vmax.xlane.f32.xlu0 %v940_v52 }
 0x469   : > { %v1053_v57 = vpop.xlane.xlu1 %1052 }
 0x46a   : > { %947 = vmax.xlane.f32.xlu0 %v946_v54 }
 0x46d   : > { %v1047_v59 = vpop.xlane.xlu1 %1046 }
 0x471   : > { %v1056_v60 = vpop.xlane.xlu0 %1055 }
 0x472   : > { %7229 = vrcp.f32 %v1056_v60 }
 0x473   : > { %7231 = vrcp.f32 %v1047_v59 }
 0x474   : > { %7233 = vrcp.f32 %v1053_v57 }
 0x475   : > { %v1050_v61 = vpop.xlane.xlu0 %1049 }
 0x476   : > { %7235 = vrcp.f32 %v1050_v61 }
 0x479   : > { %v1402_v20 = vpop.permute.xlu0 %1401 }
 0x47c   : > { %v7230_v62 = vpop.eup %7229 }
 0x47d   : > { %v7232_v63 = vpop.eup %7231  ;;  %v1096_v5 = vmul.f32 %v7230_v62, %v8376_v8  ;;  %v1433_v8 = vsel %vm733_vm1, %v1412_v58, 0 }
 0x47e   : > { %v7234_v0 = vpop.eup %7233  ;;  %v1093_v7 = vmul.f32 %v7232_v63, %v8372_v6  ;;  %v1436_v6 = vsel %vm733_vm1, %v1414_v49, 0 }
 0x47f   : > { %v1095_v11 = vmul.f32 %v7234_v0, %v8368_v4  ;;  %v1404_v4 = vpop.permute.xlu1 %1403 }
 0x480   : > { %v7236_v3 = vpop.eup %7235 }
 0x481   : > { %v1094_v9 = vmul.f32 %v7236_v3, %v8380_v10  ;;  %v1106_v13 = vpack.c.bf16 %v1096_v5, %v1095_v11  ;;  %v1439_v10 = vsel %vm733_vm1, %v1416_v53, 0 }
 0x483   : > { %v1105_v12 = vpack.c.bf16 %v1094_v9, %v1093_v7 }
 0x485   : > { %6642 = vmatprep.mubr.msk.bf16.mxu0 %vm924_vm2, %v1105_v12 }
 0x486   : > { %6643 = vmatmul.mubr.msk.bf16.vlgmr.msra.gmra.mrb[24].mxu0 %vm924_vm2, %v1106_v13 }
 0x487   : > { %6667 = vmatpush3.bf16.xpose.msra.mxu0 %v1430_v14 }
 0x488   : > { %7051 = vmatprep.subr.msk.bf16.mxu0 %vm733_vm1, %v1412_v58 }
 0x48f   : > { %6669 = vmatpush3.bf16.xpose.msra.mxu0 %v1433_v8 }
 0x490   : > { %7052 = vmatprep.subr.msk.bf16.mxu0 %vm733_vm1, %v1414_v49 }
 0x497   : > { %6671 = vmatpush3.bf16.xpose.msra.mxu0 %v1436_v6 }
 0x498   : > { %7053 = vmatprep.subr.msk.bf16.mxu0 %vm733_vm1, %v1416_v53 }
 0x49f   : > { %6673 = vmatpush3.bf16.xpose.msra.mxu0 %v1439_v10 }
 0x4a2   : > { %v1062_v15 = vpop.xlane.xlu1 %1061 }
 0x4a6   : > { %v930_v16 = vpop.xlane.xlu1 %929 }
 0x4a7   : > { %v974_v17 = vsub.f32 %v8347_v41, %v930_v16 }
 0x4a9   : > { %v991_v18 = vmul.f32 1.442695, %v974_v17 }
 0x4aa   : > { %v1065_v19 = vpop.xlane.xlu0 %1064 }
 0x4ab   : > { %7237 = vpow2.f32 %v991_v18 }
 0x4ac   : > { %7239 = vrcp.f32 %v1062_v15 }
 0x4ae   : > { %v1059_v21 = vpop.xlane.xlu0 %1058 }
 0x4af   : > { %7241 = vrcp.f32 %v1059_v21 }
 0x4b0   : > { %7243 = vrcp.f32 %v1065_v19 }
 0x4b2   : > { %v1068_v22 = vpop.xlane.xlu0 %1067 }
 0x4b3   : > { %7245 = vrcp.f32 %v1068_v22 }
 0x4b5   : > { %v8442_v23 = vpop.eup %7237 }
 0x4b6   : > { %v1024_v25 = vsel %vm924_vm2, %v8442_v23, 0.0  ;;  %v927_v26 = vpop.xlane.xlu0 %926  ;;  %v7240_v27 = vpop.eup %7239 }
 0x4b7   : > { %1025 = vadd.xlane.f32.xlu0 %v1024_v25  ;;  %v973_v29 = vsub.f32 %v8336_v33, %v927_v26  ;;  %v1098_v39 = vmul.f32 %v7240_v27, %v8391_v24 }
 0x4b9   : > { %v7242_v41 = vpop.eup %7241  ;;  %v989_v32 = vmul.f32 1.442695, %v973_v29 }
 0x4ba   : > { %v933_v37 = vpop.xlane.xlu0 %932  ;;  %v1097_v38 = vmul.f32 %v7242_v41, %v8401_v30  ;;  %v7244_v42 = vpop.eup %7243 }
 0x4bb   : > { %7247 = vpow2.f32 %v989_v32  ;;  %v975_v43 = vsub.f32 %v8332_v31, %v933_v37  ;;  %v1099_v54 = vmul.f32 %v7244_v42, %v8397_v28  ;;  %v1406_v28 = vpop.permute.xlu1 %1405 }
 0x4bc   : > { %v1107_v44 = vpack.c.bf16 %v1098_v39, %v1097_v38 }
 0x4bd   : > { %v7246_v49 = vpop.eup %7245  ;;  %v993_v52 = vmul.f32 1.442695, %v975_v43 }
 0x4be   : > { %6646 = vmatprep.mubr.msk.bf16.mxu0 %vm924_vm2, %v1107_v44  ;;  %v936_v53 = vpop.xlane.xlu0 %935  ;;  %v1100_v33 = vmul.f32 %v7246_v49, %v8405_v34 }
 0x4bf   : > { %7249 = vpow2.f32 %v993_v52  ;;  %v976_v57 = vsub.f32 %v8345_v40, %v936_v53 }
 0x4c0   : > { %v1108_v30 = vpack.c.bf16 %v1100_v33, %v1099_v54 }
 0x4c1   : > { %v995_v58 = vmul.f32 1.442695, %v976_v57 }
 0x4c2   : > { %6647 = vmatmul.mubr.msk.bf16.gmra.mrb[28].mxu0 %vm924_vm2, %v1108_v30  ;;  %v1408_v61 = vpop.permute.xlu0 %1407 }
 0x4c3   : > { %7251 = vpow2.f32 %v995_v58  ;;  %6674 = vmatprep.mubr.msk.bf16.mxu0 %vm733_vm1, %v1402_v20 }
 0x4c5   : > { %v8456_v31 = vpop.eup %7247 }
 0x4c6   : > { %v1021_v24 = vsel %vm924_vm2, %v8456_v31, 0.0 }
 0x4c7   : > { %1022 = vadd.xlane.f32.xlu1 %v1021_v24 }
 0x4c9   : > { %v8460_v59 = vpop.eup %7249 }
 0x4ca   : > { %6675 = vmatmul.mubr.msk.bf16.vlgmr.msra.gmra.mrb[32].mxu0 %vm733_vm1, %v1404_v4  ;;  %v1027_v40 = vsel %vm924_vm2, %v8460_v59, 0.0 }
 0x4cb   : > { %6678 = vmatprep.mubr.msk.bf16.mxu0 %vm733_vm1, %v1406_v28  ;;  %1028 = vadd.xlane.f32.xlu1 %v1027_v40 }
 0x4cd   : > { %v8466_v34 = vpop.eup %7251 }
 0x4ce   : > { %v1030_v60 = vsel %vm924_vm2, %v8466_v34, 0.0 }
 0x4cf   : > { %1031 = vadd.xlane.f32.xlu0 %v1030_v60 }
 0x4d2   : > { %6679 = vmatmul.mubr.msk.bf16.gmra.mrb[36].mxu0 %vm733_vm1, %v1408_v61 }
 0x4db   : > { %v939_v62 = vpop.xlane.xlu1 %938 }
 0x4dc   : > { %1109 = vrot.lane.b32.xlu1 %v8261_v36, %s7856_s2  ;;  %v977_v63 = vsub.f32 %v8355_v48, %v939_v62 }
 0x4de   : > { %v997_v5 = vmul.f32 1.442695, %v977_v63 }
 0x4df   : > { %v945_v0 = vpop.xlane.xlu1 %944 }
 0x4e0   : > { %1113 = vrot.lane.b32.xlu1 %v8267_v46, %s7856_s2  ;;  %v979_v3 = vsub.f32 %v8353_v47, %v945_v0  ;;  %7253 = vpow2.f32 %v997_v5 }
 0x4e2   : > { %v1001_v11 = vmul.f32 1.442695, %v979_v3 }
 0x4e4   : > { %1115 = vrot.lane.b32.xlu1 %v8265_v45, %s7856_s2  ;;  %7255 = vpow2.f32 %v1001_v11 }
 0x4e5   : > { %1111 = vrot.lane.b32.xlu0 %v8259_v35, %s7856_s2  ;;  %s7863_s2 = smov 72  }
 0x4ea   : > { %v8483_v6 = vpop.eup %7253 }
 0x4eb   : > { %v1033_v47 = vsel %vm924_vm2, %v8483_v6, 0.0 }
 0x4ee   : > { %v8485_v48 = vpop.eup %7255 }
 0x4f3   : > { %v942_v7 = vpop.xlane.xlu0 %941 }
 0x4f4   : > { %v978_v9 = vsub.f32 %v8360_v51, %v942_v7  ;;  %v1039_v51 = vsel %vm924_vm2, %v8485_v48, 0.0 }
 0x4f6   : > { %v999_v12 = vmul.f32 1.442695, %v978_v9 }
 0x4f7   : > { %v948_v13 = vpop.xlane.xlu0 %947 }
 0x4f8   : > { %v980_v14 = vsub.f32 %v8358_v50, %v948_v13  ;;  %7257 = vpow2.f32 %v999_v12 }
 0x4fa   : > { %v1003_v8 = vmul.f32 1.442695, %v980_v14 }
 0x4fc   : > { %7259 = vpow2.f32 %v1003_v8 }
 0x502   : > { %v8489_v4 = vpop.eup %7257 }
 0x503   : > { %v1036_v50 = vsel %vm924_vm2, %v8489_v4, 0.0 }
 0x504   : > { %1034 = vadd.xlane.f32.xlu0 %v1033_v47 }
 0x506   : > { %v8495_v10 = vpop.eup %7259 }
 0x507   : > { %v1042_v15 = vsel %vm924_vm2, %v8495_v10, 0.0 }
 0x508   : > { %1040 = vadd.xlane.f32.xlu0 %v1039_v51  ;;  %1037 = vadd.xlane.f32.xlu1 %v1036_v50 }
 0x50c   : > { %1043 = vadd.xlane.f32.xlu0 %v1042_v15 }
 0x519   : > { %1304 = vrot.lane.b32.xlu1 %v8261_v36, %s7857_s19 }
 0x51d   : > { %1308 = vrot.lane.b32.xlu1 %v8267_v46, %s7857_s19 }
 0x521   : > { %1310 = vrot.lane.b32.xlu1 %v8265_v45, %s7857_s19 }
 0x522   : > { %1306 = vrot.lane.b32.xlu0 %v8259_v35, %s7857_s19 }
 0x525   : > { %1298 = vrot.lane.b32.xlu1 %v8259_v35, %s7858_s22 }
 0x526   : > { %1296 = vrot.lane.b32.xlu0 %v8261_v36, %s7858_s22 }
 0x529   : > { %1302 = vrot.lane.b32.xlu1 %v8265_v45, %s7858_s22 }
 0x52a   : > { %1300 = vrot.lane.b32.xlu0 %v8267_v46, %s7858_s22 }
 0x52d   : > { %1779 = vrot.lane.b32.xlu1 %v8271_v56, %s7859_s29 }
 0x52e   : > { %1781 = vrot.lane.b32.xlu0 %v8269_v55, %s7859_s29 }
 0x531   : > { %1783 = vrot.lane.b32.xlu1 %v8279_v2, %s7859_s29 }
 0x532   : > { %2137 = vrot.lane.b32.xlu0 %v8259_v35, %s7860_s21 }
 0x535   : > { %1785 = vrot.lane.b32.xlu1 %v8277_v1, %s7859_s29 }
 0x539   : > { %2135 = vrot.lane.b32.xlu1 %v8261_v36, %s7860_s21 }
 0x53d   : > { %2139 = vrot.lane.b32.xlu1 %v8267_v46, %s7860_s21 }
 0x541   : > { %2141 = vrot.lane.b32.xlu1 %v8265_v45, %s7860_s21 }
 0x544   : > { %v1026_v16 = vpop.xlane.xlu0 %1025 }
 0x545   : > { %7261 = vrcp.f32 %v1026_v16 }
 0x54f   : > { %v7262_v27 = vpop.eup %7261 }
 0x550   : > { %v1086_v38 = vmul.f32 %v7262_v27, %v8442_v23 }
 0x554   : > { %v1023_v20 = vpop.xlane.xlu1 %1022 }
 0x555   : > { %7263 = vrcp.f32 %v1023_v20 }
 0x558   : > { %v1029_v17 = vpop.xlane.xlu1 %1028 }
 0x559   : > { %v8531_v18 = vpop.f32.mrb[24].mxu0  ;;  %7265 = vrcp.f32 %v1029_v17 }
 0x55a   : > { %v8533_v19 = vpop.f32.mrb[25].mxu0 }
 0x55b   : > { %v8535_v21 = vpop.f32.mrb[26].mxu0 }
 0x55c   : > { %v8539_v25 = vpop.f32.mrb[27].mxu0  ;;  %v1110_v26 = vpop.permute.xlu1 %1109 }
 0x55d   : > { %v1032_v41 = vpop.xlane.xlu0 %1031  ;;  %6618 = vmatprep.subr.bf16.mxu1 %v1110_v26 }
 0x55e   : > { %7267 = vrcp.f32 %v1032_v41  ;;  %6619 = vmatpush3.bf16.msra.mxu1 %v1110_v26 }
 0x55f   : > { %v7264_v32 = vpop.eup %7263 }
 0x560   : > { %v1085_v37 = vmul.f32 %v7264_v32, %v8456_v31  ;;  %v1114_v39 = vpop.permute.xlu1 %1113 }
 0x561   : > { %v1112_v42 = vpop.permute.xlu0 %1111 }
 0x562   : > { %6620 = vmatprep.subr.bf16.mxu1 %v1112_v42  ;;  %v1101_v43 = vpack.c.bf16 %v1086_v38, %v1085_v37 }
 0x563   : > { %6621 = vmatpush3.bf16.msra.mxu1 %v1112_v42  ;;  %v7266_v44 = vpop.eup %7265 }
 0x564   : > { %6622 = vmatprep.subr.bf16.mxu1 %v1114_v39  ;;  %6626 = vmatprep.mubr.msk.bf16.mxu1 %vm924_vm2, %v1101_v43  ;;  %v1116_v49 = vpop.permute.xlu1 %1115  ;;  %v1087_v53 = vmul.f32 %v7266_v44, %v8460_v59 }
 0x567   : > { %6623 = vmatpush3.bf16.msra.mxu1 %v1114_v39 }
 0x568   : > { %v7268_v52 = vpop.eup %7267  ;;  %6624 = vmatprep.subr.bf16.mxu1 %v1116_v49 }
 0x569   : > { %v1088_v54 = vmul.f32 %v7268_v52, %v8466_v34 }
 0x56b   : > { %v1102_v33 = vpack.c.bf16 %v1088_v54, %v1087_v53  ;;  %6625 = vmatpush3.bf16.msra.mxu1 %v1116_v49 }
 0x56e   : > { %6627 = vmatmul.mubr.msk.bf16.vlgmr.msra.gmra.mrb[8].mxu1 %vm924_vm2, %v1102_v33 }
 0x591   : > { %v1035_v23 = vpop.xlane.xlu0 %1034 }
 0x592   : > { %7269 = vrcp.f32 %v1035_v23 }
 0x595   : > { %v8549_v57 = vpop.f32.mrb[28].mxu0  ;;  %v1038_v30 = vpop.xlane.xlu1 %1037 }
 0x596   : > { %7271 = vrcp.f32 %v1038_v30  ;;  %v1041_v58 = vpop.xlane.xlu0 %1040  ;;  %v8551_v31 = vpop.f32.mrb[29].mxu0 }
 0x597   : > { %v8553_v24 = vpop.f32.mrb[30].mxu0  ;;  %7273 = vrcp.f32 %v1041_v58 }
 0x598   : > { %v8557_v28 = vpop.f32.mrb[31].mxu0 }
 0x599   : > { %v1305_v34 = vpop.permute.xlu1 %1304 }
 0x59a   : > { %v1044_v60 = vpop.xlane.xlu0 %1043  ;;  %7046 = vmatprep.subr.msk.bf16.mxu1 %vm733_vm1, %v1305_v34  ;;  %v1325_v61 = vsel %vm733_vm1, %v1305_v34, 0 }
 0x59b   : > { %7275 = vrcp.f32 %v1044_v60  ;;  %6651 = vmatpush3.bf16.xpose.msra.mxu1 %v1325_v61 }
 0x59c   : > { %v7270_v0 = vpop.eup %7269 }
 0x59d   : > { %v8563_v62 = vpop.f32.mrb[32].mxu0  ;;  %v1309_v63 = vpop.permute.xlu1 %1308  ;;  %v1089_v8 = vmul.f32 %v7270_v0, %v8483_v6 }
 0x59e   : > { %v1307_v3 = vpop.permute.xlu0 %1306  ;;  %v8565_v5 = vpop.f32.mrb[33].mxu0  ;;  %v1536_v7 = vsel %vm924_vm2, %v8563_v62, -inf }
 0x59f   : > { %7047 = vmatprep.subr.msk.bf16.mxu1 %vm733_vm1, %v1307_v3  ;;  %v8570_v9 = vpop.f32.mrb[34].mxu0  ;;  %1537 = vmax.xlane.f32.xlu0 %v1536_v7  ;;  %v1530_v51 = vsel %vm924_vm2, %v8565_v5, -inf  ;;  %v1328_v50 = vsel %vm733_vm1, %v1307_v3, 0 }
 0x5a0   : > { %v7272_v11 = vpop.eup %7271  ;;  %v8572_v12 = vpop.f32.mrb[35].mxu0  ;;  %v1539_v41 = vsel %vm924_vm2, %v8570_v9, -inf }
 0x5a1   : > { %v1311_v13 = vpop.permute.xlu1 %1310  ;;  %v1533_v14 = vsel %vm924_vm2, %v8572_v12, -inf  ;;  %v1090_v47 = vmul.f32 %v7272_v11, %v8489_v4  ;;  %v7274_v15 = vpop.eup %7273 }
 0x5a2   : > { %1534 = vmax.xlane.f32.xlu1 %v1533_v14  ;;  %v1297_v16 = vpop.permute.xlu0 %1296  ;;  %v1091_v32 = vmul.f32 %v7274_v15, %v8485_v48  ;;  %v1331_v48 = vsel %vm733_vm1, %v1309_v63, 0  ;;  %v1334_v54 = vsel %vm733_vm1, %v1311_v13, 0 }
 0x5a3   : > { %1531 = vmax.xlane.f32.xlu0 %v1530_v51  ;;  %6653 = vmatpush3.bf16.xpose.msra.mxu1 %v1328_v50  ;;  %v1103_v20 = vpack.c.bf16 %v1090_v47, %v1089_v8 }
 0x5a4   : > { %7048 = vmatprep.subr.msk.bf16.mxu1 %vm733_vm1, %v1309_v63 }
 0x5a5   : > { %v7276_v17 = vpop.eup %7275  ;;  %v8582_v26 = vpop.f32.mrb[36].mxu0  ;;  %6630 = vmatprep.mubr.msk.bf16.mxu1 %vm924_vm2, %v1103_v20 }
 0x5a6   : > { %v1299_v27 = vpop.permute.xlu1 %1298  ;;  %v8585_v6 = vpop.f32.mrb[37].mxu0  ;;  %v1548_v4 = vsel %vm924_vm2, %v8582_v26, -inf  ;;  %v1092_v37 = vmul.f32 %v7276_v17, %v8495_v10 }
 0x5a7   : > { %v8593_v38 = vpop.f32.mrb[38].mxu0  ;;  %1549 = vmax.xlane.f32.xlu1 %v1548_v4  ;;  %1540 = vmax.xlane.f32.xlu0 %v1539_v41  ;;  %v1301_v43 = vpop.permute.xlu0 %1300  ;;  %v1542_v49 = vsel %vm924_vm2, %v8585_v6, -inf }
 0x5a8   : > { %v8595_v39 = vpop.f32.mrb[39].mxu0  ;;  %v1104_v42 = vpack.c.bf16 %v1092_v37, %v1091_v32  ;;  %v1551_v30 = vsel %vm924_vm2, %v8593_v38, -inf }
 0x5a9   : > { %v1545_v58 = vsel %vm924_vm2, %v8595_v39, -inf }
 0x5aa   : > { %v1303_v44 = vpop.permute.xlu1 %1302  ;;  %6631 = vmatmul.mubr.msk.bf16.gmra.mrb[12].mxu1 %vm924_vm2, %v1104_v42 }
 0x5ab   : > { %6658 = vmatprep.mubr.msk.bf16.mxu1 %vm733_vm1, %v1297_v16  ;;  %1543 = vmax.xlane.f32.xlu1 %v1542_v49  ;;  %v1782_v52 = vpop.permute.xlu0 %1781 }
 0x5ac   : > { %6655 = vmatpush3.bf16.xpose.msra.mxu1 %v1331_v48 }
 0x5ad   : > { %7049 = vmatprep.subr.msk.bf16.mxu1 %vm733_vm1, %v1311_v13 }
 0x5ae   : > { %v1780_v10 = vpop.permute.xlu1 %1779 }
 0x5af   : > { %6698 = vmatprep.subr.bf16.mxu0 %v1780_v10  ;;  %v8633_v7 = vpop.permute.xlu0 %2137 }
 0x5b0   : > { %6699 = vmatpush3.bf16.msra.mxu0 %v1780_v10 }
 0x5b1   : > { %6700 = vmatprep.subr.bf16.mxu0 %v1782_v52 }
 0x5b2   : > { %v1784_v53 = vpop.permute.xlu1 %1783 }
 0x5b4   : > { %6701 = vmatpush3.bf16.msra.mxu0 %v1782_v52  ;;  %6657 = vmatpush3.bf16.xpose.msra.mxu1 %v1334_v54 }
 0x5b5   : > { %6702 = vmatprep.subr.bf16.mxu0 %v1784_v53 }
 0x5b6   : > { %v1786_v33 = vpop.permute.xlu1 %1785 }
 0x5b8   : > { %6703 = vmatpush3.bf16.msra.mxu0 %v1784_v53 }
 0x5b9   : > { %6704 = vmatprep.subr.bf16.mxu0 %v1786_v33 }
 0x5ba   : > { %v8605_v23 = vpop.permute.xlu1 %2135 }
 0x5bb   : > { %6659 = vmatmul.mubr.msk.bf16.vlgmr.msra.gmra.mrb[16].mxu1 %vm733_vm1, %v1299_v27 }
 0x5bc   : > { %6705 = vmatpush3.bf16.msra.mxu0 %v1786_v33  ;;  %6662 = vmatprep.mubr.msk.bf16.mxu1 %vm733_vm1, %v1301_v43 }
 0x5bd   : > { %2240 = vrot.lane.b32.xlu1 %v8271_v56, %s7860_s21  ;;  %7056 = vmatprep.subr.msk.bf16.mxu0 %vm733_vm1, %v8605_v23 }
 0x5be   : > { %2127 = vrot.lane.b32.xlu0 %v8261_v36, %s7861_s30  ;;  %v8635_v13 = vpop.permute.xlu1 %2139 }
 0x5c2   : > { %v8637_v8 = vpop.permute.xlu1 %2141 }
 0x5c3   : > { %6663 = vmatmul.mubr.msk.bf16.gmra.mrb[20].mxu1 %vm733_vm1, %v1303_v44 }
 0x5dd   : > { %1552 = vmax.xlane.f32.xlu0 %v1551_v30 }
 0x5e1   : > { %1546 = vmax.xlane.f32.xlu0 %v1545_v58 }
 0x5f7   : > { %2129 = vrot.lane.b32.xlu0 %v8259_v35, %s7861_s30 }
 0x62c   : > { %v1538_v11 = vpop.xlane.xlu0 %1537 }
 0x62d   : > { %v1564_v16 = vsub.f32 %v8563_v62, %v1538_v11 }
 0x62f   : > { %v1535_v47 = vpop.xlane.xlu1 %1534  ;;  %v1590_v32 = vmul.f32 1.442695, %v1564_v16 }
 0x630   : > { %v1532_v14 = vpop.xlane.xlu0 %1531  ;;  %v1563_v43 = vsub.f32 %v8572_v12, %v1535_v47 }
 0x631   : > { %v1562_v37 = vsub.f32 %v8565_v5, %v1532_v14  ;;  %7277 = vpow2.f32 %v1590_v32 }
 0x632   : > { %v1588_v49 = vmul.f32 1.442695, %v1563_v43 }
 0x633   : > { %v1586_v62 = vmul.f32 1.442695, %v1562_v37 }
 0x634   : > { %v1541_v50 = vpop.xlane.xlu0 %1540  ;;  %v1550_v42 = vpop.xlane.xlu1 %1549 }
 0x635   : > { %v1565_v4 = vsub.f32 %v8570_v9, %v1541_v50  ;;  %v1568_v48 = vsub.f32 %v8582_v26, %v1550_v42 }
 0x637   : > { %v1592_v44 = vmul.f32 1.442695, %v1565_v4  ;;  %v1598_v9 = vmul.f32 1.442695, %v1568_v48 }
 0x638   : > { %v1544_v10 = vpop.xlane.xlu1 %1543  ;;  %v8656_v52 = vpop.permute.xlu0 %2127 }
 0x639   : > { %7279 = vpow2.f32 %v1592_v44  ;;  %v1566_v53 = vsub.f32 %v8585_v6, %v1544_v10 }
 0x63a   : > { %7281 = vpow2.f32 %v1586_v62 }
 0x63b   : > { %7283 = vpow2.f32 %v1588_v49  ;;  %v8667_v26 = vpop.eup %7277  ;;  %v1594_v58 = vmul.f32 1.442695, %v1566_v53 }
 0x63c   : > { %7285 = vpow2.f32 %v1598_v9  ;;  %v1632_v16 = vsel %vm924_vm2, %v8667_v26, 0.0 }
 0x63d   : > { %7287 = vpow2.f32 %v1594_v58 }
 0x641   : > { %v8621_v34 = vpop.f32.mrb[8].mxu1 }
 0x642   : > { %v8623_v60 = vpop.f32.mrb[9].mxu1 }
 0x643   : > { %v8625_v61 = vpop.f32.mrb[10].mxu1  ;;  %v8674_v47 = vpop.eup %7279 }
 0x644   : > { %v8629_v0 = vpop.f32.mrb[11].mxu1  ;;  %v8678_v4 = vpop.eup %7281 }
 0x645   : > { %v8684_v42 = vpop.eup %7283  ;;  %v1626_v49 = vsel %vm924_vm2, %v8678_v4, 0.0 }
 0x646   : > { %v1629_v10 = vsel %vm924_vm2, %v8684_v42, 0.0  ;;  %v8697_v9 = vpop.eup %7285 }
 0x66a   : > { %v1553_v54 = vpop.xlane.xlu0 %1552 }
 0x66b   : > { %v1569_v11 = vsub.f32 %v8593_v38, %v1553_v54  ;;  %v1635_v38 = vsel %vm924_vm2, %v8674_v47, 0.0  ;;  %v1644_v54 = vsel %vm924_vm2, %v8697_v9, 0.0 }
 0x66d   : > { %v1600_v32 = vmul.f32 1.442695, %v1569_v11 }
 0x66e   : > { %v1547_v50 = vpop.xlane.xlu0 %1546 }
 0x66f   : > { %v1567_v43 = vsub.f32 %v8595_v39, %v1547_v50  ;;  %7289 = vpow2.f32 %v1600_v32 }
 0x671   : > { %v1596_v53 = vmul.f32 1.442695, %v1567_v43 }
 0x673   : > { %7291 = vpow2.f32 %v1596_v53  ;;  %v8743_v53 = vpop.permute.xlu1 %2240 }
 0x67d   : > { %v8639_v51 = vpop.f32.mrb[12].mxu1 }
 0x67e   : > { %v8641_v15 = vpop.f32.mrb[13].mxu1 }
 0x67f   : > { %v8644_v20 = vpop.f32.mrb[14].mxu1 }
 0x680   : > { %v8648_v27 = vpop.f32.mrb[15].mxu1 }
 0x68e   : > { %v8659_v5 = vpop.f32.mrb[16].mxu1 }
 0x68f   : > { %v8661_v33 = vpop.f32.mrb[17].mxu1  ;;  %v1512_v39 = vsel %vm924_vm2, %v8659_v5, -inf }
 0x690   : > { %v8663_v12 = vpop.f32.mrb[18].mxu1  ;;  %v1506_v30 = vsel %vm924_vm2, %v8661_v33, -inf }
 0x691   : > { %1507 = vmax.xlane.f32.xlu1 %v1506_v30  ;;  %v8670_v14 = vpop.f32.mrb[19].mxu1  ;;  %v8703_v30 = vpop.eup %7287  ;;  %v1515_v58 = vsel %vm924_vm2, %v8663_v12, -inf }
 0x692   : > { %v1509_v6 = vsel %vm924_vm2, %v8670_v14, -inf  ;;  %v1638_v11 = vsel %vm924_vm2, %v8703_v30, 0.0 }
 0x693   : > { %1510 = vmax.xlane.f32.xlu0 %v1509_v6  ;;  %v8709_v6 = vpop.eup %7289 }
 0x695   : > { %1633 = vadd.xlane.f32.xlu1 %v1632_v16  ;;  %v1647_v16 = vsel %vm924_vm2, %v8709_v6, 0.0 }
 0x696   : > { %v8680_v37 = vpop.f32.mrb[20].mxu1 }
 0x697   : > { %v8687_v44 = vpop.f32.mrb[21].mxu1  ;;  %1636 = vadd.xlane.f32.xlu0 %v1635_v38  ;;  %v8717_v38 = vpop.eup %7291 }
 0x698   : > { %v8689_v62 = vpop.f32.mrb[22].mxu1  ;;  %v1518_v50 = vsel %vm924_vm2, %v8687_v44, -inf  ;;  %v1641_v43 = vsel %vm924_vm2, %v8717_v38, 0.0 }
 0x699   : > { %v8693_v48 = vpop.f32.mrb[23].mxu1  ;;  %1627 = vadd.xlane.f32.xlu1 %v1626_v49  ;;  %v1524_v49 = vsel %vm924_vm2, %v8680_v37, -inf }
 0x69a   : > { %v1521_v32 = vsel %vm924_vm2, %v8693_v48, -inf }
 0x69b   : > { %1630 = vadd.xlane.f32.xlu0 %v1629_v10  ;;  %v1527_v10 = vsel %vm924_vm2, %v8689_v62, -inf }
 0x69d   : > { %1513 = vmax.xlane.f32.xlu1 %v1512_v39  ;;  %v8745_v39 = vpop.permute.xlu0 %2129 }
 0x69f   : > { %1645 = vadd.xlane.f32.xlu0 %v1644_v54 }
 0x6a1   : > { %1516 = vmax.xlane.f32.xlu1 %v1515_v58 }
 0x6a3   : > { %1639 = vadd.xlane.f32.xlu0 %v1638_v11 }
 0x6a5   : > { %1519 = vmax.xlane.f32.xlu1 %v1518_v50 }
 0x6a7   : > { %1648 = vadd.xlane.f32.xlu0 %v1647_v16 }
 0x6a9   : > { %1522 = vmax.xlane.f32.xlu1 %v1521_v32 }
 0x6ad   : > { %1642 = vadd.xlane.f32.xlu1 %v1641_v43 }
 0x6bd   : > { %2242 = vrot.lane.b32.xlu0 %v8269_v55, %s7860_s21 }
 0x6be   : > { %2244 = vrot.lane.b32.xlu1 %v8279_v2, %s7860_s21 }
 0x6dc   : > { %1525 = vmax.xlane.f32.xlu0 %v1524_v49 }
 0x6e2   : > { %1528 = vmax.xlane.f32.xlu1 %v1527_v10 }
 0x6f2   : > { %2131 = vrot.lane.b32.xlu0 %v8267_v46, %s7861_s30 }
 0x6f3   : > { %2133 = vrot.lane.b32.xlu1 %v8265_v45, %s7861_s30 }
 0x6f6   : > { %2246 = vrot.lane.b32.xlu0 %v8277_v1, %s7860_s21  ;;  %s7865_s21 = smov 40  }
 0x6f7   : > { %2238 = vrot.lane.b32.xlu1 %v8277_v1, %s7861_s30 }
 0x6fa   : > { %2232 = vrot.lane.b32.xlu0 %v8271_v56, %s7861_s30 }
 0x6fe   : > { %2234 = vrot.lane.b32.xlu0 %v8269_v55, %s7861_s30 }
 0x702   : > { %2236 = vrot.lane.b32.xlu0 %v8279_v2, %s7861_s30  ;;  %s10629_s30 = sld [smem:[#allocation25_spill]] }
 0x71e   : > { %v1508_v54 = vpop.xlane.xlu1 %1507 }
 0x71f   : > { %v1554_v58 = vsub.f32 %v8661_v33, %v1508_v54 }
 0x720   : > { %v1511_v11 = vpop.xlane.xlu0 %1510 }
 0x721   : > { %v1570_v50 = vmul.f32 1.442695, %v1554_v58  ;;  %v1555_v16 = vsub.f32 %v8670_v14, %v1511_v11 }
 0x722   : > { %v1634_v32 = vpop.xlane.xlu1 %1633 }
 0x723   : > { %7293 = vpow2.f32 %v1570_v50  ;;  %v1572_v43 = vmul.f32 1.442695, %v1555_v16 }
 0x724   : > { %v1637_v49 = vpop.xlane.xlu0 %1636 }
 0x725   : > { %7295 = vpow2.f32 %v1572_v43 }
 0x726   : > { %7297 = vrcp.f32 %v1637_v49  ;;  %v1628_v10 = vpop.xlane.xlu1 %1627 }
 0x727   : > { %7299 = vrcp.f32 %v1628_v10 }
 0x728   : > { %7301 = vrcp.f32 %v1634_v32  ;;  %v1631_v59 = vpop.xlane.xlu0 %1630 }
 0x729   : > { %7303 = vrcp.f32 %v1631_v59 }
 0x72a   : > { %v1514_v40 = vpop.xlane.xlu1 %1513 }
 0x72b   : > { %v1556_v22 = vsub.f32 %v8659_v5, %v1514_v40 }
 0x72c   : > { %v1646_v29 = vpop.xlane.xlu0 %1645 }
 0x72d   : > { %v8750_v33 = vpop.eup %7293  ;;  %v1574_v54 = vmul.f32 1.442695, %v1556_v22 }
 0x72e   : > { %v1517_v58 = vpop.xlane.xlu1 %1516  ;;  %v1602_v14 = vsel %vm924_vm2, %v8750_v33, 0.0 }
 0x72f   : > { %v8754_v11 = vpop.eup %7295  ;;  %7305 = vpow2.f32 %v1574_v54  ;;  %v1557_v50 = vsub.f32 %v8663_v12, %v1517_v58  ;;  %1603 = vadd.xlane.f32.xlu0 %v1602_v14 }
 0x730   : > { %v7298_v16 = vpop.eup %7297  ;;  %v1640_v32 = vpop.xlane.xlu0 %1639  ;;  %v1605_v59 = vsel %vm924_vm2, %v8754_v11, 0.0 }
 0x731   : > { %v7300_v40 = vpop.eup %7299  ;;  %v1576_v5 = vmul.f32 1.442695, %v1557_v50  ;;  %1606 = vadd.xlane.f32.xlu1 %v1605_v59  ;;  %v1677_v10 = vmul.f32 %v7298_v16, %v8674_v47 }
 0x732   : > { %v7302_v43 = vpop.eup %7301  ;;  %v1520_v22 = vpop.xlane.xlu1 %1519  ;;  %v1674_v54 = vmul.f32 %v7300_v40, %v8678_v4 }
 0x733   : > { %v7304_v49 = vpop.eup %7303  ;;  %7307 = vpow2.f32 %v1576_v5  ;;  %v1558_v17 = vsub.f32 %v8687_v44, %v1520_v22  ;;  %v1676_v58 = vmul.f32 %v7302_v43, %v8667_v26  ;;  %v2156_v26 = vsel %vm733_vm1, %v8605_v23, 0 }
 0x734   : > { %v1675_v12 = vmul.f32 %v7304_v49, %v8684_v42  ;;  %v1649_v41 = vpop.xlane.xlu0 %1648  ;;  %v2159_v23 = vsel %vm733_vm1, %v8633_v7, 0 }
 0x735   : > { %v1578_v14 = vmul.f32 1.442695, %v1558_v17  ;;  %v1687_v50 = vpack.c.bf16 %v1677_v10, %v1676_v58  ;;  %v2162_v10 = vsel %vm733_vm1, %v8635_v13, 0 }
 0x736   : > { %v1523_v63 = vpop.xlane.xlu1 %1522  ;;  %v1686_v3 = vpack.c.bf16 %v1675_v12, %v1674_v54 }
 0x737   : > { %7309 = vpow2.f32 %v1578_v14  ;;  %v1559_v59 = vsub.f32 %v8693_v48, %v1523_v63 }
 0x738   : > { %7311 = vrcp.f32 %v1646_v29  ;;  %6706 = vmatprep.mubr.msk.bf16.mxu0 %vm924_vm2, %v1686_v3 }
 0x739   : > { %v8766_v47 = vpop.eup %7305  ;;  %7313 = vrcp.f32 %v1649_v41  ;;  %v1580_v44 = vmul.f32 1.442695, %v1559_v59  ;;  %6707 = vmatmul.mubr.msk.bf16.vlgmr.msra.gmra.mrb[40].mxu0 %vm924_vm2, %v1687_v50 }
 0x73a   : > { %7315 = vrcp.f32 %v1640_v32  ;;  %6751 = vmatpush3.bf16.xpose.msra.mxu0 %v2156_v26  ;;  %v1643_v17 = vpop.xlane.xlu1 %1642  ;;  %v1608_v4 = vsel %vm924_vm2, %v8766_v47, 0.0 }
 0x73b   : > { %7317 = vpow2.f32 %v1580_v44  ;;  %7057 = vmatprep.subr.msk.bf16.mxu0 %vm733_vm1, %v8633_v7  ;;  %1609 = vadd.xlane.f32.xlu0 %v1608_v4 }
 0x73c   : > { %7319 = vrcp.f32 %v1643_v17 }
 0x73d   : > { %v8775_v29 = vpop.eup %7307 }
 0x73e   : > { %v1611_v63 = vsel %vm924_vm2, %v8775_v29, 0.0 }
 0x73f   : > { %1612 = vadd.xlane.f32.xlu0 %v1611_v63 }
 0x741   : > { %v8779_v3 = vpop.eup %7309 }
 0x742   : > { %v7312_v41 = vpop.eup %7311  ;;  %6753 = vmatpush3.bf16.xpose.msra.mxu0 %v2159_v23  ;;  %v1614_v42 = vsel %vm924_vm2, %v8779_v3, 0.0 }
 0x743   : > { %v7314_v48 = vpop.eup %7313  ;;  %7058 = vmatprep.subr.msk.bf16.mxu0 %vm733_vm1, %v8635_v13  ;;  %1615 = vadd.xlane.f32.xlu1 %v1614_v42  ;;  %v1680_v49 = vmul.f32 %v7312_v41, %v8697_v9  ;;  %v2261_v13 = vsel %vm733_vm1, %v8743_v53, 0  ;;  %v2243_v9 = vpop.permute.xlu0 %2242 }
 0x744   : > { %v7316_v16 = vpop.eup %7315  ;;  %v1681_v43 = vmul.f32 %v7314_v48, %v8709_v6  ;;  %v2264_v6 = vsel %vm733_vm1, %v2243_v9, 0 }
 0x745   : > { %v8787_v32 = vpop.eup %7317  ;;  %v1678_v7 = vmul.f32 %v7316_v16, %v8703_v30  ;;  %v2165_v30 = vsel %vm733_vm1, %v8637_v8, 0 }
 0x746   : > { %v7320_v40 = vpop.eup %7319  ;;  %v1617_v5 = vsel %vm924_vm2, %v8787_v32, 0.0  ;;  %v1689_v12 = vpack.c.bf16 %v1681_v43, %v1680_v49 }
 0x747   : > { %1618 = vadd.xlane.f32.xlu0 %v1617_v5  ;;  %v1679_v22 = vmul.f32 %v7320_v40, %v8717_v38 }
 0x749   : > { %v1688_v54 = vpack.c.bf16 %v1679_v22, %v1678_v7 }
 0x74a   : > { %6755 = vmatpush3.bf16.xpose.msra.mxu0 %v2162_v10 }
 0x74b   : > { %6710 = vmatprep.mubr.msk.bf16.mxu0 %vm924_vm2, %v1688_v54  ;;  %7059 = vmatprep.subr.msk.bf16.mxu0 %vm733_vm1, %v8637_v8 }
 0x74c   : > { %6711 = vmatmul.mubr.msk.bf16.gmra.mrb[44].mxu0 %vm924_vm2, %v1689_v12 }
 0x74d   : > { %6758 = vmatprep.mubr.msk.bf16.mxu0 %vm733_vm1, %v8656_v52  ;;  %v2245_v52 = vpop.permute.xlu1 %2244 }
 0x74e   : > { %v2267_v8 = vsel %vm733_vm1, %v2245_v52, 0 }
 0x752   : > { %6757 = vmatpush3.bf16.xpose.msra.mxu0 %v2165_v30 }
 0x753   : > { %7060 = vmatprep.subr.msk.bf16.mxu0 %vm733_vm1, %v8743_v53 }
 0x759   : > { %6759 = vmatmul.mubr.msk.bf16.vlgmr.msra.gmra.mrb[48].mxu0 %vm733_vm1, %v8745_v39 }
 0x75a   : > { %6767 = vmatpush3.bf16.xpose.msra.mxu0 %v2261_v13 }
 0x75b   : > { %7061 = vmatprep.subr.msk.bf16.mxu0 %vm733_vm1, %v2243_v9 }
 0x762   : > { %6769 = vmatpush3.bf16.xpose.msra.mxu0 %v2264_v6 }
 0x763   : > { %7062 = vmatprep.subr.msk.bf16.mxu0 %vm733_vm1, %v2245_v52 }
 0x769   : > { %v1526_v38 = vpop.xlane.xlu0 %1525 }
 0x76a   : > { %6771 = vmatpush3.bf16.xpose.msra.mxu0 %v2267_v8  ;;  %v1560_v58 = vsub.f32 %v8680_v37, %v1526_v38 }
 0x76c   : > { %v1582_v39 = vmul.f32 1.442695, %v1560_v58 }
 0x76d   : > { %v2132_v14 = vpop.permute.xlu0 %2131 }
 0x76e   : > { %7321 = vpow2.f32 %v1582_v39  ;;  %6762 = vmatprep.mubr.msk.bf16.mxu0 %vm733_vm1, %v2132_v14 }
 0x76f   : > { %v1529_v53 = vpop.xlane.xlu1 %1528 }
 0x770   : > { %v1561_v50 = vsub.f32 %v8689_v62, %v1529_v53 }
 0x771   : > { %v2247_v59 = vpop.permute.xlu0 %2246 }
 0x772   : > { %v1584_v44 = vmul.f32 1.442695, %v1561_v50  ;;  %7063 = vmatprep.subr.msk.bf16.mxu0 %vm733_vm1, %v2247_v59  ;;  %v2270_v26 = vsel %vm733_vm1, %v2247_v59, 0 }
 0x773   : > { %v2134_v17 = vpop.permute.xlu1 %2133  ;;  %6773 = vmatpush3.bf16.xpose.msra.mxu0 %v2270_v26 }
 0x774   : > { %7323 = vpow2.f32 %v1584_v44  ;;  %6763 = vmatmul.mubr.msk.bf16.gmra.mrb[52].mxu0 %vm733_vm1, %v2134_v17 }
 0x775   : > { %v2233_v37 = vpop.permute.xlu0 %2232 }
 0x776   : > { %6774 = vmatprep.mubr.msk.bf16.mxu0 %vm733_vm1, %v2233_v37 }
 0x777   : > { %v2239_v48 = vpop.permute.xlu1 %2238 }
 0x778   : > { %v8822_v4 = vpop.eup %7321 }
 0x779   : > { %v2235_v63 = vpop.permute.xlu0 %2234  ;;  %v1620_v62 = vsel %vm924_vm2, %v8822_v4, 0.0 }
 0x77a   : > { %1621 = vadd.xlane.f32.xlu1 %v1620_v62 }
 0x77c   : > { %6775 = vmatmul.mubr.msk.bf16.vlgmr.msra.gmra.mrb[56].mxu0 %vm733_vm1, %v2235_v63 }
 0x77d   : > { %v2237_v23 = vpop.permute.xlu0 %2236 }
 0x77e   : > { %v8827_v41 = vpop.eup %7323  ;;  %6778 = vmatprep.mubr.msk.bf16.mxu0 %vm733_vm1, %v2237_v23 }
 0x77f   : > { %v1623_v42 = vsel %vm924_vm2, %v8827_v41, 0.0 }
 0x780   : > { %1624 = vadd.xlane.f32.xlu0 %v1623_v42 }
 0x784   : > { %6779 = vmatmul.mubr.msk.bf16.gmra.mrb[60].mxu0 %vm733_vm1, %v2239_v48 }
 0x78b   : > { %1690 = vrot.lane.b32.xlu1 %v8261_v36, %s7859_s29 }
 0x78f   : > { %1694 = vrot.lane.b32.xlu1 %v8267_v46, %s7859_s29 }
 0x793   : > { %1696 = vrot.lane.b32.xlu1 %v8265_v45, %s7859_s29 }
 0x796   : > { %1692 = vrot.lane.b32.xlu0 %v8259_v35, %s7859_s29  ;;  %s7864_s29 = smov 104  }
 0x797   : > { %2521 = vrot.lane.b32.xlu1 %v8261_v36, %s7862_s15 }
 0x79b   : > { %2523 = vrot.lane.b32.xlu1 %v8259_v35, %s7862_s15 }
 0x7bc   : > { %v1604_v16 = vpop.xlane.xlu0 %1603 }
 0x7bd   : > { %7325 = vrcp.f32 %v1604_v16 }
 0x7be   : > { %v1607_v40 = vpop.xlane.xlu1 %1606 }
 0x7bf   : > { %7327 = vrcp.f32 %v1607_v40 }
 0x7c7   : > { %v7326_v5 = vpop.eup %7325 }
 0x7c8   : > { %v1666_v7 = vmul.f32 %v7326_v5, %v8750_v33  ;;  %v1610_v10 = vpop.xlane.xlu0 %1609 }
 0x7c9   : > { %v7328_v43 = vpop.eup %7327 }
 0x7ca   : > { %v1667_v22 = vmul.f32 %v7328_v43, %v8754_v11 }
 0x7cc   : > { %v1682_v49 = vpack.c.bf16 %v1667_v22, %v1666_v7  ;;  %v1613_v12 = vpop.xlane.xlu0 %1612 }
 0x7cd   : > { %7329 = vrcp.f32 %v1613_v12 }
 0x7ce   : > { %6690 = vmatprep.mubr.msk.bf16.mxu1 %vm924_vm2, %v1682_v49 }
 0x7d0   : > { %v1616_v54 = vpop.xlane.xlu1 %1615 }
 0x7d4   : > { %v1619_v13 = vpop.xlane.xlu0 %1618 }
 0x7d5   : > { %7331 = vrcp.f32 %v1619_v13 }
 0x7d6   : > { %7333 = vrcp.f32 %v1610_v10 }
 0x7d7   : > { %7335 = vrcp.f32 %v1616_v54  ;;  %v7330_v53 = vpop.eup %7329 }
 0x7d8   : > { %v1669_v17 = vmul.f32 %v7330_v53, %v8775_v29 }
 0x7df   : > { %v7332_v50 = vpop.eup %7331 }
 0x7e0   : > { %v7334_v59 = vpop.eup %7333  ;;  %v1671_v37 = vmul.f32 %v7332_v50, %v8787_v32 }
 0x7e1   : > { %v7336_v26 = vpop.eup %7335  ;;  %v1668_v63 = vmul.f32 %v7334_v59, %v8766_v47 }
 0x7e2   : > { %v1670_v62 = vmul.f32 %v7336_v26, %v8779_v3 }
 0x7e3   : > { %v1683_v23 = vpack.c.bf16 %v1669_v17, %v1668_v63 }
 0x7e4   : > { %v1684_v48 = vpack.c.bf16 %v1671_v37, %v1670_v62 }
 0x807   : > { %v1622_v30 = vpop.xlane.xlu1 %1621 }
 0x80b   : > { %v1691_v9 = vpop.permute.xlu1 %1690 }
 0x80c   : > { %6682 = vmatprep.subr.bf16.mxu1 %v1691_v9  ;;  %v8848_v6 = vpop.f32.mrb[40].mxu0 }
 0x80d   : > { %6683 = vmatpush3.bf16.msra.mxu1 %v1691_v9  ;;  %v8850_v52 = vpop.f32.mrb[41].mxu0  ;;  %v1625_v33 = vpop.xlane.xlu0 %1624 }
 0x80e   : > { %v8852_v11 = vpop.f32.mrb[42].mxu0  ;;  %7337 = vrcp.f32 %v1625_v33 }
 0x80f   : > { %v8856_v38 = vpop.f32.mrb[43].mxu0  ;;  %v1695_v39 = vpop.permute.xlu1 %1694  ;;  %7339 = vrcp.f32 %v1622_v30 }
 0x811   : > { %v1693_v14 = vpop.permute.xlu0 %1692 }
 0x812   : > { %6684 = vmatprep.subr.bf16.mxu1 %v1693_v14 }
 0x813   : > { %6685 = vmatpush3.bf16.msra.mxu1 %v1693_v14  ;;  %v1697_v44 = vpop.permute.xlu1 %1696 }
 0x814   : > { %6686 = vmatprep.subr.bf16.mxu1 %v1695_v39 }
 0x817   : > { %6687 = vmatpush3.bf16.msra.mxu1 %v1695_v39 }
 0x818   : > { %6688 = vmatprep.subr.bf16.mxu1 %v1697_v44  ;;  %v7338_v42 = vpop.eup %7337 }
 0x819   : > { %v7340_v16 = vpop.eup %7339  ;;  %v1673_v29 = vmul.f32 %v7338_v42, %v8827_v41 }
 0x81a   : > { %v1672_v43 = vmul.f32 %v7340_v16, %v8822_v4 }
 0x81b   : > { %6689 = vmatpush3.bf16.msra.mxu1 %v1697_v44 }
 0x81c   : > { %v1685_v22 = vpack.c.bf16 %v1673_v29, %v1672_v43 }
 0x81e   : > { %6691 = vmatmul.mubr.msk.bf16.vlgmr.msra.gmra.mrb[24].mxu1 %vm924_vm2, %v1683_v23 }
 0x81f   : > { %v8865_v40 = vpop.f32.mrb[44].mxu0  ;;  %6694 = vmatprep.mubr.msk.bf16.mxu1 %vm924_vm2, %v1684_v48 }
 0x820   : > { %v8868_v5 = vpop.f32.mrb[45].mxu0 }
 0x821   : > { %v8871_v32 = vpop.f32.mrb[46].mxu0 }
 0x822   : > { %v8875_v3 = vpop.f32.mrb[47].mxu0 }
 0x826   : > { %6695 = vmatmul.mubr.msk.bf16.gmra.mrb[28].mxu1 %vm924_vm2, %v1685_v22 }
 0x82c   : > { %v6760_v49 = vpop.f32.mrb[48].mxu0 }
 0x82d   : > { %v8881_v10 = vpop.f32.mrb[49].mxu0  ;;  %v2343_v41 = vsel %vm924_vm2, %v6760_v49, -inf }
 0x82e   : > { %2344 = vmax.xlane.f32.xlu0 %v2343_v41  ;;  %v8884_v54 = vpop.f32.mrb[50].mxu0  ;;  %v2337_v4 = vsel %vm924_vm2, %v8881_v10, -inf }
 0x82f   : > { %v8886_v12 = vpop.f32.mrb[51].mxu0  ;;  %v2346_v13 = vsel %vm924_vm2, %v8884_v54, -inf }
 0x830   : > { %v2340_v30 = vsel %vm924_vm2, %v8886_v12, -inf }
 0x831   : > { %2341 = vmax.xlane.f32.xlu1 %v2340_v30 }
 0x832   : > { %2338 = vmax.xlane.f32.xlu0 %v2337_v4 }
 0x836   : > { %2347 = vmax.xlane.f32.xlu0 %v2346_v13 }
 0x847   : > { %v8894_v9 = vpop.f32.mrb[52].mxu0 }
 0x848   : > { %v8896_v33 = vpop.f32.mrb[53].mxu0  ;;  %v2355_v39 = vsel %vm924_vm2, %v8894_v9, -inf }
 0x849   : > { %2356 = vmax.xlane.f32.xlu1 %v2355_v39  ;;  %v8900_v14 = vpop.f32.mrb[54].mxu0  ;;  %v2349_v59 = vsel %vm924_vm2, %v8896_v33, -inf  ;;  %v6232_v39 = vld [vmem:[%s10571_s3 + $0x4] sm:$0xf] }
 0x84a   : > { %v8902_v53 = vpop.f32.mrb[55].mxu0  ;;  %v2358_v50 = vsel %vm924_vm2, %v8900_v14, -inf  ;;  %7054 = vmatprep.subr.msk.bf16.mxu1 %vm1902_vm3, %v6232_v39 }
 0x84b   : > { %2359 = vmax.xlane.f32.xlu0 %v2358_v50  ;;  %v2352_v44 = vsel %vm924_vm2, %v8902_v53, -inf  ;;  %v1904_v50 = vsel %vm1902_vm3, %v6232_v39, 0 }
 0x84c   : > { %6715 = vmatpush3.bf16.msra.mxu1 %v1904_v50 }
 0x84d   : > { %2350 = vmax.xlane.f32.xlu1 %v2349_v59  ;;  %v8954_v59 = vld [vmem:[%s10571_s3] sm:$0xf] }
 0x84e   : > { %7055 = vmatprep.subr.msk.bf16.mxu1 %vm1902_vm3, %v8954_v59 }
 0x84f   : > { %2353 = vmax.xlane.f32.xlu0 %v2352_v44  ;;  %v8910_v26 = vpop.f32.mrb[56].mxu0  ;;  %v8958_v44 = vpop.permute.xlu1 %2521 }
 0x850   : > { %v8912_v17 = vpop.f32.mrb[57].mxu0  ;;  %v2367_v37 = vsel %vm924_vm2, %v8910_v26, -inf }
 0x851   : > { %2368 = vmax.xlane.f32.xlu1 %v2367_v37  ;;  %v8916_v63 = vpop.f32.mrb[58].mxu0  ;;  %v2361_v42 = vsel %vm924_vm2, %v8912_v17, -inf }
 0x852   : > { %v8918_v62 = vpop.f32.mrb[59].mxu0  ;;  %v2370_v23 = vsel %vm924_vm2, %v8916_v63, -inf }
 0x853   : > { %2371 = vmax.xlane.f32.xlu0 %v2370_v23  ;;  %v2364_v48 = vsel %vm924_vm2, %v8918_v62, -inf  ;;  %v8960_v37 = vpop.permute.xlu1 %2523 }
 0x855   : > { %2362 = vmax.xlane.f32.xlu1 %v2361_v42 }
 0x857   : > { %2365 = vmax.xlane.f32.xlu0 %v2364_v48  ;;  %v8926_v16 = vpop.f32.mrb[60].mxu0 }
 0x858   : > { %v8928_v29 = vpop.f32.mrb[61].mxu0  ;;  %v2379_v43 = vsel %vm924_vm2, %v8926_v16, -inf }
 0x859   : > { %2380 = vmax.xlane.f32.xlu1 %v2379_v43  ;;  %v8932_v22 = vpop.f32.mrb[62].mxu0  ;;  %v2373_v4 = vsel %vm924_vm2, %v8928_v29, -inf }
 0x85a   : > { %v8934_v41 = vpop.f32.mrb[63].mxu0  ;;  %v2382_v30 = vsel %vm924_vm2, %v8932_v22, -inf }
 0x85b   : > { %2383 = vmax.xlane.f32.xlu0 %v2382_v30  ;;  %v2376_v13 = vsel %vm924_vm2, %v8934_v41, -inf }
 0x85d   : > { %2374 = vmax.xlane.f32.xlu1 %v2373_v4 }
 0x85f   : > { %2377 = vmax.xlane.f32.xlu0 %v2376_v13 }
 0x86e   : > { %2527 = vrot.lane.b32.xlu1 %v8265_v45, %s7862_s15 }
 0x875   : > { %2525 = vrot.lane.b32.xlu0 %v8267_v46, %s7862_s15 }
 0x8bb   : > { %v2345_v23 = vpop.xlane.xlu0 %2344 }
 0x8bc   : > { %v2387_v42 = vsub.f32 %v6760_v49, %v2345_v23 }
 0x8be   : > { %v2405_v48 = vmul.f32 1.442695, %v2387_v42  ;;  %v2342_v43 = vpop.xlane.xlu1 %2341 }
 0x8bf   : > { %v2339_v30 = vpop.xlane.xlu0 %2338  ;;  %v2386_v13 = vsub.f32 %v8886_v12, %v2342_v43 }
 0x8c0   : > { %7341 = vpow2.f32 %v2405_v48  ;;  %v2385_v4 = vsub.f32 %v8881_v10, %v2339_v30 }
 0x8c1   : > { %v2403_v7 = vmul.f32 1.442695, %v2386_v13 }
 0x8c2   : > { %v2401_v39 = vmul.f32 1.442695, %v2385_v4 }
 0x8c3   : > { %v2348_v50 = vpop.xlane.xlu0 %2347 }
 0x8c4   : > { %7343 = vpow2.f32 %v2401_v39  ;;  %v2388_v47 = vsub.f32 %v8884_v54, %v2348_v50 }
 0x8c6   : > { %v2407_v8 = vmul.f32 1.442695, %v2388_v47 }
 0x8c8   : > { %7345 = vpow2.f32 %v2407_v8 }
 0x8c9   : > { %7347 = vpow2.f32 %v2403_v7 }
 0x8ca   : > { %v8965_v58 = vpop.eup %7341 }
 0x8cb   : > { %v2439_v49 = vsel %vm924_vm2, %v8965_v58, 0.0 }
 0x8cc   : > { %2440 = vadd.xlane.f32.xlu1 %v2439_v49 }
 0x8ce   : > { %v8969_v23 = vpop.eup %7343 }
 0x8cf   : > { %v2433_v10 = vsel %vm924_vm2, %v8969_v23, 0.0 }
 0x8d0   : > { %2434 = vadd.xlane.f32.xlu1 %v2433_v10 }
 0x8d2   : > { %v8973_v12 = vpop.eup %7345 }
 0x8d3   : > { %v2442_v54 = vsel %vm924_vm2, %v8973_v12, 0.0  ;;  %v8977_v47 = vpop.eup %7347 }
 0x8d4   : > { %2443 = vadd.xlane.f32.xlu0 %v2442_v54  ;;  %v2436_v42 = vsel %vm924_vm2, %v8977_v47, 0.0 }
 0x8d6   : > { %v2357_v8 = vpop.xlane.xlu1 %2356 }
 0x8d7   : > { %v2391_v7 = vsub.f32 %v8894_v9, %v2357_v8 }
 0x8d8   : > { %2437 = vadd.xlane.f32.xlu0 %v2436_v42  ;;  %v2360_v48 = vpop.xlane.xlu0 %2359 }
 0x8d9   : > { %v2413_v43 = vmul.f32 1.442695, %v2391_v7  ;;  %v2392_v30 = vsub.f32 %v8900_v14, %v2360_v48 }
 0x8da   : > { %v2351_v4 = vpop.xlane.xlu1 %2350 }
 0x8db   : > { %7349 = vpow2.f32 %v2413_v43  ;;  %v2415_v13 = vmul.f32 1.442695, %v2392_v30  ;;  %v2389_v39 = vsub.f32 %v8896_v33, %v2351_v4 }
 0x8dc   : > { %v2354_v50 = vpop.xlane.xlu0 %2353 }
 0x8dd   : > { %7351 = vpow2.f32 %v2415_v13  ;;  %v2409_v49 = vmul.f32 1.442695, %v2389_v39  ;;  %v2390_v10 = vsub.f32 %v8902_v53, %v2354_v50 }
 0x8de   : > { %v2369_v54 = vpop.xlane.xlu1 %2368 }
 0x8df   : > { %7353 = vpow2.f32 %v2409_v49  ;;  %v2411_v9 = vmul.f32 1.442695, %v2390_v10  ;;  %v2395_v8 = vsub.f32 %v8910_v26, %v2369_v54 }
 0x8e0   : > { %v2372_v42 = vpop.xlane.xlu0 %2371 }
 0x8e1   : > { %7355 = vpow2.f32 %v2411_v9  ;;  %v2421_v7 = vmul.f32 1.442695, %v2395_v8  ;;  %v2396_v14 = vsub.f32 %v8916_v63, %v2372_v42 }
 0x8e2   : > { %v2363_v48 = vpop.xlane.xlu1 %2362 }
 0x8e3   : > { %7357 = vpow2.f32 %v2421_v7  ;;  %v2393_v43 = vsub.f32 %v8912_v17, %v2363_v48  ;;  %v2423_v13 = vmul.f32 1.442695, %v2396_v14 }
 0x8e4   : > { %v2366_v33 = vpop.xlane.xlu0 %2365 }
 0x8e5   : > { %v8988_v30 = vpop.eup %7349  ;;  %v2417_v4 = vmul.f32 1.442695, %v2393_v43  ;;  %v2394_v53 = vsub.f32 %v8918_v62, %v2366_v33 }
 0x8e6   : > { %v2381_v39 = vpop.xlane.xlu1 %2380  ;;  %v2451_v26 = vsel %vm924_vm2, %v8988_v30, 0.0 }
 0x8e7   : > { %v8993_v50 = vpop.eup %7351  ;;  %7359 = vpow2.f32 %v2417_v4  ;;  %v2399_v63 = vsub.f32 %v8926_v16, %v2381_v39  ;;  %2452 = vadd.xlane.f32.xlu1 %v2451_v26  ;;  %v2419_v62 = vmul.f32 1.442695, %v2394_v53 }
 0x8e8   : > { %v2384_v49 = vpop.xlane.xlu0 %2383  ;;  %v2454_v17 = vsel %vm924_vm2, %v8993_v50, 0.0  ;;  %7361 = vpow2.f32 %v2423_v13 }
 0x8e9   : > { %v8998_v10 = vpop.eup %7353  ;;  %v2429_v54 = vmul.f32 1.442695, %v2399_v63  ;;  %v2400_v9 = vsub.f32 %v8932_v22, %v2384_v49  ;;  %2455 = vadd.xlane.f32.xlu0 %v2454_v17 }
 0x8ea   : > { %v2375_v8 = vpop.xlane.xlu1 %2374  ;;  %v2445_v42 = vsel %vm924_vm2, %v8998_v10, 0.0 }
 0x8eb   : > { %v9003_v7 = vpop.eup %7355  ;;  %7363 = vpow2.f32 %v2429_v54  ;;  %v2397_v16 = vsub.f32 %v8928_v29, %v2375_v8  ;;  %2446 = vadd.xlane.f32.xlu1 %v2445_v42  ;;  %v2431_v22 = vmul.f32 1.442695, %v2400_v9  ;;  %v2028_v42 = vsel %vm1902_vm3, %v8954_v59, 0 }
 0x8ec   : > { %v2378_v14 = vpop.xlane.xlu0 %2377  ;;  %v2448_v48 = vsel %vm924_vm2, %v9003_v7, 0.0  ;;  %7365 = vpow2.f32 %v2419_v62 }
 0x8ed   : > { %v9008_v43 = vpop.eup %7357  ;;  %v2425_v33 = vmul.f32 1.442695, %v2397_v16  ;;  %v2398_v4 = vsub.f32 %v8934_v41, %v2378_v14  ;;  %2449 = vadd.xlane.f32.xlu0 %v2448_v48 }
 0x8ee   : > { %v2463_v53 = vsel %vm924_vm2, %v9008_v43, 0.0 }
 0x8ef   : > { %7367 = vpow2.f32 %v2425_v33  ;;  %v2427_v13 = vmul.f32 1.442695, %v2398_v4 }
 0x8f0   : > { %7369 = vpow2.f32 %v2431_v22 }
 0x8f1   : > { %v9013_v39 = vpop.eup %7359  ;;  %v6692_v29 = vpop.f32.mrb[24].mxu1  ;;  %2464 = vadd.xlane.f32.xlu0 %v2463_v53  ;;  %7371 = vpow2.f32 %v2427_v13 }
 0x8f2   : > { %v1748_v26 = vpop.f32.mrb[25].mxu1  ;;  %v9015_v49 = vpop.eup %7361  ;;  %v2457_v41 = vsel %vm924_vm2, %v9013_v39, 0.0 }
 0x8f3   : > { %v6693_v63 = vpop.f32.mrb[26].mxu1  ;;  %v2466_v14 = vsel %vm924_vm2, %v9015_v49, 0.0 }
 0x8f4   : > { %v1869_v17 = vpack.c.bf16 %v6693_v63, %v6692_v29  ;;  %v1751_v54 = vpop.f32.mrb[27].mxu1 }
 0x8f5   : > { %v9019_v9 = vpop.eup %7363  ;;  %v1868_v62 = vpack.c.bf16 %v1751_v54, %v1748_v26  ;;  %2458 = vadd.xlane.f32.xlu0 %v2457_v41 }
 0x8f6   : > { %v2475_v8 = vsel %vm924_vm2, %v9019_v9, 0.0  ;;  %v9026_v16 = vpop.eup %7365 }
 0x8f7   : > { %6716 = vmatprep.mubr.msk.bf16.mxu1 %vm733_vm1, %v1868_v62  ;;  %2476 = vadd.xlane.f32.xlu1 %v2475_v8  ;;  %v2460_v26 = vsel %vm924_vm2, %v9026_v16, 0.0  ;;  %v10615_v62 = vpack.c.bf16 %v8856_v38, %v8850_v52  ;;  %v10616_v8 = vpack.c.bf16 %v8852_v11, %v8848_v6  ;;  %v10619_v52 = vpack.c.bf16 %v8629_v0, %v8623_v60  ;;  %v2528_v0 = vpop.permute.xlu1 %2527 }
 0x8f8   : > { %6717 = vmatmul.mubr.msk.bf16.vlgmr.msra.gmra.mrb[32].mxu1 %vm733_vm1, %v1869_v17  ;;  %v10620_v6 = vpack.c.bf16 %v8625_v61, %v8621_v34  ;;  %v10621_v60 = vpack.c.bf16 %v8648_v27, %v8641_v15  ;;  %v2526_v34 = vpop.permute.xlu0 %2525  ;;  %v10622_v61 = vpack.c.bf16 %v8644_v20, %v8639_v51  ;;  %v10623_v15 = vpack.c.bf16 %v8539_v25, %v8533_v19  ;;  %v6265_v27 = vld [vmem:[%s10571_s3 + $0x8] sm:$0xf] }
 0x8f9   : > { %v9031_v48 = vpop.eup %7367  ;;  %6733 = vmatpush3.bf16.msra.mxu1 %v2028_v42  ;;  %v6696_v22 = vpop.f32.mrb[28].mxu1  ;;  %2467 = vadd.xlane.f32.xlu0 %v2466_v14  ;;  %v10617_v42 = vpack.c.bf16 %v8875_v3, %v8868_v5  ;;  %v10618_v14 = vpack.c.bf16 %v8871_v32, %v8865_v40  ;;  %v10624_v19 = vpack.c.bf16 %v8535_v21, %v8531_v18 }
 0x8fa   : > { %6782 = vmatprep.subr.bf16.mxu1 %v8958_v44  ;;  %v1764_v33 = vpop.f32.mrb[29].mxu1  ;;  %v2469_v59 = vsel %vm924_vm2, %v9031_v48, 0.0  ;;  %v9036_v4 = vpop.eup %7369  ;;  %v10625_v25 = vpack.c.bf16 %v8557_v28, %v8551_v31  ;;  %v10626_v51 = vpack.c.bf16 %v8553_v24, %v8549_v57 }
 0x8fb   : > { %v6697_v13 = vpop.f32.mrb[30].mxu1  ;;  %2470 = vadd.xlane.f32.xlu1 %v2469_v59  ;;  %v9040_v63 = vpop.eup %7371  ;;  %v2478_v54 = vsel %vm924_vm2, %v9036_v4, 0.0 }
 0x8fc   : > { %v1871_v53 = vpack.c.bf16 %v6697_v13, %v6696_v22  ;;  %v1767_v29 = vpop.f32.mrb[31].mxu1  ;;  %v2472_v41 = vsel %vm924_vm2, %v9040_v63, 0.0 }
 0x8fd   : > { %v1870_v17 = vpack.c.bf16 %v1767_v29, %v1764_v33  ;;  %2461 = vadd.xlane.f32.xlu0 %v2460_v26 }
 0x8ff   : > { %6720 = vmatprep.mubr.msk.bf16.mxu1 %vm733_vm1, %v1870_v17  ;;  %2479 = vadd.xlane.f32.xlu1 %v2478_v54 }
 0x900   : > { %6721 = vmatmul.mubr.msk.bf16.gmra.mrb[36].mxu1 %vm733_vm1, %v1871_v53 }
 0x901   : > { %6724 = vmatprep.mubr.msk.bf16.mxu1 %vm733_vm1, %v10615_v62  ;;  %2473 = vadd.xlane.f32.xlu0 %v2472_v41 }
 0x908   : > { %6725 = vmatmul.mubr.msk.bf16.gmra.mrb[40].mxu1 %vm733_vm1, %v10616_v8 }
 0x909   : > { %6728 = vmatprep.mubr.msk.bf16.mxu1 %vm733_vm1, %v10617_v42 }
 0x910   : > { %6729 = vmatmul.mubr.msk.bf16.gmra.mrb[44].mxu1 %vm733_vm1, %v10618_v14  ;;  %2612 = vrot.lane.b32.xlu1 %v8269_v55, %s7862_s15 }
 0x911   : > { %6734 = vmatprep.mubr.msk.bf16.mxu1 %vm733_vm1, %v10619_v52 }
 0x914   : > { %2614 = vrot.lane.b32.xlu1 %v8279_v2, %s7862_s15 }
 0x917   : > { %2610 = vrot.lane.b32.xlu0 %v8271_v56, %s7862_s15 }
 0x918   : > { %6735 = vmatmul.mubr.msk.bf16.vlgmr.msra.gmra.mrb[32].mxu1 %vm733_vm1, %v10620_v6  ;;  %2616 = vrot.lane.b32.xlu1 %v8277_v1, %s7862_s15  ;;  %s6353_s15 = sshll.u32 %s7961_s14, 9  ;;  %s6023_s14 = scalar_lea.sflag [#allocation4], %s8207_s24 }
 0x919   : > { %6783 = vmatpush3.bf16.msra.mxu1 %v8958_v44  ;;  %6738 = vmatprep.mubr.msk.bf16.mxu1 %vm733_vm1, %v10621_v60  ;;  %s10524_s19 = scalar_lea.hbm %s10630_s8, %s6353_s15 }
 0x91a   : > { %6784 = vmatprep.subr.bf16.mxu1 %v8960_v37 }
 0x91b   : > { %2857 = vrot.lane.b32.xlu0 %v8261_v36, %s7863_s2 }
 0x91c   : > { %2859 = vrot.lane.b32.xlu1 %v8259_v35, %s7863_s2 }
 0x91d   : > { %6785 = vmatpush3.bf16.msra.mxu1 %v8960_v37  ;;  %v2734_v37 = vsel %vm1902_vm3, %v6265_v27, 0 }
 0x91e   : > { %6786 = vmatprep.subr.bf16.mxu1 %v2526_v34 }
 0x91f   : > { %2861 = vrot.lane.b32.xlu0 %v8267_v46, %s7863_s2 }
 0x920   : > { %6739 = vmatmul.mubr.msk.bf16.gmra.mrb[36].mxu1 %vm733_vm1, %v10622_v61  ;;  %2962 = vrot.lane.b32.xlu1 %v8271_v56, %s7863_s2 }
 0x921   : > { %6787 = vmatpush3.bf16.msra.mxu1 %v2526_v34  ;;  %6742 = vmatprep.mubr.msk.bf16.mxu1 %vm733_vm1, %v10623_v15 }
 0x922   : > { %6788 = vmatprep.subr.bf16.mxu1 %v2528_v0 }
 0x923   : > { %2863 = vrot.lane.b32.xlu0 %v8265_v45, %s7863_s2 }
 0x924   : > { %2964 = vrot.lane.b32.xlu1 %v8269_v55, %s7863_s2 }
 0x925   : > { %6789 = vmatpush3.bf16.msra.mxu1 %v2528_v0 }
 0x926   : > { %7064 = vmatprep.subr.msk.bf16.mxu1 %vm1902_vm3, %v6265_v27 }
 0x927   : > { %2849 = vrot.lane.b32.xlu0 %v8261_v36, %s7864_s29 }
 0x928   : > { %6743 = vmatmul.mubr.msk.bf16.gmra.mrb[40].mxu1 %vm733_vm1, %v10624_v19  ;;  %2851 = vrot.lane.b32.xlu1 %v8259_v35, %s7864_s29 }
 0x929   : > { %6746 = vmatprep.mubr.msk.bf16.mxu1 %vm733_vm1, %v10625_v25 }
 0x92b   : > { %2966 = vrot.lane.b32.xlu0 %v8279_v2, %s7863_s2 }
 0x92c   : > { %2853 = vrot.lane.b32.xlu1 %v8267_v46, %s7864_s29 }
 0x92f   : > { %2855 = vrot.lane.b32.xlu0 %v8265_v45, %s7864_s29 }
 0x930   : > { %6747 = vmatmul.mubr.msk.bf16.gmra.mrb[44].mxu1 %vm733_vm1, %v10626_v51  ;;  %2968 = vrot.lane.b32.xlu1 %v8277_v1, %s7863_s2  ;;  %s10627_s2 = sld [smem:[#allocation23_spill]] }
 0x933   : > { %2954 = vrot.lane.b32.xlu0 %v8271_v56, %s7864_s29 }
 0x934   : > { %2956 = vrot.lane.b32.xlu1 %v8269_v55, %s7864_s29 }
 0x937   : > { %2958 = vrot.lane.b32.xlu0 %v8279_v2, %s7864_s29 }
 0x938   : > { %2960 = vrot.lane.b32.xlu1 %v8277_v1, %s7864_s29  ;;  %s6188_s29 = sshll.u32 %s8207_s24, 5 }
 0x93c   : > { %3243 = vrot.lane.b32.xlu1 %v8261_v36, %s7865_s21 }
 0x959   : > { %v2441_v18 = vpop.xlane.xlu1 %2440 }
 0x95d   : > { %v2435_v21 = vpop.xlane.xlu1 %2434 }
 0x961   : > { %v2444_v31 = vpop.xlane.xlu0 %2443 }
 0x962   : > { %7373 = vrcp.f32 %v2444_v31 }
 0x963   : > { %7375 = vrcp.f32 %v2435_v21 }
 0x964   : > { %7377 = vrcp.f32 %v2441_v18 }
 0x965   : > { %v2438_v57 = vpop.xlane.xlu0 %2437 }
 0x966   : > { %7379 = vrcp.f32 %v2438_v57 }
 0x96c   : > { %v7374_v24 = vpop.eup %7373 }
 0x96d   : > { %v7376_v28 = vpop.eup %7375  ;;  %v2500_v38 = vmul.f32 %v7374_v24, %v8973_v12 }
 0x96e   : > { %v7378_v20 = vpop.eup %7377  ;;  %v2497_v40 = vmul.f32 %v7376_v28, %v8969_v23 }
 0x96f   : > { %v2499_v36 = vmul.f32 %v7378_v20, %v8965_v58 }
 0x970   : > { %v7380_v11 = vpop.eup %7379 }
 0x971   : > { %v2498_v5 = vmul.f32 %v7380_v11, %v8977_v47  ;;  %v2514_v3 = vpack.c.bf16 %v2500_v38, %v2499_v36 }
 0x973   : > { %v2513_v32 = vpack.c.bf16 %v2498_v5, %v2497_v40 }
 0x974   : > { %v2453_v44 = vpop.xlane.xlu1 %2452 }
 0x975   : > { %6790 = vmatprep.mubr.msk.bf16.mxu1 %vm924_vm2, %v2513_v32 }
 0x976   : > { %6791 = vmatmul.mubr.msk.bf16.vlgmr.msra.gmra.mrb[48].mxu1 %vm924_vm2, %v2514_v3  ;;  %v2456_v22 = vpop.xlane.xlu0 %2455 }
 0x977   : > { %6815 = vmatpush3.bf16.msra.mxu1 %v2734_v37  ;;  %7381 = vrcp.f32 %v2456_v22 }
 0x978   : > { %v2447_v33 = vpop.xlane.xlu1 %2446 }
 0x979   : > { %7383 = vrcp.f32 %v2447_v33 }
 0x97a   : > { %7385 = vrcp.f32 %v2453_v44  ;;  %v2450_v23 = vpop.xlane.xlu0 %2449 }
 0x97b   : > { %7387 = vrcp.f32 %v2450_v23 }
 0x97e   : > { %v2465_v12 = vpop.xlane.xlu0 %2464 }
 0x981   : > { %v7382_v47 = vpop.eup %7381 }
 0x982   : > { %v2459_v58 = vpop.xlane.xlu0 %2458  ;;  %v2504_v26 = vmul.f32 %v7382_v47, %v8993_v50 }
 0x983   : > { %v7384_v59 = vpop.eup %7383  ;;  %7389 = vrcp.f32 %v2459_v58 }
 0x984   : > { %v7386_v13 = vpop.eup %7385  ;;  %v2477_v53 = vpop.xlane.xlu1 %2476  ;;  %v2501_v54 = vmul.f32 %v7384_v59, %v8998_v10 }
 0x985   : > { %v7388_v29 = vpop.eup %7387  ;;  %v2503_v62 = vmul.f32 %v7386_v13, %v8988_v30 }
 0x986   : > { %v2468_v17 = vpop.xlane.xlu0 %2467  ;;  %v2502_v41 = vmul.f32 %v7388_v29, %v9003_v7 }
 0x987   : > { %v2516_v14 = vpack.c.bf16 %v2504_v26, %v2503_v62 }
 0x988   : > { %v2471_v8 = vpop.xlane.xlu1 %2470  ;;  %v2515_v42 = vpack.c.bf16 %v2502_v41, %v2501_v54 }
 0x98a   : > { %6794 = vmatprep.mubr.msk.bf16.mxu1 %vm924_vm2, %v2515_v42  ;;  %v2462_v52 = vpop.xlane.xlu0 %2461 }
 0x98b   : > { %7391 = vrcp.f32 %v2462_v52  ;;  %6795 = vmatmul.mubr.msk.bf16.gmra.mrb[52].mxu1 %vm924_vm2, %v2516_v14 }
 0x98c   : > { %v2480_v6 = vpop.xlane.xlu1 %2479  ;;  %7393 = vrcp.f32 %v2468_v17 }
 0x98d   : > { %v7390_v7 = vpop.eup %7389 }
 0x98e   : > { %v2474_v60 = vpop.xlane.xlu0 %2473  ;;  %v2505_v61 = vmul.f32 %v7390_v7, %v9013_v39 }
 0x98f   : > { %7395 = vrcp.f32 %v2474_v60 }
 0x990   : > { %v2613_v50 = vpop.permute.xlu1 %2612  ;;  %7397 = vrcp.f32 %v2465_v12 }
 0x991   : > { %7399 = vrcp.f32 %v2471_v8 }
 0x992   : > { %v2611_v10 = vpop.permute.xlu0 %2610  ;;  %7401 = vrcp.f32 %v2480_v6 }
 0x993   : > { %6798 = vmatprep.subr.bf16.mxu0 %v2611_v10  ;;  %7403 = vrcp.f32 %v2477_v53 }
 0x994   : > { %v2615_v30 = vpop.permute.xlu1 %2614  ;;  %6799 = vmatpush3.bf16.msra.mxu0 %v2611_v10 }
 0x995   : > { %v7392_v34 = vpop.eup %7391  ;;  %6800 = vmatprep.subr.bf16.mxu0 %v2613_v50 }
 0x996   : > { %v2506_v0 = vmul.f32 %v7392_v34, %v9026_v16  ;;  %v2858_v19 = vpop.permute.xlu0 %2857  ;;  %v7394_v25 = vpop.eup %7393 }
 0x997   : > { %v2508_v57 = vmul.f32 %v7394_v25, %v9015_v49 }
 0x998   : > { %v2617_v15 = vpop.permute.xlu1 %2616  ;;  %6801 = vmatpush3.bf16.msra.mxu0 %v2613_v50  ;;  %v2517_v27 = vpack.c.bf16 %v2506_v0, %v2505_v61 }
 0x999   : > { %6802 = vmatprep.subr.bf16.mxu0 %v2615_v30  ;;  %v7396_v51 = vpop.eup %7395 }
 0x99a   : > { %6806 = vmatprep.mubr.msk.bf16.mxu0 %vm924_vm2, %v2517_v27  ;;  %v7398_v18 = vpop.eup %7397  ;;  %v2510_v39 = vmul.f32 %v7396_v51, %v9040_v63  ;;  %v2862_v24 = vpop.permute.xlu0 %2861 }
 0x99b   : > { %v7400_v31 = vpop.eup %7399  ;;  %v2507_v16 = vmul.f32 %v7398_v18, %v9008_v43 }
 0x99c   : > { %v2860_v21 = vpop.permute.xlu1 %2859  ;;  %6803 = vmatpush3.bf16.msra.mxu0 %v2615_v30  ;;  %v2509_v20 = vmul.f32 %v7400_v31, %v9031_v48  ;;  %v7402_v38 = vpop.eup %7401  ;;  %v2878_v48 = vsel %vm733_vm1, %v2858_v19, 0 }
 0x99d   : > { %6804 = vmatprep.subr.bf16.mxu0 %v2617_v15  ;;  %v2518_v11 = vpack.c.bf16 %v2508_v57, %v2507_v16  ;;  %v7404_v49 = vpop.eup %7403  ;;  %v2512_v43 = vmul.f32 %v7402_v38, %v9036_v4  ;;  %v2881_v33 = vsel %vm733_vm1, %v2860_v21, 0  ;;  %v2884_v4 = vsel %vm733_vm1, %v2862_v24, 0 }
 0x99e   : > { %v2519_v40 = vpack.c.bf16 %v2510_v39, %v2509_v20  ;;  %v2864_v63 = vpop.permute.xlu0 %2863  ;;  %v2511_v36 = vmul.f32 %v7404_v49, %v9019_v9 }
 0x99f   : > { %v2887_v12 = vsel %vm733_vm1, %v2864_v63, 0 }
 0x9a0   : > { %v2963_v28 = vpop.permute.xlu1 %2962  ;;  %6805 = vmatpush3.bf16.msra.mxu0 %v2617_v15  ;;  %v2520_v3 = vpack.c.bf16 %v2512_v43, %v2511_v36 }
 0x9a1   : > { %7065 = vmatprep.subr.msk.bf16.mxu0 %vm733_vm1, %v2858_v19  ;;  %7069 = vmatprep.subr.msk.bf16.mxu1 %vm733_vm1, %v2963_v28  ;;  %v2983_v41 = vsel %vm733_vm1, %v2963_v28, 0 }
 0x9a2   : > { %v2850_v44 = vpop.permute.xlu0 %2849 }
 0x9a3   : > { %6807 = vmatmul.mubr.msk.bf16.vlgmr.msra.gmra.mrb[64].mxu0 %vm924_vm2, %v2518_v11 }
 0x9a4   : > { %v2965_v5 = vpop.permute.xlu1 %2964  ;;  %6810 = vmatprep.mubr.msk.bf16.mxu0 %vm924_vm2, %v2519_v40 }
 0x9a5   : > { %v2986_v62 = vsel %vm733_vm1, %v2965_v5, 0 }
 0x9a6   : > { %v2967_v58 = vpop.permute.xlu0 %2966 }
 0x9a7   : > { %v2989_v14 = vsel %vm733_vm1, %v2967_v58, 0 }
 0x9a8   : > { %v2852_v32 = vpop.permute.xlu1 %2851 }
 0x9a9   : > { %6833 = vmatpush3.bf16.xpose.msra.mxu0 %v2878_v48 }
 0x9aa   : > { %7066 = vmatprep.subr.msk.bf16.mxu0 %vm733_vm1, %v2860_v21  ;;  %v2856_v59 = vpop.permute.xlu0 %2855 }
 0x9ab   : > { %6811 = vmatmul.mubr.msk.bf16.gmra.mrb[68].mxu0 %vm924_vm2, %v2520_v3 }
 0x9ac   : > { %v2854_v37 = vpop.permute.xlu1 %2853  ;;  %6840 = vmatprep.mubr.msk.bf16.mxu0 %vm733_vm1, %v2850_v44 }
 0x9ae   : > { %v2955_v31 = vpop.permute.xlu0 %2954 }
 0x9b0   : > { %v2969_v22 = vpop.permute.xlu1 %2968 }
 0x9b1   : > { %6835 = vmatpush3.bf16.xpose.msra.mxu0 %v2881_v33  ;;  %v2992_v10 = vsel %vm733_vm1, %v2969_v22, 0 }
 0x9b2   : > { %7067 = vmatprep.subr.msk.bf16.mxu0 %vm733_vm1, %v2862_v24  ;;  %v2959_v57 = vpop.permute.xlu0 %2958 }
 0x9b4   : > { %v2957_v9 = vpop.permute.xlu1 %2956 }
 0x9b8   : > { %v2961_v23 = vpop.permute.xlu1 %2960 }
 0x9b9   : > { %6837 = vmatpush3.bf16.xpose.msra.mxu0 %v2884_v4 }
 0x9ba   : > { %7068 = vmatprep.subr.msk.bf16.mxu0 %vm733_vm1, %v2864_v63 }
 0x9bc   : > { %v3244_v47 = vpop.permute.xlu1 %3243 }
 0x9c1   : > { %6839 = vmatpush3.bf16.xpose.msra.mxu0 %v2887_v12 }
 0x9c2   : > { %6864 = vmatprep.subr.bf16.mxu0 %v3244_v47 }
 0x9c8   : > { %6841 = vmatmul.mubr.msk.bf16.vlgmr.msra.gmra.mrb[72].mxu0 %vm733_vm1, %v2852_v32 }
 0x9c9   : > { %6844 = vmatprep.mubr.msk.bf16.mxu0 %vm733_vm1, %v2854_v37  ;;  %6865 = vmatpush3.bf16.msra.mxu0 %v3244_v47 }
 0x9d0   : > { %6845 = vmatmul.mubr.msk.bf16.gmra.mrb[76].mxu0 %vm733_vm1, %v2856_v59 }
 0xa49   : > { %v6792_v13 = vpop.f32.mrb[48].mxu1 }
 0xa4a   : > { %v2579_v53 = vpop.f32.mrb[49].mxu1 }
 0xa4b   : > { %v6793_v29 = vpop.f32.mrb[50].mxu1 }
 0xa4c   : > { %v2700_v26 = vpack.c.bf16 %v6793_v29, %v6792_v13  ;;  %v2582_v17 = vpop.f32.mrb[51].mxu1 }
 0xa4d   : > { %v2699_v54 = vpack.c.bf16 %v2582_v17, %v2579_v53 }
 0xa4f   : > { %6816 = vmatprep.mubr.msk.bf16.mxu1 %vm733_vm1, %v2699_v54 }
 0xa50   : > { %6817 = vmatmul.mubr.msk.bf16.vlgmr.msra.gmra.mrb[32].mxu1 %vm733_vm1, %v2700_v26 }
 0xa51   : > { %6849 = vmatpush3.bf16.xpose.msra.mxu1 %v2983_v41 }
 0xa52   : > { %7070 = vmatprep.subr.msk.bf16.mxu1 %vm733_vm1, %v2965_v5 }
 0xa59   : > { %6851 = vmatpush3.bf16.xpose.msra.mxu1 %v2986_v62 }
 0xa5a   : > { %7071 = vmatprep.subr.msk.bf16.mxu1 %vm733_vm1, %v2967_v58 }
 0xa5e   : > { %v6796_v8 = vpop.f32.mrb[52].mxu1 }
 0xa5f   : > { %v2595_v42 = vpop.f32.mrb[53].mxu1 }
 0xa60   : > { %v6797_v52 = vpop.f32.mrb[54].mxu1 }
 0xa61   : > { %6853 = vmatpush3.bf16.xpose.msra.mxu1 %v2989_v14  ;;  %v2702_v6 = vpack.c.bf16 %v6797_v52, %v6796_v8  ;;  %v2598_v60 = vpop.f32.mrb[55].mxu1 }
 0xa62   : > { %7072 = vmatprep.subr.msk.bf16.mxu1 %vm733_vm1, %v2969_v22  ;;  %v2701_v50 = vpack.c.bf16 %v2598_v60, %v2595_v42 }
 0xa64   : > { %6820 = vmatprep.mubr.msk.bf16.mxu1 %vm733_vm1, %v2701_v50 }
 0xa65   : > { %6821 = vmatmul.mubr.msk.bf16.gmra.mrb[36].mxu1 %vm733_vm1, %v2702_v6 }
 0xa69   : > { %6855 = vmatpush3.bf16.xpose.msra.mxu1 %v2992_v10 }
 0xa76   : > { %v6808_v7 = vpop.f32.mrb[64].mxu0 }
 0xa77   : > { %v2668_v30 = vpop.f32.mrb[65].mxu0 }
 0xa78   : > { %v6809_v34 = vpop.f32.mrb[66].mxu0 }
 0xa79   : > { %v2704_v61 = vpack.c.bf16 %v6809_v34, %v6808_v7  ;;  %v2671_v0 = vpop.f32.mrb[67].mxu0 }
 0xa7a   : > { %v2703_v15 = vpack.c.bf16 %v2671_v0, %v2668_v30 }
 0xa7c   : > { %6824 = vmatprep.mubr.msk.bf16.mxu1 %vm733_vm1, %v2703_v15 }
 0xa7d   : > { %6825 = vmatmul.mubr.msk.bf16.gmra.mrb[40].mxu1 %vm733_vm1, %v2704_v61 }
 0xa7e   : > { %v6812_v27 = vpop.f32.mrb[68].mxu0 }
 0xa7f   : > { %v2684_v19 = vpop.f32.mrb[69].mxu0 }
 0xa80   : > { %v6813_v25 = vpop.f32.mrb[70].mxu0 }
 0xa81   : > { %v2706_v51 = vpack.c.bf16 %v6813_v25, %v6812_v27  ;;  %v2687_v18 = vpop.f32.mrb[71].mxu0 }
 0xa82   : > { %v2705_v21 = vpack.c.bf16 %v2687_v18, %v2684_v19 }
 0xa84   : > { %6828 = vmatprep.mubr.msk.bf16.mxu1 %vm733_vm1, %v2705_v21 }
 0xa85   : > { %6829 = vmatmul.mubr.msk.bf16.gmra.mrb[44].mxu1 %vm733_vm1, %v2706_v51 }
 0xa86   : > { %6856 = vmatprep.mubr.msk.bf16.mxu1 %vm733_vm1, %v2955_v31 }
 0xa8d   : > { %6857 = vmatmul.mubr.msk.bf16.vlgmr.msra.gmra.mrb[56].mxu1 %vm733_vm1, %v2957_v9 }
 0xa8e   : > { %6860 = vmatprep.mubr.msk.bf16.mxu1 %vm733_vm1, %v2959_v57 }
 0xa95   : > { %6861 = vmatmul.mubr.msk.bf16.gmra.mrb[60].mxu1 %vm733_vm1, %v2961_v23 }
 0xa9b   : > { %v6842_v39 = vpop.f32.mrb[72].mxu0 }
 0xa9c   : > { %v2923_v16 = vpop.f32.mrb[73].mxu0  ;;  %v3065_v24 = vsel %vm924_vm2, %v6842_v39, -inf }
 0xa9d   : > { %3066 = vmax.xlane.f32.xlu0 %v3065_v24  ;;  %v6843_v28 = vpop.f32.mrb[74].mxu0  ;;  %v3059_v38 = vsel %vm924_vm2, %v2923_v16, -inf }
 0xa9e   : > { %v2926_v20 = vpop.f32.mrb[75].mxu0  ;;  %v3068_v5 = vsel %vm924_vm2, %v6843_v28, -inf }
 0xa9f   : > { %v3062_v11 = vsel %vm924_vm2, %v2926_v20, -inf }
 0xaa0   : > { %3063 = vmax.xlane.f32.xlu1 %v3062_v11 }
 0xaa1   : > { %3060 = vmax.xlane.f32.xlu0 %v3059_v38 }
 0xaa3   : > { %v6846_v40 = vpop.f32.mrb[76].mxu0 }
 0xaa4   : > { %v2939_v49 = vpop.f32.mrb[77].mxu0  ;;  %v3077_v63 = vsel %vm924_vm2, %v6846_v40, -inf }
 0xaa5   : > { %3069 = vmax.xlane.f32.xlu0 %v3068_v5  ;;  %3078 = vmax.xlane.f32.xlu1 %v3077_v63  ;;  %v6847_v43 = vpop.f32.mrb[78].mxu0  ;;  %v3071_v32 = vsel %vm924_vm2, %v2939_v49, -inf }
 0xaa6   : > { %v2942_v36 = vpop.f32.mrb[79].mxu0  ;;  %v3080_v48 = vsel %vm924_vm2, %v6847_v43, -inf }
 0xaa7   : > { %v3074_v3 = vsel %vm924_vm2, %v2942_v36, -inf }
 0xaa9   : > { %3072 = vmax.xlane.f32.xlu1 %v3071_v32  ;;  %3081 = vmax.xlane.f32.xlu0 %v3080_v48 }
 0xaad   : > { %3075 = vmax.xlane.f32.xlu0 %v3074_v3 }
 0xb2a   : > { %v3067_v44 = vpop.xlane.xlu0 %3066 }
 0xb2b   : > { %v3109_v37 = vsub.f32 %v6842_v39, %v3067_v44 }
 0xb2d   : > { %v3127_v22 = vmul.f32 1.442695, %v3109_v37  ;;  %v3064_v33 = vpop.xlane.xlu1 %3063 }
 0xb2e   : > { %v3061_v9 = vpop.xlane.xlu0 %3060  ;;  %v3108_v12 = vsub.f32 %v2926_v20, %v3064_v33 }
 0xb2f   : > { %7405 = vpow2.f32 %v3127_v22  ;;  %v3107_v4 = vsub.f32 %v2923_v16, %v3061_v9 }
 0xb30   : > { %v3125_v26 = vmul.f32 1.442695, %v3108_v12 }
 0xb31   : > { %v3123_v23 = vmul.f32 1.442695, %v3107_v4 }
 0xb32   : > { %v3079_v47 = vpop.xlane.xlu1 %3078  ;;  %v3070_v58 = vpop.xlane.xlu0 %3069 }
 0xb33   : > { %7407 = vpow2.f32 %v3123_v23  ;;  %v3113_v59 = vsub.f32 %v6846_v40, %v3079_v47  ;;  %v3110_v13 = vsub.f32 %v6843_v28, %v3070_v58 }
 0xb35   : > { %v3135_v53 = vmul.f32 1.442695, %v3113_v59  ;;  %v3129_v29 = vmul.f32 1.442695, %v3110_v13 }
 0xb36   : > { %v3073_v17 = vpop.xlane.xlu1 %3072  ;;  %v3082_v54 = vpop.xlane.xlu0 %3081 }
 0xb37   : > { %7409 = vpow2.f32 %v3135_v53  ;;  %v3111_v41 = vsub.f32 %v2939_v49, %v3073_v17  ;;  %v3114_v62 = vsub.f32 %v6847_v43, %v3082_v54 }
 0xb38   : > { %7411 = vpow2.f32 %v3129_v29 }
 0xb39   : > { %v9194_v8 = vpop.eup %7405  ;;  %v3131_v42 = vmul.f32 1.442695, %v3111_v41  ;;  %7413 = vpow2.f32 %v3125_v26  ;;  %v3137_v14 = vmul.f32 1.442695, %v3114_v62 }
 0xb3a   : > { %v3076_v52 = vpop.xlane.xlu0 %3075  ;;  %v3161_v6 = vsel %vm924_vm2, %v9194_v8, 0.0 }
 0xb3b   : > { %7415 = vpow2.f32 %v3131_v42  ;;  %v3112_v60 = vsub.f32 %v2942_v36, %v3076_v52  ;;  %3162 = vadd.xlane.f32.xlu1 %v3161_v6 }
 0xb3c   : > { %7417 = vpow2.f32 %v3137_v14 }
 0xb3d   : > { %v7408_v50 = vpop.eup %7407  ;;  %v3133_v10 = vmul.f32 1.442695, %v3112_v60 }
 0xb3e   : > { %v3155_v7 = vsel %vm924_vm2, %v7408_v50, 0.0 }
 0xb3f   : > { %3156 = vadd.xlane.f32.xlu1 %v3155_v7  ;;  %7419 = vpow2.f32 %v3133_v10 }
 0xb41   : > { %v9199_v30 = vpop.eup %7409 }
 0xb42   : > { %v9201_v34 = vpop.eup %7411  ;;  %v3173_v61 = vsel %vm924_vm2, %v9199_v30, 0.0 }
 0xb43   : > { %3174 = vadd.xlane.f32.xlu1 %v3173_v61  ;;  %v3164_v0 = vsel %vm924_vm2, %v9201_v34, 0.0  ;;  %v7414_v15 = vpop.eup %7413 }
 0xb44   : > { %3165 = vadd.xlane.f32.xlu0 %v3164_v0  ;;  %v3158_v25 = vsel %vm924_vm2, %v7414_v15, 0.0 }
 0xb45   : > { %v9207_v27 = vpop.eup %7415 }
 0xb46   : > { %v3167_v19 = vsel %vm924_vm2, %v9207_v27, 0.0  ;;  %v9212_v51 = vpop.eup %7417 }
 0xb47   : > { %3168 = vadd.xlane.f32.xlu1 %v3167_v19  ;;  %v3176_v18 = vsel %vm924_vm2, %v9212_v51, 0.0 }
 0xb48   : > { %3159 = vadd.xlane.f32.xlu0 %v3158_v25 }
 0xb49   : > { %v9216_v21 = vpop.eup %7419 }
 0xb4a   : > { %v3170_v31 = vsel %vm924_vm2, %v9216_v21, 0.0 }
 0xb4c   : > { %3177 = vadd.xlane.f32.xlu0 %v3176_v18 }
 0xb50   : > { %3171 = vadd.xlane.f32.xlu0 %v3170_v31 }
 0xb60   : > { %v6858_v57 = vpop.f32.mrb[56].mxu1 }
 0xb61   : > { %v3028_v39 = vpop.f32.mrb[57].mxu1  ;;  %v3089_v16 = vsel %vm924_vm2, %v6858_v57, -inf }
 0xb62   : > { %v6859_v24 = vpop.f32.mrb[58].mxu1  ;;  %3090 = vmax.xlane.f32.xlu1 %v3089_v16  ;;  %v3083_v11 = vsel %vm924_vm2, %v3028_v39, -inf }
 0xb63   : > { %v3031_v28 = vpop.f32.mrb[59].mxu1  ;;  %v3092_v20 = vsel %vm924_vm2, %v6859_v24, -inf }
 0xb64   : > { %3093 = vmax.xlane.f32.xlu0 %v3092_v20  ;;  %v3086_v38 = vsel %vm924_vm2, %v3031_v28, -inf }
 0xb66   : > { %3084 = vmax.xlane.f32.xlu1 %v3083_v11 }
 0xb68   : > { %v6862_v40 = vpop.f32.mrb[60].mxu1  ;;  %3087 = vmax.xlane.f32.xlu0 %v3086_v38 }
 0xb69   : > { %v3044_v49 = vpop.f32.mrb[61].mxu1  ;;  %v3101_v5 = vsel %vm924_vm2, %v6862_v40, -inf }
 0xb6a   : > { %v6863_v63 = vpop.f32.mrb[62].mxu1  ;;  %3102 = vmax.xlane.f32.xlu1 %v3101_v5  ;;  %v3095_v32 = vsel %vm924_vm2, %v3044_v49, -inf }
 0xb6b   : > { %v9225_v43 = vpop.f32.mrb[63].mxu1  ;;  %v3104_v36 = vsel %vm924_vm2, %v6863_v63, -inf }
 0xb6c   : > { %3105 = vmax.xlane.f32.xlu0 %v3104_v36  ;;  %v3098_v48 = vsel %vm924_vm2, %v9225_v43, -inf }
 0xb6e   : > { %3096 = vmax.xlane.f32.xlu1 %v3095_v32 }
 0xb70   : > { %3099 = vmax.xlane.f32.xlu0 %v3098_v48 }
 0xb7f   : > { %3245 = vrot.lane.b32.xlu1 %v8259_v35, %s7865_s21 }
 0xb83   : > { %3249 = vrot.lane.b32.xlu1 %v8265_v45, %s7865_s21 }
 0xb86   : > { %3247 = vrot.lane.b32.xlu0 %v8267_v46, %s7865_s21 }
 0xbc8   : > { %v3163_v3 = vpop.xlane.xlu1 %3162 }
 0xbcc   : > { %v3157_v44 = vpop.xlane.xlu1 %3156 }
 0xbcd   : > { %7421 = vrcp.f32 %v3157_v44 }
 0xbd0   : > { %v3175_v47 = vpop.xlane.xlu1 %3174 }
 0xbd1   : > { %v3166_v37 = vpop.xlane.xlu0 %3165 }
 0xbd4   : > { %v3169_v58 = vpop.xlane.xlu1 %3168 }
 0xbd5   : > { %v3160_v22 = vpop.xlane.xlu0 %3159 }
 0xbd6   : > { %7423 = vrcp.f32 %v3160_v22 }
 0xbd7   : > { %v7422_v33 = vpop.eup %7421 }
 0xbd8   : > { %v3219_v4 = vmul.f32 %v7422_v33, %v7408_v50 }
 0xbd9   : > { %v3178_v35 = vpop.xlane.xlu0 %3177 }
 0xbdd   : > { %v3172_v45 = vpop.xlane.xlu0 %3171 }
 0xbe0   : > { %v7424_v9 = vpop.eup %7423 }
 0xbe1   : > { %v3220_v23 = vmul.f32 %v7424_v9, %v7414_v15 }
 0xbe3   : > { %v3235_v12 = vpack.c.bf16 %v3220_v23, %v3219_v4 }
 0xbe5   : > { %6872 = vmatprep.mubr.msk.bf16.mxu0 %vm924_vm2, %v3235_v12 }
 0xbef   : > { %v3091_v59 = vpop.xlane.xlu1 %3090 }
 0xbf0   : > { %v3117_v13 = vsub.f32 %v6858_v57, %v3091_v59 }
 0xbf1   : > { %v3094_v46 = vpop.xlane.xlu0 %3093 }
 0xbf2   : > { %v3143_v53 = vmul.f32 1.442695, %v3117_v13  ;;  %v3118_v29 = vsub.f32 %v6859_v24, %v3094_v46 }
 0xbf3   : > { %v3085_v26 = vpop.xlane.xlu1 %3084 }
 0xbf4   : > { %7425 = vpow2.f32 %v3143_v53  ;;  %v3115_v17 = vsub.f32 %v3028_v39, %v3085_v26  ;;  %v3145_v41 = vmul.f32 1.442695, %v3118_v29 }
 0xbf5   : > { %v3088_v54 = vpop.xlane.xlu0 %3087  ;;  %7427 = vrcp.f32 %v3163_v3 }
 0xbf6   : > { %v3139_v62 = vmul.f32 1.442695, %v3115_v17  ;;  %v3116_v42 = vsub.f32 %v3031_v28, %v3088_v54 }
 0xbf7   : > { %v3103_v14 = vpop.xlane.xlu1 %3102 }
 0xbf8   : > { %7429 = vpow2.f32 %v3139_v62  ;;  %v3121_v52 = vsub.f32 %v6862_v40, %v3103_v14  ;;  %v3141_v60 = vmul.f32 1.442695, %v3116_v42 }
 0xbf9   : > { %7431 = vrcp.f32 %v3166_v37  ;;  %v3106_v6 = vpop.xlane.xlu0 %3105 }
 0xbfa   : > { %7433 = vpow2.f32 %v3145_v41  ;;  %v3151_v50 = vmul.f32 1.442695, %v3121_v52  ;;  %v3122_v10 = vsub.f32 %v6863_v63, %v3106_v6 }
 0xbfb   : > { %7435 = vrcp.f32 %v3172_v45  ;;  %v3097_v7 = vpop.xlane.xlu1 %3096 }
 0xbfc   : > { %7437 = vpow2.f32 %v3151_v50  ;;  %v3119_v61 = vsub.f32 %v3044_v49, %v3097_v7  ;;  %v3153_v0 = vmul.f32 1.442695, %v3122_v10  ;;  %v6290_v7 = vld [vmem:[%s10571_s3 + $0xc] sm:$0xf] }
 0xbfd   : > { %7439 = vrcp.f32 %v3169_v58  ;;  %v3100_v15 = vpop.xlane.xlu0 %3099 }
 0xbfe   : > { %v9238_v19 = vpop.eup %7425  ;;  %7441 = vpow2.f32 %v3141_v60  ;;  %v3147_v25 = vmul.f32 1.442695, %v3119_v61  ;;  %v3120_v18 = vsub.f32 %v9225_v43, %v3100_v15 }
 0xbff   : > { %7443 = vrcp.f32 %v3178_v35  ;;  %v3246_v31 = vpop.permute.xlu1 %3245  ;;  %v3185_v57 = vsel %vm924_vm2, %v9238_v19, 0.0  ;;  %v7428_v16 = vpop.eup %7427 }
 0xc00   : > { %7445 = vpow2.f32 %v3147_v25  ;;  %v3149_v39 = vmul.f32 1.442695, %v3120_v18  ;;  %6866 = vmatprep.subr.bf16.mxu0 %v3246_v31  ;;  %3186 = vadd.xlane.f32.xlu0 %v3185_v57  ;;  %v3221_v37 = vmul.f32 %v7428_v16, %v9194_v8  ;;  %v3456_v25 = vsel %vm1902_vm3, %v6290_v7, 0 }
 0xc01   : > { %7447 = vpow2.f32 %v3153_v0  ;;  %6867 = vmatpush3.bf16.msra.mxu0 %v3246_v31  ;;  %v3248_v24 = vpop.permute.xlu0 %3247 }
 0xc02   : > { %v9243_v28 = vpop.eup %7429  ;;  %7449 = vpow2.f32 %v3149_v39  ;;  %6868 = vmatprep.subr.bf16.mxu0 %v3248_v24 }
 0xc03   : > { %v7432_v20 = vpop.eup %7431  ;;  %v3179_v11 = vsel %vm924_vm2, %v9243_v28, 0.0  ;;  %7451 = vrcp.f32 %v3175_v47  ;;  %v3250_v49 = vpop.permute.xlu1 %3249 }
 0xc04   : > { %v9247_v38 = vpop.eup %7433  ;;  %3180 = vadd.xlane.f32.xlu0 %v3179_v11  ;;  %v3222_v43 = vmul.f32 %v7432_v20, %v9201_v34 }
 0xc05   : > { %v7436_v40 = vpop.eup %7435  ;;  %6869 = vmatpush3.bf16.msra.mxu0 %v3248_v24  ;;  %v3188_v32 = vsel %vm924_vm2, %v9247_v38, 0.0 }
 0xc06   : > { %v9249_v5 = vpop.eup %7437  ;;  %6870 = vmatprep.subr.bf16.mxu0 %v3250_v49  ;;  %v3224_v3 = vmul.f32 %v7436_v40, %v9216_v21  ;;  %v3236_v9 = vpack.c.bf16 %v3222_v43, %v3221_v37 }
 0xc07   : > { %v7440_v63 = vpop.eup %7439  ;;  %v3197_v36 = vsel %vm924_vm2, %v9249_v5, 0.0 }
 0xc08   : > { %v7442_v48 = vpop.eup %7441  ;;  %3198 = vadd.xlane.f32.xlu1 %v3197_v36  ;;  %3189 = vadd.xlane.f32.xlu0 %v3188_v32  ;;  %v3223_v33 = vmul.f32 %v7440_v63, %v9207_v27 }
 0xc09   : > { %v7444_v44 = vpop.eup %7443  ;;  %6871 = vmatpush3.bf16.msra.mxu0 %v3250_v49  ;;  %v3182_v23 = vsel %vm924_vm2, %v7442_v48, 0.0 }
 0xc0a   : > { %v9258_v22 = vpop.eup %7445  ;;  %v3237_v21 = vpack.c.bf16 %v3224_v3, %v3223_v33  ;;  %v3226_v35 = vmul.f32 %v7444_v44, %v9212_v51 }
 0xc0b   : > { %v9261_v34 = vpop.eup %7447  ;;  %v3191_v4 = vsel %vm924_vm2, %v9258_v22, 0.0 }
 0xc0c   : > { %v7450_v12 = vpop.eup %7449  ;;  %3192 = vadd.xlane.f32.xlu1 %v3191_v4  ;;  %3183 = vadd.xlane.f32.xlu0 %v3182_v23  ;;  %v3200_v27 = vsel %vm924_vm2, %v9261_v34, 0.0 }
 0xc0d   : > { %6873 = vmatmul.mubr.msk.bf16.vlgmr.msra.gmra.mrb[80].mxu0 %vm924_vm2, %v3236_v9  ;;  %v7452_v8 = vpop.eup %7451  ;;  %v3194_v47 = vsel %vm924_vm2, %v7450_v12, 0.0 }
 0xc0e   : > { %6876 = vmatprep.mubr.msk.bf16.mxu0 %vm924_vm2, %v3237_v21  ;;  %v3225_v58 = vmul.f32 %v7452_v8, %v9199_v30  ;;  %v3571_v8 = vlaneseq }
 0xc10   : > { %3201 = vadd.xlane.f32.xlu1 %v3200_v27  ;;  %3195 = vadd.xlane.f32.xlu0 %v3194_v47  ;;  %v3238_v45 = vpack.c.bf16 %v3226_v35, %v3225_v58  ;;  %v9305_v27 = vshrl.u32 %v3571_v8, 7  ;;  %v9313_v35 = vld [vmem:[%s10574_s6] sm:$0x3f] }
 0xc12   : > { %v9308_v47 = vsub.s32 0, %v9305_v27 }
 0xc14   : > { %v9317_v58 = vrot.slane %v9313_v35, %v9308_v47 }
 0xc15   : > { %6877 = vmatmul.mubr.msk.bf16.gmra.mrb[84].mxu0 %vm924_vm2, %v3238_v45 }
 0xc21   : > { %3334 = vrot.lane.b32.xlu1 %v8269_v55, %s7865_s21 }
 0xc25   : > { %3336 = vrot.lane.b32.xlu1 %v8279_v2, %s7865_s21 }
 0xc26   : > { %3332 = vrot.lane.b32.xlu0 %v8271_v56, %s7865_s21 }
 0xc29   : > { %3338 = vrot.lane.b32.xlu1 %v8277_v1, %s7865_s21 }
 0xc8d   : > { %v3187_v51 = vpop.xlane.xlu0 %3186 }
 0xc91   : > { %v3181_v59 = vpop.xlane.xlu0 %3180 }
 0xc92   : > { %7453 = vrcp.f32 %v3181_v59 }
 0xc95   : > { %v3199_v13 = vpop.xlane.xlu1 %3198  ;;  %v3190_v46 = vpop.xlane.xlu0 %3189 }
 0xc99   : > { %v3193_v30 = vpop.xlane.xlu1 %3192  ;;  %v3184_v53 = vpop.xlane.xlu0 %3183 }
 0xc9a   : > { %7455 = vrcp.f32 %v3184_v53  ;;  %v7533_v53 = vld [vmem:[%s8211_s5] sm:$0xff] }
 0xc9b   : > { %7457 = vrcp.f32 %v3190_v46 }
 0xc9c   : > { %v7454_v56 = vpop.eup %7453 }
 0xc9d   : > { %v3202_v29 = vpop.xlane.xlu1 %3201  ;;  %v3196_v26 = vpop.xlane.xlu0 %3195  ;;  %v3227_v54 = vmul.f32 %v7454_v56, %v9243_v28 }
 0xc9e   : > { %7459 = vrcp.f32 %v3196_v26 }
 0xc9f   : > { %7461 = vrcp.f32 %v3187_v51 }
 0xca0   : > { %7463 = vrcp.f32 %v3193_v30 }
 0xca1   : > { %v3335_v55 = vpop.permute.xlu1 %3334  ;;  %v3333_v2 = vpop.permute.xlu0 %3332  ;;  %7465 = vrcp.f32 %v3202_v29 }
 0xca2   : > { %6880 = vmatprep.subr.bf16.mxu1 %v3333_v2  ;;  %7467 = vrcp.f32 %v3199_v13 }
 0xca3   : > { %6881 = vmatpush3.bf16.msra.mxu1 %v3333_v2  ;;  %v7534_v2 = vld [vmem:[%s8211_s5 + $0x10] sm:$0xff] }
 0xca4   : > { %6882 = vmatprep.subr.bf16.mxu1 %v3335_v55  ;;  %v7456_v1 = vpop.eup %7455 }
 0xca5   : > { %v3337_v17 = vpop.permute.xlu1 %3336  ;;  %v3228_v41 = vmul.f32 %v7456_v1, %v7442_v48  ;;  %v7458_v42 = vpop.eup %7457  ;;  %v7535_v1 = vld [vmem:[%s8211_s5 + $0x8] sm:$0xff] }
 0xca6   : > { %v3230_v50 = vmul.f32 %v7458_v42, %v9247_v38  ;;  %v7536_v42 = vld [vmem:[%s8211_s5 + $0x18] sm:$0xff] }
 0xca7   : > { %6883 = vmatpush3.bf16.msra.mxu1 %v3335_v55  ;;  %v3239_v62 = vpack.c.bf16 %v3228_v41, %v3227_v54 }
 0xca8   : > { %6884 = vmatprep.subr.bf16.mxu1 %v3337_v17  ;;  %v7460_v14 = vpop.eup %7459 }
 0xca9   : > { %6888 = vmatprep.mubr.msk.bf16.mxu1 %vm924_vm2, %v3239_v62  ;;  %v7462_v52 = vpop.eup %7461  ;;  %v3339_v6 = vpop.permute.xlu1 %3338  ;;  %v3232_v10 = vmul.f32 %v7460_v14, %v7450_v12 }
 0xcaa   : > { %v7464_v60 = vpop.eup %7463  ;;  %v3229_v61 = vmul.f32 %v7462_v52, %v9238_v19 }
 0xcab   : > { %6885 = vmatpush3.bf16.msra.mxu1 %v3337_v17  ;;  %v3231_v0 = vmul.f32 %v7464_v60, %v9258_v22  ;;  %v7466_v18 = vpop.eup %7465 }
 0xcac   : > { %6886 = vmatprep.subr.bf16.mxu1 %v3339_v6  ;;  %v3240_v15 = vpack.c.bf16 %v3230_v50, %v3229_v61  ;;  %v7468_v57 = vpop.eup %7467  ;;  %v3234_v39 = vmul.f32 %v7466_v18, %v9261_v34  ;;  %v7537_v61 = vld [vmem:[%s8211_s5 + $0x20] sm:$0xff]  ;;  %v7538_v18 = vld [vmem:[%s8211_s5 + $0x30] sm:$0xff] }
 0xcad   : > { %v3241_v31 = vpack.c.bf16 %v3232_v10, %v3231_v0  ;;  %v3233_v19 = vmul.f32 %v7468_v57, %v9249_v5 }
 0xcaf   : > { %6887 = vmatpush3.bf16.msra.mxu1 %v3339_v6  ;;  %v3242_v16 = vpack.c.bf16 %v3234_v39, %v3233_v19  ;;  %v7539_v39 = vld [vmem:[%s8211_s5 + $0x28] sm:$0xff] }
 0xcb0   : > { %7073 = vmatprep.subr.msk.bf16.mxu1 %vm1902_vm3, %v6290_v7 }
 0xcb2   : > { %6889 = vmatmul.mubr.msk.bf16.vlgmr.msra.gmra.mrb[64].mxu1 %vm924_vm2, %v3240_v15 }
 0xcb3   : > { %6892 = vmatprep.mubr.msk.bf16.mxu1 %vm924_vm2, %v3241_v31  ;;  %6897 = vmatpush3.bf16.msra.mxu1 %v3456_v25 }
 0xcba   : > { %6893 = vmatmul.mubr.msk.bf16.gmra.mrb[68].mxu1 %vm924_vm2, %v3242_v16 }
 0xce0   : > { %v6874_v24 = vpop.f32.mrb[80].mxu0 }
 0xce1   : > { %v3301_v28 = vpop.f32.mrb[81].mxu0 }
 0xce2   : > { %v6875_v20 = vpop.f32.mrb[82].mxu0 }
 0xce3   : > { %v3422_v11 = vpack.c.bf16 %v6875_v20, %v6874_v24  ;;  %v3304_v38 = vpop.f32.mrb[83].mxu0  ;;  %v7540_v24 = vld [vmem:[%s8211_s5 + $0x38] sm:$0xff] }
 0xce4   : > { %v3421_v40 = vpack.c.bf16 %v3304_v38, %v3301_v28 }
 0xce6   : > { %6898 = vmatprep.mubr.msk.bf16.mxu1 %vm733_vm1, %v3421_v40 }
 0xce7   : > { %6899 = vmatmul.mubr.msk.bf16.vlgmr.msra.gmra.mrb[32].mxu1 %vm733_vm1, %v3422_v11 }
 0xce8   : > { %v6878_v49 = vpop.f32.mrb[84].mxu0 }
 0xce9   : > { %v3317_v63 = vpop.f32.mrb[85].mxu0 }
 0xcea   : > { %v6879_v43 = vpop.f32.mrb[86].mxu0 }
 0xceb   : > { %v3424_v36 = vpack.c.bf16 %v6879_v43, %v6878_v49  ;;  %v3320_v32 = vpop.f32.mrb[87].mxu0 }
 0xcec   : > { %v3423_v48 = vpack.c.bf16 %v3320_v32, %v3317_v63 }
 0xcee   : > { %6902 = vmatprep.mubr.msk.bf16.mxu1 %vm733_vm1, %v3423_v48 }
 0xcef   : > { %6903 = vmatmul.mubr.msk.bf16.gmra.mrb[36].mxu1 %vm733_vm1, %v3424_v36 }
 0xd85   : > { %v6890_v5 = vpop.f32.mrb[64].mxu1 }
 0xd86   : > { %v3390_v3 = vpop.f32.mrb[65].mxu1 }
 0xd87   : > { %v6891_v44 = vpop.f32.mrb[66].mxu1 }
 0xd88   : > { %v3426_v37 = vpack.c.bf16 %v6891_v44, %v6890_v5  ;;  %v3393_v22 = vpop.f32.mrb[67].mxu1 }
 0xd89   : > { %v3425_v33 = vpack.c.bf16 %v3393_v22, %v3390_v3  ;;  %v7541_v3 = vld [vmem:[%s8211_s5 + $0x40] sm:$0xff] }
 0xd8b   : > { %6906 = vmatprep.mubr.msk.bf16.mxu1 %vm733_vm1, %v3425_v33  ;;  %v7542_v33 = vld [vmem:[%s8211_s5 + $0x50] sm:$0xff] }
 0xd8c   : > { %6907 = vmatmul.mubr.msk.bf16.gmra.mrb[40].mxu1 %vm733_vm1, %v3426_v37 }
 0xd8d   : > { %v6894_v34 = vpop.f32.mrb[68].mxu1 }
 0xd8e   : > { %v3406_v9 = vpop.f32.mrb[69].mxu1 }
 0xd8f   : > { %v6895_v4 = vpop.f32.mrb[70].mxu1 }
 0xd90   : > { %v3428_v23 = vpack.c.bf16 %v6895_v4, %v6894_v34  ;;  %v3409_v12 = vpop.f32.mrb[71].mxu1 }
 0xd91   : > { %v3427_v21 = vpack.c.bf16 %v3409_v12, %v3406_v9  ;;  %v7543_v9 = vld [vmem:[%s8211_s5 + $0x48] sm:$0xff] }
 0xd93   : > { %6910 = vmatprep.mubr.msk.bf16.mxu1 %vm733_vm1, %v3427_v21  ;;  %v7544_v21 = vld [vmem:[%s8211_s5 + $0x58] sm:$0xff] }
 0xd94   : > { %6911 = vmatmul.mubr.msk.bf16.gmra.mrb[44].mxu1 %vm733_vm1, %v3428_v23 }
 0xdba   : > { %v6900_v45 = vpop.f32.mrb[32].mxu1 }
 0xdbb   : > { %v3492_v51 = vpop.f32.mrb[33].mxu1  ;;  %v3577_v59 = vadd.f32 %v6900_v45, %v9317_v58 }
 0xdbc   : > { %v3575_v13 = vadd.f32 %v9317_v58, %v3492_v51  ;;  %v6901_v46 = vpop.f32.mrb[34].mxu1 }
 0xdbd   : > { %v3495_v30 = vpop.f32.mrb[35].mxu1  ;;  %v3578_v55 = vadd.f32 %v6901_v46, %v9317_v58  ;;  %v9327_v56 = vadd.f32 %v7534_v2, %v3577_v59 }
 0xdbe   : > { %v9322_v29 = vadd.f32 %v7533_v53, %v3575_v13  ;;  %v3576_v26 = vadd.f32 %v9317_v58, %v3495_v30 }
 0xdbf   : > { %v9337_v14 = vadd.f32 %v7536_v42, %v3578_v55  ;;  %v3613_v10 = vsel %vm591_vm0, %v9327_v56, 0.0 }
 0xdc0   : > { %v9330_v17 = vadd.f32 %v7535_v1, %v3576_v26  ;;  %v3607_v54 = vsel %vm591_vm0, %v9322_v29, 0.0 }
 0xdc1   : > { %3608 = vadd.xlane.f32.xlu0 %v3607_v54  ;;  %v3616_v25 = vsel %vm591_vm0, %v9337_v14, 0.0  ;;  %v7545_v54 = vld [vmem:[%s8211_s5 + $0x60] sm:$0xff] }
 0xdc2   : > { %v6904_v41 = vpop.f32.mrb[36].mxu1  ;;  %v3610_v62 = vsel %vm591_vm0, %v9330_v17, 0.0 }
 0xdc3   : > { %3611 = vadd.xlane.f32.xlu1 %v3610_v62  ;;  %v3508_v52 = vpop.f32.mrb[37].mxu1  ;;  %v3581_v6 = vadd.f32 %v6904_v41, %v9317_v58 }
 0xdc4   : > { %v3579_v60 = vadd.f32 %v9317_v58, %v3508_v52  ;;  %v6905_v50 = vpop.f32.mrb[38].mxu1 }
 0xdc5   : > { %3614 = vadd.xlane.f32.xlu0 %v3613_v10  ;;  %v3511_v7 = vpop.f32.mrb[39].mxu1  ;;  %v9350_v31 = vadd.f32 %v7538_v18, %v3581_v6  ;;  %v3582_v57 = vadd.f32 %v6905_v50, %v9317_v58  ;;  %v7546_v10 = vld [vmem:[%s8211_s5 + $0x70] sm:$0xff] }
 0xdc6   : > { %v9344_v0 = vadd.f32 %v7537_v61, %v3579_v60  ;;  %v3580_v15 = vadd.f32 %v9317_v58, %v3511_v7  ;;  %v7547_v61 = vld [vmem:[%s8211_s5 + $0x68] sm:$0xff] }
 0xdc7   : > { %v9359_v28 = vadd.f32 %v7540_v24, %v3582_v57  ;;  %v3625_v20 = vsel %vm591_vm0, %v9350_v31, 0.0 }
 0xdc8   : > { %v9354_v19 = vadd.f32 %v7539_v39, %v3580_v15  ;;  %v3619_v16 = vsel %vm591_vm0, %v9344_v0, 0.0 }
 0xdc9   : > { %3617 = vadd.xlane.f32.xlu0 %v3616_v25  ;;  %3620 = vadd.xlane.f32.xlu1 %v3619_v16  ;;  %v3628_v38 = vsel %vm591_vm0, %v9359_v28, 0.0 }
 0xdca   : > { %v3622_v11 = vsel %vm591_vm0, %v9354_v19, 0.0 }
 0xdcd   : > { %3626 = vadd.xlane.f32.xlu1 %v3625_v20  ;;  %3623 = vadd.xlane.f32.xlu0 %v3622_v11 }
 0xdd1   : > { %3629 = vadd.xlane.f32.xlu0 %v3628_v38 }
 0xe4e   : > { %v3609_v40 = vpop.xlane.xlu0 %3608 }
 0xe4f   : > { %v3656_v59 = vmul.f32 0.03125, %v3609_v40 }
 0xe50   : > { %v3612_v12 = vpop.xlane.xlu1 %3611 }
 0xe51   : > { %v3657_v2 = vmul.f32 0.03125, %v3612_v12  ;;  %v9399_v6 = vsub.f32 %v9322_v29, %v3656_v59  ;;  %v7548_v29 = vld [vmem:[%s8211_s5 + $0x78] sm:$0xff] }
 0xe52   : > { %v3615_v48 = vpop.xlane.xlu0 %3614 }
 0xe53   : > { %v3658_v50 = vmul.f32 0.03125, %v3615_v48  ;;  %v3688_v38 = vmul.f32 %v9399_v6, %v9399_v6 }
 0xe55   : > { %v9418_v24 = vsub.f32 %v9327_v56, %v3658_v50  ;;  %v3704_v48 = vsel %vm591_vm0, %v3688_v38, 0.0 }
 0xe56   : > { %v3618_v13 = vpop.xlane.xlu0 %3617  ;;  %v3621_v60 = vpop.xlane.xlu1 %3620 }
 0xe57   : > { %v3659_v57 = vmul.f32 0.03125, %v3618_v13  ;;  %v3660_v20 = vmul.f32 0.03125, %v3621_v60  ;;  %v7201_v13 = vld [vmem:[#allocation7] sm:$0xff]  }
 0xe58   : > { %6914 = vmatprep.subr.bf16.mxu0 %v7201_v13 }
 0xe59   : > { %v9425_v40 = vsub.f32 %v9337_v14, %v3659_v57  ;;  %6915 = vmatpush3.bf16.msra.mxu0 %v7201_v13 }
 0xe5a   : > { %v3624_v18 = vpop.xlane.xlu0 %3623 }
 0xe5f   : > { %v6908_v49 = vpop.f32.mrb[40].mxu1 }
 0xe60   : > { %v3524_v63 = vpop.f32.mrb[41].mxu1  ;;  %v3585_v43 = vadd.f32 %v6908_v49, %v9317_v58  ;;  %v3661_v49 = vmul.f32 0.03125, %v3624_v18 }
 0xe61   : > { %v3583_v36 = vadd.f32 %v9317_v58, %v3524_v63  ;;  %v6909_v32 = vpop.f32.mrb[42].mxu1 }
 0xe62   : > { %v3527_v5 = vpop.f32.mrb[43].mxu1  ;;  %v3586_v37 = vadd.f32 %v6909_v32, %v9317_v58  ;;  %v9375_v34 = vadd.f32 %v7542_v33, %v3585_v43  ;;  %v3630_v43 = vpop.xlane.xlu0 %3629  ;;  %v9438_v14 = vsub.f32 %v9354_v19, %v3661_v49 }
 0xe63   : > { %v9370_v44 = vadd.f32 %v7541_v3, %v3583_v36  ;;  %v3584_v22 = vadd.f32 %v9317_v58, %v3527_v5  ;;  %v9432_v36 = vsub.f32 %v9344_v0, %v3660_v20  ;;  %v3690_v5 = vmul.f32 %v9418_v24, %v9418_v24 }
 0xe64   : > { %v9383_v8 = vadd.f32 %v7544_v21, %v3586_v37  ;;  %v3637_v55 = vsel %vm591_vm0, %v9375_v34, 0.0  ;;  %v3663_v3 = vmul.f32 0.03125, %v3630_v43  ;;  %v3693_v12 = vmul.f32 %v9438_v14, %v9438_v14 }
 0xe65   : > { %v9378_v4 = vadd.f32 %v7543_v9, %v3584_v22  ;;  %v3631_v23 = vsel %vm591_vm0, %v9370_v44, 0.0  ;;  %v3691_v22 = vmul.f32 %v9425_v40, %v9425_v40  ;;  %v3710_v33 = vsel %vm591_vm0, %v3690_v5, 0.0 }
 0xe66   : > { %3632 = vadd.xlane.f32.xlu1 %v3631_v23  ;;  %v3640_v52 = vsel %vm591_vm0, %v9383_v8, 0.0  ;;  %v3692_v9 = vmul.f32 %v9432_v36, %v9432_v36  ;;  %v9450_v23 = vsub.f32 %v9359_v28, %v3663_v3 }
 0xe67   : > { %v6912_v45 = vpop.f32.mrb[44].mxu1  ;;  %v3634_v51 = vsel %vm591_vm0, %v9378_v4, 0.0  ;;  %v3713_v19 = vsel %vm591_vm0, %v3691_v22, 0.0 }
 0xe68   : > { %3635 = vadd.xlane.f32.xlu0 %v3634_v51  ;;  %v3540_v46 = vpop.f32.mrb[45].mxu1  ;;  %v3589_v30 = vadd.f32 %v6912_v45, %v9317_v58  ;;  %v3716_v21 = vsel %vm591_vm0, %v3692_v9, 0.0  ;;  %v3719_v45 = vsel %vm591_vm0, %v3693_v12, 0.0  ;;  %v3695_v51 = vmul.f32 %v9450_v23, %v9450_v23 }
 0xe69   : > { %v3587_v53 = vadd.f32 %v9317_v58, %v3540_v46  ;;  %v6913_v26 = vpop.f32.mrb[46].mxu1  ;;  %v7202_v46 = vld [vmem:[#allocation7 + $0x8] sm:$0xff]  }
 0xe6a   : > { %3638 = vadd.xlane.f32.xlu1 %v3637_v55  ;;  %v3543_v1 = vpop.f32.mrb[47].mxu1  ;;  %v3590_v62 = vadd.f32 %v6913_v26, %v9317_v58  ;;  %v9402_v7 = vadd.f32 %v7546_v10, %v3589_v30  ;;  %v3725_v59 = vsel %vm591_vm0, %v3695_v51, 0.0  ;;  %6916 = vmatprep.subr.bf16.mxu0 %v7202_v46 }
 0xe6b   : > { %v9392_v41 = vadd.f32 %v7545_v54, %v3587_v53  ;;  %v3588_v42 = vadd.f32 %v9317_v58, %v3543_v1  ;;  %v9410_v58 = vsub.f32 %v9330_v17, %v3657_v2  ;;  %v3627_v17 = vpop.xlane.xlu1 %3626  ;;  %6917 = vmatpush3.bf16.msra.mxu0 %v7202_v46 }
 0xe6c   : > { %3641 = vadd.xlane.f32.xlu0 %v3640_v52  ;;  %v9413_v39 = vadd.f32 %v7548_v29, %v3590_v62  ;;  %v3649_v11 = vsel %vm591_vm0, %v9402_v7, 0.0  ;;  %v3662_v32 = vmul.f32 0.03125, %v3627_v17 }
 0xe6d   : > { %v9405_v15 = vadd.f32 %v7547_v61, %v3588_v42  ;;  %v3643_v25 = vsel %vm591_vm0, %v9392_v41, 0.0  ;;  %v3689_v56 = vmul.f32 %v9410_v58, %v9410_v58 }
 0xe6e   : > { %3644 = vadd.xlane.f32.xlu1 %v3643_v25  ;;  %v3652_v63 = vsel %vm591_vm0, %v9413_v39, 0.0  ;;  %v9444_v0 = vsub.f32 %v9350_v31, %v3662_v32 }
 0xe6f   : > { %v3646_v16 = vsel %vm591_vm0, %v9405_v15, 0.0  ;;  %v3707_v37 = vsel %vm591_vm0, %v3689_v56, 0.0 }
 0xe70   : > { %3647 = vadd.xlane.f32.xlu0 %v3646_v16  ;;  %v3694_v31 = vmul.f32 %v9444_v0, %v9444_v0 }
 0xe72   : > { %3650 = vadd.xlane.f32.xlu1 %v3649_v11  ;;  %v3722_v28 = vsel %vm591_vm0, %v3694_v31, 0.0 }
 0xe74   : > { %3653 = vadd.xlane.f32.xlu0 %v3652_v63 }
 0xe76   : > { %3705 = vadd.xlane.f32.xlu1 %v3704_v48 }
 0xe78   : > { %3708 = vadd.xlane.f32.xlu0 %v3707_v37 }
 0xe7a   : > { %3711 = vadd.xlane.f32.xlu1 %v3710_v33 }
 0xe7c   : > { %3714 = vadd.xlane.f32.xlu0 %v3713_v19 }
 0xe7e   : > { %3717 = vadd.xlane.f32.xlu1 %v3716_v21 }
 0xe80   : > { %3720 = vadd.xlane.f32.xlu0 %v3719_v45 }
 0xe82   : > { %3723 = vadd.xlane.f32.xlu1 %v3722_v28 }
 0xe84   : > { %3726 = vadd.xlane.f32.xlu0 %v3725_v59 }
 0xef3   : > { %v3633_v30 = vpop.xlane.xlu1 %3632 }
 0xef4   : > { %v3664_v53 = vmul.f32 0.03125, %v3633_v30 }
 0xef5   : > { %v3636_v26 = vpop.xlane.xlu0 %3635 }
 0xef6   : > { %v9464_v55 = vsub.f32 %v9370_v44, %v3664_v53  ;;  %v3665_v2 = vmul.f32 0.03125, %v3636_v26  ;;  %v9512_v53 = vsub.s32 1, %v9305_v27 }
 0xef7   : > { %v3639_v1 = vpop.xlane.xlu1 %3638 }
 0xef8   : > { %v9467_v54 = vsub.f32 %v9378_v4, %v3665_v2  ;;  %v3666_v62 = vmul.f32 0.03125, %v3639_v1  ;;  %v3696_v42 = vmul.f32 %v9464_v55, %v9464_v55 }
 0xef9   : > { %v3642_v52 = vpop.xlane.xlu0 %3641 }
 0xefa   : > { %v9472_v60 = vsub.f32 %v9375_v34, %v3666_v62  ;;  %v3667_v50 = vmul.f32 0.03125, %v3642_v52  ;;  %v3728_v10 = vsel %vm591_vm0, %v3696_v42, 0.0  ;;  %v3697_v44 = vmul.f32 %v9467_v54, %v9467_v54 }
 0xefb   : > { %3729 = vadd.xlane.f32.xlu1 %v3728_v10  ;;  %v3645_v61 = vpop.xlane.xlu1 %3644  ;;  %v9519_v10 = vsub.s32 2, %v9305_v27 }
 0xefc   : > { %v9478_v25 = vsub.f32 %v9383_v8, %v3667_v50  ;;  %v3668_v4 = vmul.f32 0.03125, %v3645_v61  ;;  %v3731_v18 = vsel %vm591_vm0, %v3697_v44, 0.0  ;;  %v3698_v57 = vmul.f32 %v9472_v60, %v9472_v60 }
 0xefd   : > { %3732 = vadd.xlane.f32.xlu0 %v3731_v18  ;;  %v3648_v34 = vpop.xlane.xlu0 %3647  ;;  %v9516_v50 = vrot.slane %v9313_v35, %v9512_v53 }
 0xefe   : > { %v9484_v29 = vsub.f32 %v9392_v41, %v3668_v4  ;;  %v3669_v16 = vmul.f32 0.03125, %v3648_v34  ;;  %v3734_v20 = vsel %vm591_vm0, %v3698_v57, 0.0  ;;  %v3699_v11 = vmul.f32 %v9478_v25, %v9478_v25 }
 0xeff   : > { %3735 = vadd.xlane.f32.xlu1 %v3734_v20  ;;  %v3651_v8 = vpop.xlane.xlu1 %3650 }
 0xf00   : > { %v9490_v38 = vsub.f32 %v9405_v15, %v3669_v16  ;;  %v3670_v17 = vmul.f32 0.03125, %v3651_v8  ;;  %v3737_v49 = vsel %vm591_vm0, %v3699_v11, 0.0  ;;  %v3700_v63 = vmul.f32 %v9484_v29, %v9484_v29 }
 0xf01   : > { %3738 = vadd.xlane.f32.xlu0 %v3737_v49  ;;  %v3654_v41 = vpop.xlane.xlu0 %3653  ;;  %v9525_v11 = vrot.slane %v9313_v35, %v9519_v10 }
 0xf02   : > { %v9496_v56 = vsub.f32 %v9402_v7, %v3670_v17  ;;  %v3671_v43 = vmul.f32 0.03125, %v3654_v41  ;;  %v3740_v32 = vsel %vm591_vm0, %v3700_v63, 0.0  ;;  %v3701_v48 = vmul.f32 %v9490_v38, %v9490_v38 }
 0xf03   : > { %3741 = vadd.xlane.f32.xlu1 %v3740_v32  ;;  %v3706_v15 = vpop.xlane.xlu1 %3705 }
 0xf04   : > { %v9502_v5 = vsub.f32 %v9413_v39, %v3671_v43  ;;  %v3752_v3 = vmul.f32 0.03125, %v3706_v15  ;;  %v3743_v37 = vsel %vm591_vm0, %v3701_v48, 0.0  ;;  %v3702_v22 = vmul.f32 %v9496_v56, %v9496_v56 }
 0xf05   : > { %3744 = vadd.xlane.f32.xlu0 %v3743_v37  ;;  %v3709_v7 = vpop.xlane.xlu0 %3708 }
 0xf06   : > { %v3768_v33 = vadd.f32 1e-05, %v3752_v3  ;;  %v3753_v9 = vmul.f32 0.03125, %v3709_v7  ;;  %v3746_v19 = vsel %vm591_vm0, %v3702_v22, 0.0  ;;  %v3703_v12 = vmul.f32 %v9502_v5, %v9502_v5 }
 0xf07   : > { %3747 = vadd.xlane.f32.xlu1 %v3746_v19  ;;  %v3712_v21 = vpop.xlane.xlu1 %3711 }
 0xf08   : > { %7469 = vrsqrt.f32 %v3768_v33  ;;  %v3769_v39 = vadd.f32 1e-05, %v3753_v9  ;;  %v3754_v31 = vmul.f32 0.03125, %v3712_v21  ;;  %v3749_v45 = vsel %vm591_vm0, %v3703_v12, 0.0 }
 0xf09   : > { %3750 = vadd.xlane.f32.xlu0 %v3749_v45  ;;  %v3715_v51 = vpop.xlane.xlu0 %3714 }
 0xf0a   : > { %7471 = vrsqrt.f32 %v3769_v39  ;;  %v3770_v28 = vadd.f32 1e-05, %v3754_v31  ;;  %v3755_v59 = vmul.f32 0.03125, %v3715_v51 }
 0xf0b   : > { %v3718_v13 = vpop.xlane.xlu1 %3717 }
 0xf0c   : > { %7473 = vrsqrt.f32 %v3770_v28  ;;  %v3771_v46 = vadd.f32 1e-05, %v3755_v59  ;;  %v3756_v30 = vmul.f32 0.03125, %v3718_v13  ;;  %v7203_v13 = vld [vmem:[%s10627_s2] sm:$0xff]  }
 0xf0d   : > { %v3721_v26 = vpop.xlane.xlu0 %3720  ;;  %6934 = vmatprep.subr.bf16.mxu0 %v7203_v13 }
 0xf0e   : > { %7475 = vrsqrt.f32 %v3771_v46  ;;  %v3772_v2 = vadd.f32 1e-05, %v3756_v30  ;;  %v3757_v1 = vmul.f32 0.03125, %v3721_v26  ;;  %v7204_v46 = vld [vmem:[%s10627_s2 + $0x8] sm:$0xff]   ;;  %v7205_v30 = vld [vmem:[%s10627_s2 + $0x10] sm:$0xff]   ;;  %v7206_v26 = vld [vmem:[%s10627_s2 + $0x18] sm:$0xff]  }
 0xf0f   : > { %v3724_v62 = vpop.xlane.xlu1 %3723 }
 0xf10   : > { %7477 = vrsqrt.f32 %v3772_v2  ;;  %v3773_v42 = vadd.f32 1e-05, %v3757_v1  ;;  %v3758_v52 = vmul.f32 0.03125, %v3724_v62 }
 0xf11   : > { %v3727_v44 = vpop.xlane.xlu0 %3726 }
 0xf12   : > { %v7470_v61 = vpop.eup %7469  ;;  %7479 = vrsqrt.f32 %v3773_v42  ;;  %v3774_v4 = vadd.f32 1e-05, %v3758_v52  ;;  %v3759_v18 = vmul.f32 0.03125, %v3727_v44 }
 0xf13   : > { %v3800_v57 = vmul.f32 %v7470_v61, %v9399_v6 }
 0xf14   : > { %v7472_v34 = vpop.eup %7471  ;;  %7481 = vrsqrt.f32 %v3774_v4  ;;  %v3775_v16 = vadd.f32 1e-05, %v3759_v18 }
 0xf15   : > { %v3801_v20 = vmul.f32 %v7472_v34, %v9410_v58  ;;  %v3820_v8 = vmul.f32 %v9516_v50, %v3800_v57 }
 0xf16   : > { %v7474_v17 = vpop.eup %7473  ;;  %7483 = vrsqrt.f32 %v3775_v16 }
 0xf17   : > { %v3802_v49 = vmul.f32 %v7474_v17, %v9418_v24  ;;  %v3821_v63 = vmul.f32 %v9516_v50, %v3801_v20  ;;  %v9533_v32 = vadd.f32 %v9525_v11, %v3820_v8 }
 0xf18   : > { %v7476_v41 = vpop.eup %7475 }
 0xf19   : > { %v3822_v6 = vmul.f32 %v9516_v50, %v3802_v49  ;;  %v3803_v43 = vmul.f32 %v7476_v41, %v9425_v40  ;;  %v9536_v58 = vadd.f32 %v9525_v11, %v3821_v63 }
 0xf1a   : > { %v7478_v48 = vpop.eup %7477 }
 0xf1b   : > { %v3823_v15 = vmul.f32 %v9516_v50, %v3803_v43  ;;  %v3804_v3 = vmul.f32 %v7478_v48, %v9432_v36  ;;  %v3860_v24 = vpack.c.bf16 %v9536_v58, %v9533_v32  ;;  %v9543_v22 = vadd.f32 %v9525_v11, %v3822_v6 }
 0xf1c   : > { %v7480_v37 = vpop.eup %7479 }
 0xf1d   : > { %v9546_v40 = vadd.f32 %v9525_v11, %v3823_v15  ;;  %v3805_v7 = vmul.f32 %v7480_v37, %v9438_v14  ;;  %6918 = vmatprep.mubr.msk.bf16.mxu0 %vm591_vm0, %v3860_v24  ;;  %v3824_v33 = vmul.f32 %v9516_v50, %v3804_v3 }
 0xf1e   : > { %v7482_v9 = vpop.eup %7481 }
 0xf1f   : > { %v3806_v19 = vmul.f32 %v7482_v9, %v9444_v0  ;;  %v3861_v36 = vpack.c.bf16 %v9546_v40, %v9543_v22  ;;  %v3825_v12 = vmul.f32 %v9516_v50, %v3805_v7  ;;  %v9558_v31 = vadd.f32 %v9525_v11, %v3824_v33 }
 0xf20   : > { %v7484_v21 = vpop.eup %7483 }
 0xf21   : > { %v3807_v39 = vmul.f32 %v7484_v21, %v9450_v23  ;;  %6919 = vmatmul.mubr.msk.bf16.vlgmr.msra.gmra.mrb[88].mxu0 %vm591_vm0, %v3861_v36  ;;  %v9561_v14 = vadd.f32 %v9525_v11, %v3825_v12  ;;  %v3826_v45 = vmul.f32 %v9516_v50, %v3806_v19 }
 0xf22   : > { %6935 = vmatpush3.bf16.msra.mxu0 %v7203_v13 }
 0xf23   : > { %v3862_v0 = vpack.c.bf16 %v9561_v14, %v9558_v31  ;;  %v3827_v51 = vmul.f32 %v9516_v50, %v3807_v39  ;;  %v9569_v28 = vadd.f32 %v9525_v11, %v3826_v45  ;;  %6936 = vmatprep.subr.bf16.mxu0 %v7204_v46 }
 0xf25   : > { %6922 = vmatprep.mubr.msk.bf16.mxu0 %vm591_vm0, %v3862_v0  ;;  %v9572_v23 = vadd.f32 %v9525_v11, %v3827_v51 }
 0xf26   : > { %6937 = vmatpush3.bf16.msra.mxu0 %v7204_v46 }
 0xf27   : > { %v3863_v59 = vpack.c.bf16 %v9572_v23, %v9569_v28  ;;  %6938 = vmatprep.subr.bf16.mxu0 %v7205_v30 }
 0xf29   : > { %6923 = vmatmul.mubr.msk.bf16.gmra.mrb[92].mxu0 %vm591_vm0, %v3863_v59 }
 0xf2a   : > { %6939 = vmatpush3.bf16.msra.mxu0 %v7205_v30 }
 0xf2b   : > { %6940 = vmatprep.subr.bf16.mxu0 %v7206_v26 }
 0xf2e   : > { %6941 = vmatpush3.bf16.msra.mxu0 %v7206_v26 }
 0xf88   : > { %v3730_v2 = vpop.xlane.xlu1 %3729 }
 0xf89   : > { %v3760_v1 = vmul.f32 0.03125, %v3730_v2 }
 0xf8a   : > { %v3733_v62 = vpop.xlane.xlu0 %3732 }
 0xf8b   : > { %v3776_v42 = vadd.f32 1e-05, %v3760_v1  ;;  %v3761_v52 = vmul.f32 0.03125, %v3733_v62 }
 0xf8c   : > { %v3736_v44 = vpop.xlane.xlu1 %3735 }
 0xf8d   : > { %7485 = vrsqrt.f32 %v3776_v42  ;;  %v3777_v61 = vadd.f32 1e-05, %v3761_v52  ;;  %v3762_v4 = vmul.f32 0.03125, %v3736_v44 }
 0xf8e   : > { %v3739_v18 = vpop.xlane.xlu0 %3738 }
 0xf8f   : > { %7487 = vrsqrt.f32 %v3777_v61  ;;  %v3778_v57 = vadd.f32 1e-05, %v3762_v4  ;;  %v3763_v34 = vmul.f32 0.03125, %v3739_v18 }
 0xf90   : > { %v3742_v16 = vpop.xlane.xlu1 %3741 }
 0xf91   : > { %7489 = vrsqrt.f32 %v3778_v57  ;;  %v3779_v20 = vadd.f32 1e-05, %v3763_v34  ;;  %v3764_v8 = vmul.f32 0.03125, %v3742_v16  ;;  %v6299_v16 = vld [vmem:[#allocation8] ss:$0 sm:$0xff] }
 0xf92   : > { %v3745_v17 = vpop.xlane.xlu0 %3744 }
 0xf93   : > { %7491 = vrsqrt.f32 %v3779_v20  ;;  %v3780_v49 = vadd.f32 1e-05, %v3764_v8  ;;  %v3765_v63 = vmul.f32 0.03125, %v3745_v17 }
 0xf94   : > { %v3748_v41 = vpop.xlane.xlu1 %3747 }
 0xf95   : > { %7493 = vrsqrt.f32 %v3780_v49  ;;  %v3781_v6 = vadd.f32 1e-05, %v3765_v63  ;;  %v3766_v43 = vmul.f32 0.03125, %v3748_v41 }
 0xf96   : > { %v3751_v48 = vpop.xlane.xlu0 %3750 }
 0xf97   : > { %v7486_v15 = vpop.eup %7485  ;;  %7495 = vrsqrt.f32 %v3781_v6  ;;  %v3782_v3 = vadd.f32 1e-05, %v3766_v43  ;;  %v3767_v24 = vmul.f32 0.03125, %v3751_v48 }
 0xf98   : > { %v3808_v37 = vmul.f32 %v7486_v15, %v9464_v55 }
 0xf99   : > { %v7488_v7 = vpop.eup %7487  ;;  %7497 = vrsqrt.f32 %v3782_v3  ;;  %v3783_v33 = vadd.f32 1e-05, %v3767_v24 }
 0xf9a   : > { %v3809_v9 = vmul.f32 %v7488_v7, %v9467_v54  ;;  %v3828_v19 = vmul.f32 %v9516_v50, %v3808_v37 }
 0xf9b   : > { %v7490_v36 = vpop.eup %7489  ;;  %7499 = vrsqrt.f32 %v3783_v33 }
 0xf9c   : > { %v3810_v12 = vmul.f32 %v7490_v36, %v9472_v60  ;;  %v3829_v21 = vmul.f32 %v9516_v50, %v3809_v9  ;;  %v9596_v0 = vadd.f32 %v9525_v11, %v3828_v19 }
 0xf9d   : > { %v7492_v39 = vpop.eup %7491 }
 0xf9e   : > { %v3811_v45 = vmul.f32 %v7492_v39, %v9478_v25  ;;  %v9599_v55 = vadd.f32 %v9525_v11, %v3829_v21  ;;  %v3830_v51 = vmul.f32 %v9516_v50, %v3810_v12 }
 0xf9f   : > { %v7494_v54 = vpop.eup %7493 }
 0xfa0   : > { %v3812_v59 = vmul.f32 %v7494_v54, %v9484_v29  ;;  %v3864_v13 = vpack.c.bf16 %v9599_v55, %v9596_v0  ;;  %v3831_v60 = vmul.f32 %v9516_v50, %v3811_v45  ;;  %v9609_v25 = vadd.f32 %v9525_v11, %v3830_v51 }
 0xfa1   : > { %v7496_v46 = vpop.eup %7495 }
 0xfa2   : > { %v3813_v30 = vmul.f32 %v7496_v46, %v9490_v38  ;;  %6926 = vmatprep.mubr.msk.bf16.mxu0 %vm591_vm0, %v3864_v13  ;;  %v9612_v26 = vadd.f32 %v9525_v11, %v3831_v60  ;;  %v3832_v2 = vmul.f32 %v9516_v50, %v3812_v59 }
 0xfa3   : > { %v7498_v1 = vpop.eup %7497 }
 0xfa4   : > { %v3814_v29 = vmul.f32 %v7498_v1, %v9496_v56  ;;  %v3865_v62 = vpack.c.bf16 %v9612_v26, %v9609_v25  ;;  %v3833_v42 = vmul.f32 %v9516_v50, %v3813_v30  ;;  %v9622_v44 = vadd.f32 %v9525_v11, %v3832_v2 }
 0xfa5   : > { %v7500_v52 = vpop.eup %7499 }
 0xfa6   : > { %v3815_v38 = vmul.f32 %v7500_v52, %v9502_v5  ;;  %6927 = vmatmul.mubr.msk.bf16.gmra.mrb[96].mxu0 %vm591_vm0, %v3865_v62  ;;  %v9625_v61 = vadd.f32 %v9525_v11, %v3833_v42  ;;  %v3834_v4 = vmul.f32 %v9516_v50, %v3814_v29 }
 0xfa8   : > { %v3866_v56 = vpack.c.bf16 %v9625_v61, %v9622_v44  ;;  %v3835_v18 = vmul.f32 %v9516_v50, %v3815_v38  ;;  %v9633_v57 = vadd.f32 %v9525_v11, %v3834_v4 }
 0xfaa   : > { %6930 = vmatprep.mubr.msk.bf16.mxu0 %vm591_vm0, %v3866_v56  ;;  %v9636_v5 = vadd.f32 %v9525_v11, %v3835_v18 }
 0xfac   : > { %v3867_v34 = vpack.c.bf16 %v9636_v5, %v9633_v57 }
 0xfae   : > { %6931 = vmatmul.mubr.msk.bf16.gmra.mrb[100].mxu0 %vm591_vm0, %v3867_v34 }
 0xff4   : > { %v6920_v20 = vpop.f32.mrb[88].mxu0 }
 0xff5   : > { %v3953_v8 = vadd.f32 %v6920_v20, %v6299_v16  ;;  %v3944_v17 = vpop.f32.mrb[89].mxu0 }
 0xff6   : > { %v3945_v49 = vadd.f32 %v6299_v16, %v3944_v17  ;;  %v6921_v63 = vpop.f32.mrb[90].mxu0 }
 0xff7   : > { %v3956_v50 = vadd.f32 %v6921_v63, %v6299_v16  ;;  %v3947_v41 = vpop.f32.mrb[91].mxu0  ;;  %v4009_v43 = vmax.f32 %v3953_v8, 0.0 }
 0xff8   : > { %v3948_v6 = vadd.f32 %v6299_v16, %v3947_v41  ;;  %v4007_v15 = vmax.f32 %v3945_v49, 0.0 }
 0xff9   : > { %v4010_v48 = vmax.f32 %v3956_v50, 0.0 }
 0xffa   : > { %v4008_v3 = vmax.f32 %v3948_v6, 0.0 }
 0xffb   : > { %v4032_v11 = vpack.c.bf16 %v4010_v48, %v4009_v43 }
 0xffc   : > { %v4031_v24 = vpack.c.bf16 %v4008_v3, %v4007_v15  ;;  %v6924_v37 = vpop.f32.mrb[92].mxu0 }
 0xffd   : > { %v3969_v7 = vadd.f32 %v6924_v37, %v6299_v16  ;;  %v3960_v33 = vpop.f32.mrb[93].mxu0  ;;  %v4041_v37 = vsub.s32 3, %v9305_v27 }
 0xffe   : > { %v3961_v9 = vadd.f32 %v6299_v16, %v3960_v33  ;;  %v6925_v19 = vpop.f32.mrb[94].mxu0  ;;  %6942 = vmatprep.mubr.msk.bf16.mxu0 %vm924_vm2, %v4031_v24 }
 0xfff   : > { %v3972_v36 = vadd.f32 %v6925_v19, %v6299_v16  ;;  %v3963_v12 = vpop.f32.mrb[95].mxu0  ;;  %6943 = vmatmul.mubr.msk.bf16.vlgmr.msra.gmra.mrb[104].mxu0 %vm924_vm2, %v4032_v11  ;;  %v4013_v39 = vmax.f32 %v3969_v7, 0.0  ;;  %v9651_v7 = vrot.slane %v9313_v35, %v4041_v37 }
0x1000   : > { %v3964_v21 = vadd.f32 %v6299_v16, %v3963_v12  ;;  %v4011_v51 = vmax.f32 %v3961_v9, 0.0 }
0x1001   : > { %v4014_v45 = vmax.f32 %v3972_v36, 0.0 }
0x1002   : > { %v4012_v54 = vmax.f32 %v3964_v21, 0.0 }
0x1003   : > { %v4034_v59 = vpack.c.bf16 %v4014_v45, %v4013_v39 }
0x1004   : > { %v4033_v13 = vpack.c.bf16 %v4012_v54, %v4011_v51 }
0x1006   : > { %6946 = vmatprep.mubr.msk.bf16.mxu0 %vm924_vm2, %v4033_v13 }
0x1007   : > { %6947 = vmatmul.mubr.msk.bf16.gmra.mrb[108].mxu0 %vm924_vm2, %v4034_v59 }
0x1079   : > { %v6928_v60 = vpop.f32.mrb[96].mxu0 }
0x107a   : > { %v3985_v46 = vadd.f32 %v6928_v60, %v6299_v16  ;;  %v3976_v30 = vpop.f32.mrb[97].mxu0 }
0x107b   : > { %v3977_v2 = vadd.f32 %v6299_v16, %v3976_v30  ;;  %v6929_v1 = vpop.f32.mrb[98].mxu0 }
0x107c   : > { %v3988_v29 = vadd.f32 %v6929_v1, %v6299_v16  ;;  %v3979_v62 = vpop.f32.mrb[99].mxu0  ;;  %v4017_v52 = vmax.f32 %v3985_v46, 0.0 }
0x107d   : > { %v3980_v42 = vadd.f32 %v6299_v16, %v3979_v62  ;;  %v4015_v4 = vmax.f32 %v3977_v2, 0.0 }
0x107e   : > { %v4018_v38 = vmax.f32 %v3988_v29, 0.0 }
0x107f   : > { %v4016_v56 = vmax.f32 %v3980_v42, 0.0 }
0x1080   : > { %v4036_v18 = vpack.c.bf16 %v4018_v38, %v4017_v52 }
0x1081   : > { %v4035_v34 = vpack.c.bf16 %v4016_v56, %v4015_v4  ;;  %v6932_v20 = vpop.f32.mrb[100].mxu0 }
0x1082   : > { %v4001_v8 = vadd.f32 %v6932_v20, %v6299_v16  ;;  %v3992_v17 = vpop.f32.mrb[101].mxu0 }
0x1083   : > { %v3993_v49 = vadd.f32 %v6299_v16, %v3992_v17  ;;  %v6933_v63 = vpop.f32.mrb[102].mxu0  ;;  %6950 = vmatprep.mubr.msk.bf16.mxu0 %vm924_vm2, %v4035_v34 }
0x1084   : > { %v4004_v50 = vadd.f32 %v6933_v63, %v6299_v16  ;;  %v3995_v41 = vpop.f32.mrb[103].mxu0  ;;  %6951 = vmatmul.mubr.msk.bf16.gmra.mrb[112].mxu0 %vm924_vm2, %v4036_v18  ;;  %v4021_v43 = vmax.f32 %v4001_v8, 0.0 }
0x1085   : > { %v3996_v6 = vadd.f32 %v6299_v16, %v3995_v41  ;;  %v4019_v15 = vmax.f32 %v3993_v49, 0.0 }
0x1086   : > { %v4022_v48 = vmax.f32 %v4004_v50, 0.0 }
0x1087   : > { %v4020_v3 = vmax.f32 %v3996_v6, 0.0 }
0x1088   : > { %v4038_v11 = vpack.c.bf16 %v4022_v48, %v4021_v43 }
0x1089   : > { %v4037_v24 = vpack.c.bf16 %v4020_v3, %v4019_v15 }
0x108b   : > { %6954 = vmatprep.mubr.msk.bf16.mxu0 %vm924_vm2, %v4037_v24 }
0x108c   : > { %6955 = vmatmul.mubr.msk.bf16.gmra.mrb[116].mxu0 %vm924_vm2, %v4038_v11 }
0x10d2   : > { %v6944_v33 = vpop.f32.mrb[104].mxu0 }
0x10d3   : > { %v4125_v9 = vpop.f32.mrb[105].mxu0  ;;  %v4134_v19 = vadd.f32 %v6944_v33, %v9651_v7 }
0x10d4   : > { %v4126_v16 = vadd.f32 %v4125_v9, %v9651_v7  ;;  %v6945_v36 = vpop.f32.mrb[106].mxu0 }
0x10d5   : > { %v4128_v12 = vpop.f32.mrb[107].mxu0  ;;  %v4137_v39 = vadd.f32 %v6945_v36, %v9651_v7  ;;  %v9661_v51 = vadd.f32 %v4134_v19, %v9543_v22 }
0x10d6   : > { %v9656_v21 = vadd.f32 %v4126_v16, %v9533_v32  ;;  %v4129_v45 = vadd.f32 %v4128_v12, %v9651_v7 }
0x10d7   : > { %v9669_v59 = vadd.f32 %v4137_v39, %v9546_v40 }
0x10d8   : > { %v9664_v35 = vadd.f32 %v4129_v45, %v9536_v58  ;;  %v4204_v54 = vsel %vm591_vm0, %v9656_v21, 0.0  ;;  %v4210_v58 = vsel %vm591_vm0, %v9661_v51, 0.0 }
0x10d9   : > { %4205 = vadd.xlane.f32.xlu1 %v4204_v54  ;;  %v4213_v62 = vsel %vm591_vm0, %v9669_v59, 0.0 }
0x10da   : > { %v6948_v13 = vpop.f32.mrb[108].mxu0  ;;  %v4207_v32 = vsel %vm591_vm0, %v9664_v35, 0.0 }
0x10db   : > { %v4141_v60 = vpop.f32.mrb[109].mxu0  ;;  %4208 = vadd.xlane.f32.xlu0 %v4207_v32  ;;  %v4150_v46 = vadd.f32 %v6948_v13, %v9651_v7 }
0x10dc   : > { %v4142_v22 = vadd.f32 %v4141_v60, %v9651_v7  ;;  %v6949_v30 = vpop.f32.mrb[110].mxu0 }
0x10dd   : > { %v4144_v2 = vpop.f32.mrb[111].mxu0  ;;  %4211 = vadd.xlane.f32.xlu1 %v4210_v58  ;;  %v4153_v40 = vadd.f32 %v6949_v30, %v9651_v7  ;;  %v9685_v42 = vadd.f32 %v4150_v46, %v9569_v28 }
0x10de   : > { %v9678_v1 = vadd.f32 %v4142_v22, %v9558_v31  ;;  %v4145_v29 = vadd.f32 %v4144_v2, %v9651_v7 }
0x10df   : > { %4214 = vadd.xlane.f32.xlu0 %v4213_v62  ;;  %v9693_v31 = vadd.f32 %v4153_v40, %v9572_v23  ;;  %v4222_v56 = vsel %vm591_vm0, %v9685_v42, 0.0 }
0x10e0   : > { %v9688_v52 = vadd.f32 %v4145_v29, %v9561_v14  ;;  %v4216_v38 = vsel %vm591_vm0, %v9678_v1, 0.0 }
0x10e1   : > { %4217 = vadd.xlane.f32.xlu1 %v4216_v38  ;;  %v4225_v28 = vsel %vm591_vm0, %v9693_v31, 0.0 }
0x10e2   : > { %v4219_v4 = vsel %vm591_vm0, %v9688_v52, 0.0 }
0x10e3   : > { %4220 = vadd.xlane.f32.xlu0 %v4219_v4 }
0x10e5   : > { %4223 = vadd.xlane.f32.xlu1 %v4222_v56 }
0x10e7   : > { %4226 = vadd.xlane.f32.xlu0 %v4225_v28 }
0x1157   : > { %v6952_v14 = vpop.f32.mrb[112].mxu0 }
0x1158   : > { %v4157_v18 = vpop.f32.mrb[113].mxu0  ;;  %v4166_v34 = vadd.f32 %v6952_v14, %v9651_v7 }
0x1159   : > { %v4158_v20 = vadd.f32 %v4157_v18, %v9651_v7  ;;  %v6953_v23 = vpop.f32.mrb[114].mxu0 }
0x115a   : > { %v4160_v8 = vpop.f32.mrb[115].mxu0  ;;  %v4169_v49 = vadd.f32 %v6953_v23, %v9651_v7  ;;  %v9709_v50 = vadd.f32 %v4166_v34, %v9609_v25 }
0x115b   : > { %v9704_v17 = vadd.f32 %v4158_v20, %v9596_v0  ;;  %v4161_v63 = vadd.f32 %v4160_v8, %v9651_v7 }
0x115c   : > { %v9717_v43 = vadd.f32 %v4169_v49, %v9612_v26 }
0x115d   : > { %v9712_v41 = vadd.f32 %v4161_v63, %v9599_v55  ;;  %v4228_v6 = vsel %vm591_vm0, %v9704_v17, 0.0  ;;  %v4234_v55 = vsel %vm591_vm0, %v9709_v50, 0.0 }
0x115e   : > { %4229 = vadd.xlane.f32.xlu1 %v4228_v6  ;;  %v4237_v9 = vsel %vm591_vm0, %v9717_v43, 0.0 }
0x115f   : > { %v6956_v48 = vpop.f32.mrb[116].mxu0  ;;  %v4231_v0 = vsel %vm591_vm0, %v9712_v41, 0.0 }
0x1160   : > { %4232 = vadd.xlane.f32.xlu0 %v4231_v0  ;;  %v4173_v15 = vpop.f32.mrb[117].mxu0  ;;  %v4182_v3 = vadd.f32 %v6956_v48, %v9651_v7 }
0x1161   : > { %v4174_v25 = vadd.f32 %v4173_v15, %v9651_v7  ;;  %v6957_v11 = vpop.f32.mrb[118].mxu0 }
0x1162   : > { %4235 = vadd.xlane.f32.xlu1 %v4234_v55  ;;  %v4176_v24 = vpop.f32.mrb[119].mxu0  ;;  %v4185_v26 = vadd.f32 %v6957_v11, %v9651_v7  ;;  %v9733_v19 = vadd.f32 %v4182_v3, %v9633_v57 }
0x1163   : > { %v9726_v37 = vadd.f32 %v4174_v25, %v9622_v44  ;;  %v4177_v33 = vadd.f32 %v4176_v24, %v9651_v7  ;;  %v7208_v25 = vld [vmem:[%s10628_s20 + $0x8] sm:$0xff]  }
0x1164   : > { %4238 = vadd.xlane.f32.xlu0 %v4237_v9  ;;  %v9741_v44 = vadd.f32 %v4185_v26, %v9636_v5 }
0x1165   : > { %v9736_v16 = vadd.f32 %v4177_v33, %v9625_v61  ;;  %v4240_v36 = vsel %vm591_vm0, %v9726_v37, 0.0  ;;  %v4246_v61 = vsel %vm591_vm0, %v9733_v19, 0.0 }
0x1166   : > { %v4206_v12 = vpop.xlane.xlu1 %4205  ;;  %4241 = vadd.xlane.f32.xlu1 %v4240_v36  ;;  %v4249_v60 = vsel %vm591_vm0, %v9741_v44, 0.0 }
0x1167   : > { %v4252_v39 = vmul.f32 0.03125, %v4206_v12  ;;  %v4243_v7 = vsel %vm591_vm0, %v9736_v16, 0.0 }
0x1168   : > { %v4209_v45 = vpop.xlane.xlu0 %4208  ;;  %4244 = vadd.xlane.f32.xlu0 %v4243_v7 }
0x1169   : > { %v9746_v57 = vsub.f32 %v9656_v21, %v4252_v39  ;;  %v4253_v54 = vmul.f32 0.03125, %v4209_v45 }
0x116a   : > { %v4212_v13 = vpop.xlane.xlu1 %4211  ;;  %4247 = vadd.xlane.f32.xlu1 %v4246_v61 }
0x116b   : > { %v9751_v32 = vsub.f32 %v9664_v35, %v4253_v54  ;;  %v4254_v5 = vmul.f32 0.03125, %v4212_v13  ;;  %v4284_v46 = vmul.f32 %v9746_v57, %v9746_v57 }
0x116c   : > { %v4215_v22 = vpop.xlane.xlu0 %4214  ;;  %4250 = vadd.xlane.f32.xlu0 %v4249_v60 }
0x116d   : > { %v9758_v21 = vsub.f32 %v9661_v51, %v4254_v5  ;;  %v4255_v30 = vmul.f32 0.03125, %v4215_v22  ;;  %v4300_v58 = vsel %vm591_vm0, %v4284_v46, 0.0  ;;  %v4285_v2 = vmul.f32 %v9751_v32, %v9751_v32 }
0x116e   : > { %v4218_v35 = vpop.xlane.xlu1 %4217  ;;  %4301 = vadd.xlane.f32.xlu1 %v4300_v58 }
0x116f   : > { %v9764_v40 = vsub.f32 %v9669_v59, %v4255_v30  ;;  %v4256_v29 = vmul.f32 0.03125, %v4218_v35  ;;  %v4303_v62 = vsel %vm591_vm0, %v4285_v2, 0.0  ;;  %v4286_v38 = vmul.f32 %v9758_v21, %v9758_v21 }
0x1170   : > { %v4221_v4 = vpop.xlane.xlu0 %4220  ;;  %4304 = vadd.xlane.f32.xlu0 %v4303_v62 }
0x1171   : > { %v9770_v51 = vsub.f32 %v9678_v1, %v4256_v29  ;;  %v4257_v56 = vmul.f32 0.03125, %v4221_v4  ;;  %v4306_v28 = vsel %vm591_vm0, %v4286_v38, 0.0  ;;  %v4287_v14 = vmul.f32 %v9764_v40, %v9764_v40 }
0x1172   : > { %v4224_v18 = vpop.xlane.xlu1 %4223  ;;  %4307 = vadd.xlane.f32.xlu1 %v4306_v28 }
0x1173   : > { %v9776_v59 = vsub.f32 %v9688_v52, %v4257_v56  ;;  %v4258_v34 = vmul.f32 0.03125, %v4224_v18  ;;  %v4309_v20 = vsel %vm591_vm0, %v4287_v14, 0.0  ;;  %v4288_v23 = vmul.f32 %v9770_v51, %v9770_v51 }
0x1174   : > { %v4227_v8 = vpop.xlane.xlu0 %4226  ;;  %4310 = vadd.xlane.f32.xlu0 %v4309_v20 }
0x1175   : > { %v9782_v1 = vsub.f32 %v9685_v42, %v4258_v34  ;;  %v4259_v49 = vmul.f32 0.03125, %v4227_v8  ;;  %v4312_v63 = vsel %vm591_vm0, %v4288_v23, 0.0  ;;  %v4289_v6 = vmul.f32 %v9776_v59, %v9776_v59 }
0x1176   : > { %4313 = vadd.xlane.f32.xlu1 %v4312_v63 }
0x1177   : > { %v9788_v52 = vsub.f32 %v9693_v31, %v4259_v49  ;;  %v4315_v48 = vsel %vm591_vm0, %v4289_v6, 0.0  ;;  %v4290_v0 = vmul.f32 %v9782_v1, %v9782_v1  ;;  %v7207_v31 = vld [vmem:[%s10628_s20] sm:$0xff]  }
0x1178   : > { %4316 = vadd.xlane.f32.xlu0 %v4315_v48  ;;  %6958 = vmatprep.subr.bf16.mxu1 %v7207_v31 }
0x1179   : > { %v4318_v15 = vsel %vm591_vm0, %v4290_v0, 0.0  ;;  %v4291_v42 = vmul.f32 %v9788_v52, %v9788_v52  ;;  %6959 = vmatpush3.bf16.msra.mxu1 %v7207_v31 }
0x117a   : > { %4319 = vadd.xlane.f32.xlu1 %v4318_v15  ;;  %6960 = vmatprep.subr.bf16.mxu1 %v7208_v25 }
0x117b   : > { %v4321_v3 = vsel %vm591_vm0, %v4291_v42, 0.0 }
0x117c   : > { %4322 = vadd.xlane.f32.xlu0 %v4321_v3 }
0x117d   : > { %6961 = vmatpush3.bf16.msra.mxu1 %v7208_v25 }
0x11eb   : > { %v4230_v11 = vpop.xlane.xlu1 %4229 }
0x11ec   : > { %v4260_v55 = vmul.f32 0.03125, %v4230_v11 }
0x11ed   : > { %v4233_v24 = vpop.xlane.xlu0 %4232 }
0x11ee   : > { %v9804_v26 = vsub.f32 %v9704_v17, %v4260_v55  ;;  %v4261_v33 = vmul.f32 0.03125, %v4233_v24  ;;  %v4414_v24 = vsub.s32 4, %v9305_v27 }
0x11ef   : > { %v4236_v9 = vpop.xlane.xlu1 %4235 }
0x11f0   : > { %v9807_v36 = vsub.f32 %v9712_v41, %v4261_v33  ;;  %v4262_v12 = vmul.f32 0.03125, %v4236_v9  ;;  %v4292_v39 = vmul.f32 %v9804_v26, %v9804_v26 }
0x11f1   : > { %v4239_v7 = vpop.xlane.xlu0 %4238 }
0x11f2   : > { %v9812_v45 = vsub.f32 %v9709_v50, %v4262_v12  ;;  %v4263_v54 = vmul.f32 0.03125, %v4239_v7  ;;  %v4324_v61 = vsel %vm591_vm0, %v4292_v39, 0.0  ;;  %v4293_v17 = vmul.f32 %v9807_v36, %v9807_v36 }
0x11f3   : > { %4325 = vadd.xlane.f32.xlu1 %v4324_v61  ;;  %v4242_v13 = vpop.xlane.xlu1 %4241  ;;  %v4434_v39 = vsub.s32 5, %v9305_v27 }
0x11f4   : > { %v9818_v5 = vsub.f32 %v9717_v43, %v4263_v54  ;;  %v4264_v41 = vmul.f32 0.03125, %v4242_v13  ;;  %v4327_v60 = vsel %vm591_vm0, %v4293_v17, 0.0  ;;  %v4294_v46 = vmul.f32 %v9812_v45, %v9812_v45  ;;  %v7549_v17 = vld [vmem:[%s10574_s6] sm:$0x3f] }
0x11f5   : > { %4328 = vadd.xlane.f32.xlu0 %v4327_v60  ;;  %v4245_v50 = vpop.xlane.xlu0 %4244  ;;  %v9856_v13 = vrot.slane %v7549_v17, %v4414_v24 }
0x11f6   : > { %v9824_v22 = vsub.f32 %v9726_v37, %v4264_v41  ;;  %v4265_v30 = vmul.f32 0.03125, %v4245_v50  ;;  %v4330_v58 = vsel %vm591_vm0, %v4294_v46, 0.0  ;;  %v4295_v2 = vmul.f32 %v9818_v5, %v9818_v5 }
0x11f7   : > { %4331 = vadd.xlane.f32.xlu1 %v4330_v58  ;;  %v4248_v43 = vpop.xlane.xlu1 %4247  ;;  %v9859_v58 = vrot.slane %v7549_v17, %v4434_v39  ;;  %v7554_v39 = vld [vmem:[%s8211_s5 + $0x20] sm:$0xff] }
0x11f8   : > { %v9830_v35 = vsub.f32 %v9736_v16, %v4265_v30  ;;  %v4266_v29 = vmul.f32 0.03125, %v4248_v43  ;;  %v4333_v62 = vsel %vm591_vm0, %v4295_v2, 0.0  ;;  %v4296_v38 = vmul.f32 %v9824_v22, %v9824_v22 }
0x11f9   : > { %4334 = vadd.xlane.f32.xlu0 %v4333_v62  ;;  %v4251_v37 = vpop.xlane.xlu0 %4250 }
0x11fa   : > { %v9836_v4 = vsub.f32 %v9733_v19, %v4266_v29  ;;  %v4267_v56 = vmul.f32 0.03125, %v4251_v37  ;;  %v4336_v28 = vsel %vm591_vm0, %v4296_v38, 0.0  ;;  %v4297_v14 = vmul.f32 %v9830_v35, %v9830_v35 }
0x11fb   : > { %4337 = vadd.xlane.f32.xlu1 %v4336_v28  ;;  %v4302_v16 = vpop.xlane.xlu1 %4301 }
0x11fc   : > { %v9842_v18 = vsub.f32 %v9741_v44, %v4267_v56  ;;  %v4348_v34 = vmul.f32 0.03125, %v4302_v16  ;;  %v4339_v20 = vsel %vm591_vm0, %v4297_v14, 0.0  ;;  %v4298_v23 = vmul.f32 %v9836_v4, %v9836_v4 }
0x11fd   : > { %4340 = vadd.xlane.f32.xlu0 %v4339_v20  ;;  %v4305_v19 = vpop.xlane.xlu0 %4304  ;;  %v7550_v20 = vld [vmem:[%s8211_s5] sm:$0xff] }
0x11fe   : > { %v4364_v8 = vadd.f32 1e-05, %v4348_v34  ;;  %v4349_v49 = vmul.f32 0.03125, %v4305_v19  ;;  %v4342_v63 = vsel %vm591_vm0, %v4298_v23, 0.0  ;;  %v4299_v6 = vmul.f32 %v9842_v18, %v9842_v18 }
0x11ff   : > { %4343 = vadd.xlane.f32.xlu1 %v4342_v63  ;;  %v4308_v48 = vpop.xlane.xlu1 %4307 }
0x1200   : > { %7501 = vrsqrt.f32 %v4364_v8  ;;  %v4365_v44 = vadd.f32 1e-05, %v4349_v49  ;;  %v4350_v0 = vmul.f32 0.03125, %v4308_v48  ;;  %v4345_v15 = vsel %vm591_vm0, %v4299_v6, 0.0  ;;  %v7551_v49 = vld [vmem:[%s8211_s5 + $0x8] sm:$0xff] }
0x1201   : > { %4346 = vadd.xlane.f32.xlu0 %v4345_v15  ;;  %v4311_v42 = vpop.xlane.xlu0 %4310 }
0x1202   : > { %7503 = vrsqrt.f32 %v4365_v44  ;;  %v4366_v3 = vadd.f32 1e-05, %v4350_v0  ;;  %v4351_v31 = vmul.f32 0.03125, %v4311_v42  ;;  %v7552_v42 = vld [vmem:[%s8211_s5 + $0x10] sm:$0xff] }
0x1203   : > { %v4314_v25 = vpop.xlane.xlu1 %4313 }
0x1204   : > { %7505 = vrsqrt.f32 %v4366_v3  ;;  %v4367_v11 = vadd.f32 1e-05, %v4351_v31  ;;  %v4352_v55 = vmul.f32 0.03125, %v4314_v25  ;;  %v7553_v31 = vld [vmem:[%s8211_s5 + $0x18] sm:$0xff] }
0x1205   : > { %v4317_v33 = vpop.xlane.xlu0 %4316 }
0x1206   : > { %7507 = vrsqrt.f32 %v4367_v11  ;;  %v4368_v9 = vadd.f32 1e-05, %v4352_v55  ;;  %v4353_v12 = vmul.f32 0.03125, %v4317_v33 }
0x1207   : > { %v4320_v7 = vpop.xlane.xlu1 %4319 }
0x1208   : > { %7509 = vrsqrt.f32 %v4368_v9  ;;  %v4369_v54 = vadd.f32 1e-05, %v4353_v12  ;;  %v4354_v61 = vmul.f32 0.03125, %v4320_v7  ;;  %v7555_v7 = vld [vmem:[%s8211_s5 + $0x28] sm:$0xff] }
0x1209   : > { %v4323_v41 = vpop.xlane.xlu0 %4322 }
0x120a   : > { %v7502_v60 = vpop.eup %7501  ;;  %7511 = vrsqrt.f32 %v4369_v54  ;;  %v4370_v46 = vadd.f32 1e-05, %v4354_v61  ;;  %v4355_v50 = vmul.f32 0.03125, %v4323_v41 }
0x120b   : > { %v4396_v30 = vmul.f32 %v7502_v60, %v9746_v57 }
0x120c   : > { %v7504_v2 = vpop.eup %7503  ;;  %7513 = vrsqrt.f32 %v4370_v46  ;;  %v4371_v43 = vadd.f32 1e-05, %v4355_v50  ;;  %v7557_v50 = vld [vmem:[%s8211_s5 + $0x38] sm:$0xff] }
0x120d   : > { %v4397_v29 = vmul.f32 %v7504_v2, %v9751_v32  ;;  %v4416_v62 = vmul.f32 %v9856_v13, %v4396_v30 }
0x120e   : > { %v7506_v38 = vpop.eup %7505  ;;  %7515 = vrsqrt.f32 %v4371_v43 }
0x120f   : > { %v4398_v37 = vmul.f32 %v7506_v38, %v9758_v21  ;;  %v4417_v56 = vmul.f32 %v9856_v13, %v4397_v29  ;;  %v4436_v28 = vadd.f32 %v9859_v58, %v4416_v62 }
0x1210   : > { %v7508_v57 = vpop.eup %7507 }
0x1211   : > { %v4418_v14 = vmul.f32 %v9856_v13, %v4398_v37  ;;  %v4399_v16 = vmul.f32 %v7508_v57, %v9764_v40  ;;  %v4437_v34 = vadd.f32 %v9859_v58, %v4417_v56  ;;  %v4452_v23 = vadd.f32 %v7550_v20, %v4436_v28 }
0x1212   : > { %v7510_v32 = vpop.eup %7509 }
0x1213   : > { %v4438_v19 = vadd.f32 %v9859_v58, %v4418_v14  ;;  %v4419_v21 = vmul.f32 %v9856_v13, %v4399_v16  ;;  %v4400_v8 = vmul.f32 %v7510_v32, %v9770_v51  ;;  %v4453_v63 = vadd.f32 %v7551_v49, %v4437_v34 }
0x1214   : > { %v7512_v6 = vpop.eup %7511 }
0x1215   : > { %v4439_v48 = vadd.f32 %v9859_v58, %v4419_v21  ;;  %v4401_v40 = vmul.f32 %v7512_v6, %v9776_v59  ;;  %v4478_v44 = vpack.c.bf16 %v4453_v63, %v4452_v23  ;;  %v4420_v15 = vmul.f32 %v9856_v13, %v4400_v8 }
0x1216   : > { %v7514_v0 = vpop.eup %7513  ;;  %v4454_v3 = vadd.f32 %v7552_v42, %v4438_v19 }
0x1217   : > { %v4455_v25 = vadd.f32 %v7553_v31, %v4439_v48  ;;  %v4402_v11 = vmul.f32 %v7514_v0, %v9782_v1  ;;  %6962 = vmatprep.mubr.msk.bf16.mxu1 %vm591_vm0, %v4478_v44  ;;  %v4421_v51 = vmul.f32 %v9856_v13, %v4401_v40  ;;  %v4440_v59 = vadd.f32 %v9859_v58, %v4420_v15 }
0x1218   : > { %v7516_v55 = vpop.eup %7515 }
0x1219   : > { %v4403_v24 = vmul.f32 %v7516_v55, %v9788_v52  ;;  %v4479_v33 = vpack.c.bf16 %v4455_v25, %v4454_v3  ;;  %v4441_v9 = vadd.f32 %v9859_v58, %v4421_v51  ;;  %v4422_v12 = vmul.f32 %v9856_v13, %v4402_v11  ;;  %v7556_v52 = vld [vmem:[%s8211_s5 + $0x30] sm:$0xff] }
0x121a   : > { %v4456_v1 = vadd.f32 %v7554_v39, %v4440_v59 }
0x121b   : > { %6963 = vmatmul.mubr.msk.bf16.vlgmr.msra.gmra.mrb[72].mxu1 %vm591_vm0, %v4479_v33  ;;  %v4457_v54 = vadd.f32 %v7555_v7, %v4441_v9  ;;  %v4423_v61 = vmul.f32 %v9856_v13, %v4403_v24  ;;  %v4442_v17 = vadd.f32 %v9859_v58, %v4422_v12  ;;  %v7559_v7 = vld [vmem:[%s8211_s5 + $0x48] sm:$0xff] }
0x121d   : > { %v4480_v41 = vpack.c.bf16 %v4457_v54, %v4456_v1  ;;  %v4443_v60 = vadd.f32 %v9859_v58, %v4423_v61  ;;  %v4458_v46 = vadd.f32 %v7556_v52, %v4442_v17 }
0x121f   : > { %6966 = vmatprep.mubr.msk.bf16.mxu1 %vm591_vm0, %v4480_v41  ;;  %v4459_v30 = vadd.f32 %v7557_v50, %v4443_v60 }
0x1221   : > { %v4481_v2 = vpack.c.bf16 %v4459_v30, %v4458_v46 }
0x1223   : > { %6967 = vmatmul.mubr.msk.bf16.gmra.mrb[76].mxu1 %vm591_vm0, %v4481_v2  ;;  %v7561_v2 = vld [vmem:[%s8211_s5 + $0x58] sm:$0xff] }
0x1280   : > { %v4326_v43 = vpop.xlane.xlu1 %4325 }
0x1281   : > { %v4356_v29 = vmul.f32 0.03125, %v4326_v43 }
0x1282   : > { %v4329_v62 = vpop.xlane.xlu0 %4328 }
0x1283   : > { %v4372_v38 = vadd.f32 1e-05, %v4356_v29  ;;  %v4357_v37 = vmul.f32 0.03125, %v4329_v62 }
0x1284   : > { %v4332_v56 = vpop.xlane.xlu1 %4331 }
0x1285   : > { %7517 = vrsqrt.f32 %v4372_v38  ;;  %v4373_v28 = vadd.f32 1e-05, %v4357_v37  ;;  %v4358_v57 = vmul.f32 0.03125, %v4332_v56 }
0x1286   : > { %v4335_v14 = vpop.xlane.xlu0 %4334 }
0x1287   : > { %7519 = vrsqrt.f32 %v4373_v28  ;;  %v4374_v16 = vadd.f32 1e-05, %v4358_v57  ;;  %v4359_v34 = vmul.f32 0.03125, %v4335_v14  ;;  %v7562_v28 = vld [vmem:[%s8211_s5 + $0x60] sm:$0xff]  ;;  %v7563_v14 = vld [vmem:[%s8211_s5 + $0x68] sm:$0xff] }
0x1288   : > { %v4338_v32 = vpop.xlane.xlu1 %4337 }
0x1289   : > { %7521 = vrsqrt.f32 %v4374_v16  ;;  %v4375_v20 = vadd.f32 1e-05, %v4359_v34  ;;  %v4360_v23 = vmul.f32 0.03125, %v4338_v32 }
0x128a   : > { %v4341_v19 = vpop.xlane.xlu0 %4340 }
0x128b   : > { %7523 = vrsqrt.f32 %v4375_v20  ;;  %v4376_v21 = vadd.f32 1e-05, %v4360_v23  ;;  %v4361_v8 = vmul.f32 0.03125, %v4341_v19 }
0x128c   : > { %v4344_v49 = vpop.xlane.xlu1 %4343 }
0x128d   : > { %7525 = vrsqrt.f32 %v4376_v21  ;;  %v4377_v63 = vadd.f32 1e-05, %v4361_v8  ;;  %v4362_v6 = vmul.f32 0.03125, %v4344_v49  ;;  %v7565_v21 = vld [vmem:[%s8211_s5 + $0x78] sm:$0xff] }
0x128e   : > { %v4347_v48 = vpop.xlane.xlu0 %4346 }
0x128f   : > { %v7518_v40 = vpop.eup %7517  ;;  %7527 = vrsqrt.f32 %v4377_v63  ;;  %v4378_v44 = vadd.f32 1e-05, %v4362_v6  ;;  %v4363_v0 = vmul.f32 0.03125, %v4347_v48  ;;  %v7866_v63 = vmov 1983009808  }
0x1290   : > { %v4404_v15 = vmul.f32 %v7518_v40, %v9804_v26  ;;  %v4709_v6 = vunpack.c.l.s4 %v7866_v63  ;;  %v9932_v48 = vld [vmem:[#allocation11] ss:$0 sm:$0xff]  ;;  %v9934_v40 = vld [vmem:[#allocation11 + $0x1] ss:$0 sm:$0xff] }
0x1291   : > { %v7520_v42 = vpop.eup %7519  ;;  %7529 = vrsqrt.f32 %v4378_v44  ;;  %v4379_v3 = vadd.f32 1e-05, %v4363_v0  ;;  %v4979_v44 = vld [vmem:[#allocation10] sm:$0x7] }
0x1292   : > { %v4405_v31 = vmul.f32 %v7520_v42, %v9807_v36  ;;  %v4424_v25 = vmul.f32 %v9856_v13, %v4404_v15  ;;  %v7558_v36 = vld [vmem:[%s8211_s5 + $0x40] sm:$0xff] }
0x1293   : > { %v7522_v11 = vpop.eup %7521  ;;  %7531 = vrsqrt.f32 %v4379_v3 }
0x1294   : > { %v4406_v51 = vmul.f32 %v7522_v11, %v9812_v45  ;;  %v4425_v55 = vmul.f32 %v9856_v13, %v4405_v31  ;;  %v4444_v59 = vadd.f32 %v9859_v58, %v4424_v25  ;;  %v9940_v25 = vrot.slane %v4979_v44, %v9308_v47 }
0x1295   : > { %v7524_v24 = vpop.eup %7523  ;;  %v9943_v11 = vrot.slane %v4979_v44, %v9512_v53 }
0x1296   : > { %v4407_v26 = vmul.f32 %v7524_v24, %v9818_v5  ;;  %v4445_v33 = vadd.f32 %v9859_v58, %v4425_v55  ;;  %v4426_v9 = vmul.f32 %v9856_v13, %v4406_v51  ;;  %v4460_v39 = vadd.f32 %v7558_v36, %v4444_v59 }
0x1297   : > { %v7526_v12 = vpop.eup %7525  ;;  %v5117_v36 = vmul.f32 0.0, %v9940_v25 }
0x1298   : > { %v4408_v1 = vmul.f32 %v7526_v12, %v9824_v22  ;;  %v4461_v45 = vadd.f32 %v7559_v7, %v4445_v33  ;;  %v4427_v54 = vmul.f32 %v9856_v13, %v4407_v26  ;;  %v4446_v61 = vadd.f32 %v9859_v58, %v4426_v9  ;;  %v7560_v22 = vld [vmem:[%s8211_s5 + $0x50] sm:$0xff] }
0x1299   : > { %v7528_v17 = vpop.eup %7527 }
0x129a   : > { %v4409_v5 = vmul.f32 %v7528_v17, %v9830_v35  ;;  %v4482_v41 = vpack.c.bf16 %v4461_v45, %v4460_v39  ;;  %v4447_v60 = vadd.f32 %v9859_v58, %v4427_v54  ;;  %v4428_v46 = vmul.f32 %v9856_v13, %v4408_v1  ;;  %v4980_v17 = vld [vmem:[#allocation10 + $0x4] sm:$0x7] }
0x129b   : > { %v7530_v52 = vpop.eup %7529  ;;  %v4462_v30 = vadd.f32 %v7560_v22, %v4446_v61  ;;  %v5249_v39 = vmul.f32 0.0, %v9943_v11  ;;  %v9954_v1 = vrot.slane %v4979_v44, %v9519_v10 }
0x129c   : > { %v4410_v50 = vmul.f32 %v7530_v52, %v9836_v4  ;;  %6970 = vmatprep.mubr.msk.bf16.mxu1 %vm591_vm0, %v4482_v41  ;;  %v4463_v43 = vadd.f32 %v7561_v2, %v4447_v60  ;;  %v4429_v29 = vmul.f32 %v9856_v13, %v4409_v5  ;;  %v4448_v35 = vadd.f32 %v9859_v58, %v4428_v46 }
0x129d   : > { %v7532_v62 = vpop.eup %7531  ;;  %v5315_v22 = vmul.f32 0.0, %v9954_v1 }
0x129e   : > { %v4411_v38 = vmul.f32 %v7532_v62, %v9842_v18  ;;  %v4483_v37 = vpack.c.bf16 %v4463_v43, %v4462_v30  ;;  %v4449_v56 = vadd.f32 %v9859_v58, %v4429_v29  ;;  %v4430_v4 = vmul.f32 %v9856_v13, %v4410_v50  ;;  %v7564_v18 = vld [vmem:[%s8211_s5 + $0x70] sm:$0xff]  ;;  %v4981_v62 = vld [vmem:[#allocation10 + $0x8] sm:$0x7]  ;;  %s538_s5 = scalar_lea.vmem [#allocation14], %s6188_s29  ;;  %s7867_s29 = smov [#allocation14]  }
0x129f   : > { %v4464_v57 = vadd.f32 %v7562_v28, %v4448_v35  ;;  %v5256_v50 = vadd.f32 %v5249_v39, %v5117_v36  ;;  %v10005_v63 = vrot.slane %v4981_v62, %v9519_v10  ;;  %s6037_s21 = sshll.u32 %s538_s5, 4  ;;  %s7768_s0 = sshll.u32 %s7867_s29, 4  ;;  %s10519_s21 = int_to_ptr.vmem [resolvable:$true] %s6037_s21  ;;  %s7769_s0 = int_to_ptr.vmem [resolvable:$false] %s7768_s0 }
0x12a0   : > { %6971 = vmatmul.mubr.msk.bf16.gmra.mrb[80].mxu1 %vm591_vm0, %v4483_v37  ;;  %v4465_v16 = vadd.f32 %v7563_v14, %v4449_v56  ;;  %v4431_v34 = vmul.f32 %v9856_v13, %v4411_v38  ;;  %v4450_v32 = vadd.f32 %v9859_v58, %v4430_v4  ;;  %v9973_v38 = vrot.slane %v4980_v17, %v9308_v47  ;;  %s7764_s22 = scalar_lea.vmem %s10519_s21, 512  ;;  %s7770_s1 = scalar_lea.vmem %s7769_s0, 1024 }
0x12a1   : > { %v9976_v37 = vrot.slane %v4980_v17, %v9512_v53  ;;  %p7765_p6 = scmp.ne.s32.totalorder %s10519_s21, %s7764_s22  ;;  %p7771_p13 = scmp.lt.s32.totalorder %s10519_s21, %s7769_s0 }
0x12a2   : > { %v4484_v20 = vpack.c.bf16 %v4465_v16, %v4464_v57  ;;  %v4451_v23 = vadd.f32 %v9859_v58, %v4431_v34  ;;  %v4466_v19 = vadd.f32 %v7564_v18, %v4450_v32  ;;  %v4710_v58 = vunpack.c.0.s8 %v4709_v6  ;;  %p7772_p0 = scmp.lt.s32.totalorder %s7770_s1, %s7764_s22 }
0x12a3   : > { %v9985_v16 = vrot.slane %v4980_v17, %v9519_v10  ;;  %v9987_v34 = vadd.f32 %v5315_v22, %v5256_v50  ;;  %v9990_v32 = vrot.slane %v4981_v62, %v9308_v47  ;;  %p7766_p4 = pnand %p7765_p6, %p10631_p9 }
0x12a4   : > { %6974 = vmatprep.mubr.msk.bf16.mxu1 %vm591_vm0, %v4484_v20  ;;  %v4467_v8 = vadd.f32 %v7565_v21, %v4451_v23  ;;  %v9948_v26 = vsub.s32 %v4710_v58, %v9305_v27  ;;  %p7773_p2 = por %p7772_p0, %p7771_p13 }
0x12a5   : > { %p7767_p1 = pneg %p7766_p4 }
0x12a6   : > { %v4485_v49 = vpack.c.bf16 %v4467_v8, %v4466_v19  ;;  %v9994_v19 = vrot.slane %v4981_v62, %v9512_v53 }
0x12a7   : > { %p7774_p8 = pnand %p7773_p2, %p7767_p1 }
0x12a8   : > { %6975 = vmatmul.mubr.msk.bf16.gmra.mrb[84].mxu1 %vm591_vm0, %v4485_v49 }
0x12ee   : > { %v6964_v13 = vpop.f32.mrb[72].mxu1 }
0x12ef   : > { %v4625_v0 = vmul.f32 %v6964_v13, %v9932_v48  ;;  %v4556_v15 = vpop.f32.mrb[73].mxu1 }
0x12f0   : > { %v4623_v42 = vmul.f32 %v9932_v48, %v4556_v15  ;;  %v6965_v3 = vpop.f32.mrb[74].mxu1 }
0x12f1   : > { %v4645_v31 = vadd.f32 %v9934_v40, %v4625_v0  ;;  %v4559_v51 = vpop.f32.mrb[75].mxu1  ;;  %v4626_v59 = vmul.f32 %v6965_v3, %v9932_v48 }
0x12f2   : > { %v4643_v55 = vadd.f32 %v9934_v40, %v4623_v42  ;;  %v4624_v9 = vmul.f32 %v9932_v48, %v4559_v51 }
0x12f3   : > { %v4661_v24 = vmax.f32 %v4645_v31, 0.0  ;;  %v4646_v45 = vadd.f32 %v9934_v40, %v4626_v59 }
0x12f4   : > { %v4659_v33 = vmax.f32 %v4643_v55, 0.0  ;;  %v4644_v60 = vadd.f32 %v9934_v40, %v4624_v9 }
0x12f5   : > { %v4677_v12 = vmin.f32 %v4661_v24, 6.0  ;;  %v4662_v29 = vmax.f32 %v4646_v45, 0.0 }
0x12f6   : > { %v4675_v7 = vmin.f32 %v4659_v33, 6.0  ;;  %v6968_v54 = vpop.f32.mrb[76].mxu1  ;;  %v4660_v57 = vmax.f32 %v4644_v60, 0.0 }
0x12f7   : > { %v9958_v61 = vrot.slane %v4677_v12, %v9948_v26  ;;  %v4572_v27 = vpop.f32.mrb[77].mxu1  ;;  %v4741_v46 = vcombine.high %v4677_v12, %v4677_v12  ;;  %v4678_v18 = vmin.f32 %v4662_v29, 6.0  ;;  %v10002_v49 = vmul.f32 %v6968_v54, %v9932_v48 }
0x12f8   : > { %v4707_v5 = vcombine.high %v4675_v7, %v4675_v7  ;;  %v4714_v41 = vrot.slane %v4675_v7, %v9948_v26  ;;  %v9962_v52 = vpop.f32.mrb[78].mxu1  ;;  %v4676_v0 = vmin.f32 %v4660_v57, 6.0 }
0x12f9   : > { %v9965_v30 = vpop.f32.mrb[79].mxu1  ;;  %v9970_v35 = vcombine.high %v9958_v61, %v9958_v61  ;;  %v9982_v14 = vrot.slane %v4741_v46, %v9948_v26  ;;  %v10009_v6 = vrot.slane %v9958_v61, %v9512_v53  ;;  %v4758_v55 = vcombine.high %v4678_v18, %v4678_v18 }
0x12fa   : > { %v4721_v2 = vrot.slane %v4707_v5, %v9948_v26  ;;  %v4722_v43 = vcombine.high %v4714_v41, %v4714_v41  ;;  %v5332_v56 = vrot.slane %v4714_v41, %v9512_v53  ;;  %v5484_v44 = vrot.slane %v4714_v41, %v9308_v47 }
0x12fb   : > { %v9998_v21 = vrot.slane %v9970_v35, %v9512_v53  ;;  %v10015_v58 = vrot.slane %v9982_v14, %v9512_v53  ;;  %v4765_v9 = vrot.slane %v4678_v18, %v9948_v26  ;;  %v4772_v39 = vrot.slane %v4758_v55, %v9948_v26 }
0x12fc   : > { %v5336_v4 = vrot.slane %v4722_v43, %v9512_v53  ;;  %v5340_v28 = vrot.slane %v4721_v2, %v9512_v53  ;;  %v4723_v20 = vcombine.high %v4721_v2, %v4721_v2  ;;  %v5488_v42 = vrot.slane %v4722_v43, %v9308_v47 }
0x12fd   : > { %v5492_v10 = vrot.slane %v4721_v2, %v9308_v47  ;;  %v5427_v59 = vsel %vm5078_vm4, %v9998_v21, %v10009_v6  ;;  %v4724_v7 = vcombine.high %v4676_v0, %v4676_v0  ;;  %v5504_v45 = vrot.slane %v9970_v35, %v9308_v47 }
0x12fe   : > { %v5425_v23 = vsel %vm5078_vm4, %v5336_v4, %v5332_v56  ;;  %v5496_v3 = vrot.slane %v4723_v20, %v9308_v47  ;;  %v5664_v31 = vrot.slane %v4723_v20, %v9512_v53  ;;  %v5693_v51 = vsel %vm5220_vm7, %v5336_v4, %v5332_v56 }
0x12ff   : > { %v5426_v8 = vsel %vm5080_vm5, %v5340_v28, %v5425_v23  ;;  %v5609_v24 = vsel %vm5220_vm7, %v5488_v42, %v5484_v44  ;;  %v5694_v33 = vsel %vm5078_vm4, %v5340_v28, %v5693_v51  ;;  %v4773_v17 = vcombine.high %v4765_v9, %v4765_v9 }
0x1300   : > { %v5449_v13 = vsel %vm5104_vm6, 0.0, %v5426_v8  ;;  %v5610_v36 = vsel %vm5078_vm4, %v5492_v10, %v5609_v24  ;;  %v4627_v5 = vmul.f32 %v9932_v48, %v4572_v27  ;;  %v5428_v41 = vsel %vm5080_vm5, %v10015_v58, %v5427_v59 }
0x1301   : > { %v5461_v15 = vmul.f32 %v9973_v38, %v5449_v13  ;;  %v5611_v54 = vsel %vm5080_vm5, %v5496_v3, %v5610_v36  ;;  %v5695_v46 = vsel %vm5080_vm5, %v5664_v31, %v5694_v33  ;;  %v4997_v50 = vrot.slane %v4765_v9, %v9512_v53 }
0x1302   : > { %v5641_v60 = vmul.f32 %v5611_v54, %v9976_v37  ;;  %v10041_v22 = vcombine.high %v4772_v39, %v4772_v39  ;;  %v5001_v2 = vrot.slane %v4773_v17, %v9512_v53  ;;  %v5147_v43 = vrot.slane %v4773_v17, %v9308_v47 }
0x1303   : > { %v5469_v12 = vadd.f32 %v5461_v15, %v9987_v34  ;;  %v4731_v29 = vrot.slane %v4676_v0, %v9948_v26  ;;  %v5005_v27 = vrot.slane %v4772_v39, %v9512_v53  ;;  %v5143_v35 = vrot.slane %v4765_v9, %v9308_v47 }
0x1304   : > { %v4738_v56 = vrot.slane %v4724_v7, %v9948_v26  ;;  %v5500_v4 = vrot.slane %v9958_v61, %v9308_v47  ;;  %v5082_v28 = vsel %vm5078_vm4, %v5001_v2, %v4997_v50  ;;  %v5151_v57 = vrot.slane %v4772_v39, %v9308_v47 }
0x1305   : > { %v5649_v62 = vadd.f32 %v5641_v60, %v5469_v12  ;;  %v4739_v20 = vcombine.high %v4731_v29, %v4731_v29  ;;  %v10055_v23 = vcombine.high %v9982_v14, %v9982_v14  ;;  %v5508_v18 = vrot.slane %v9982_v14, %v9308_v47 }
0x1306   : > { %v5725_v8 = vmul.f32 %v5695_v46, %v9985_v16  ;;  %v5224_v13 = vsel %vm5220_vm7, %v5147_v43, %v5143_v35  ;;  %v5450_v44 = vsel %vm5104_vm6, 0.0, %v5428_v41  ;;  %v5612_v61 = vsel %vm5220_vm7, %v5504_v45, %v5500_v4 }
0x1307   : > { %v5290_v0 = vsel %vm5220_vm7, %v5001_v2, %v4997_v50  ;;  %v4740_v15 = vcombine.high %v4738_v56, %v4738_v56  ;;  %v5083_v10 = vsel %vm5080_vm5, %v5005_v27, %v5082_v28  ;;  %v5155_v3 = vrot.slane %v10041_v22, %v9308_v47 }
0x1308   : > { %v5733_v42 = vadd.f32 %v5725_v8, %v5649_v62  ;;  %v5270_v14 = vrot.slane %v10041_v22, %v9512_v53  ;;  %v5225_v31 = vsel %vm5078_vm4, %v5151_v57, %v5224_v13  ;;  %v4985_v51 = vrot.slane %v4731_v29, %v9512_v53 }
0x1309   : > { %v4989_v55 = vrot.slane %v4739_v20, %v9512_v53  ;;  %v4993_v59 = vrot.slane %v4738_v56, %v9512_v53  ;;  %v5291_v24 = vsel %vm5078_vm4, %v5005_v27, %v5290_v0  ;;  %v5127_v33 = vrot.slane %v4731_v29, %v9308_v47 }
0x130a   : > { %v5131_v9 = vrot.slane %v4739_v20, %v9308_v47  ;;  %v5135_v12 = vrot.slane %v4738_v56, %v9308_v47  ;;  %v5139_v39 = vrot.slane %v4740_v15, %v9308_v47  ;;  %v5266_v7 = vrot.slane %v4740_v15, %v9512_v53 }
0x130b   : > { %v5079_v36 = vsel %vm5078_vm4, %v4989_v55, %v4985_v51  ;;  %v5287_v45 = vsel %vm5220_vm7, %v4989_v55, %v4985_v51  ;;  %v10082_v54 = vsel %vm5104_vm6, 0.0, %v5083_v10  ;;  %v10088_v46 = vsel %vm5080_vm5, %v5155_v3, %v5225_v31 }
0x130c   : > { %v5081_v17 = vsel %vm5080_vm5, %v4993_v59, %v5079_v36  ;;  %v5221_v41 = vsel %vm5220_vm7, %v5131_v9, %v5127_v33  ;;  %v5288_v60 = vsel %vm5078_vm4, %v4993_v59, %v5287_v45  ;;  %v4649_v2 = vadd.f32 %v9934_v40, %v10002_v49 }
0x130d   : > { %v5105_v50 = vsel %vm5104_vm6, 0.0, %v5081_v17  ;;  %v5222_v22 = vsel %vm5078_vm4, %v5135_v12, %v5221_v41  ;;  %v5289_v62 = vsel %vm5080_vm5, %v5266_v7, %v5288_v60  ;;  %v5119_v35 = vmul.f32 %v9940_v25, %v10082_v54 }
0x130e   : > { %v5118_v43 = vmul.f32 %v9940_v25, %v5105_v50  ;;  %v5223_v29 = vsel %vm5080_vm5, %v5139_v39, %v5222_v22  ;;  %v5745_v27 = vmul.f32 %v9990_v32, %v5105_v50  ;;  %v4665_v4 = vmax.f32 %v4649_v2, 0.0 }
0x130f   : > { %v5250_v56 = vmul.f32 %v9943_v11, %v5223_v29  ;;  %v4647_v28 = vadd.f32 %v9934_v40, %v4627_v5  ;;  %v5251_v57 = vmul.f32 %v9943_v11, %v10088_v46  ;;  %v5805_v49 = vmul.f32 %v9994_v19, %v5223_v29 }
0x1310   : > { %v4630_v20 = vmul.f32 %v9962_v52, %v9932_v48  ;;  %v5753_v8 = vadd.f32 %v5745_v27, %v5733_v42  ;;  %v5316_v0 = vmul.f32 %v9954_v1, %v5289_v62  ;;  %v4681_v15 = vmin.f32 %v4665_v4, 6.0 }
0x1311   : > { %v5257_v13 = vadd.f32 %v5250_v56, %v5118_v43  ;;  %v4663_v10 = vmax.f32 %v4647_v28, 0.0  ;;  %v5462_v3 = vmul.f32 %v9973_v38, %v5450_v44  ;;  %v4628_v31 = vmul.f32 %v9932_v48, %v9965_v30 }
0x1312   : > { %v5813_v5 = vadd.f32 %v5805_v49, %v5753_v8  ;;  %v5841_v51 = vmul.f32 %v10005_v63, %v5289_v62  ;;  %v4816_v59 = vrot.slane %v4681_v15, %v9948_v26  ;;  %v4650_v52 = vadd.f32 %v9934_v40, %v4630_v20 }
0x1313   : > { %v5323_v55 = vadd.f32 %v5316_v0, %v5257_v13  ;;  %v4679_v33 = vmin.f32 %v4663_v10, 6.0  ;;  %v5512_v42 = vrot.slane %v10055_v23, %v9308_v47  ;;  %v10117_v9 = vsel %vm5080_vm5, %v5270_v14, %v5291_v24 }
0x1314   : > { %v4809_v12 = vcombine.high %v4681_v15, %v4681_v15  ;;  %v10119_v44 = vadd.f32 %v5841_v51, %v5813_v5  ;;  %v5613_v30 = vsel %vm5078_vm4, %v5508_v18, %v5612_v61  ;;  %v5258_v36 = vadd.f32 %v5251_v57, %v5119_v35 }
0x1315   : > { %v10122_v39 = vadd.f32 %v5462_v3, %v5323_v55  ;;  %v4824_v7 = vcombine.high %v4816_v59, %v4816_v59  ;;  %v5696_v45 = vsel %vm5220_vm7, %v9998_v21, %v10009_v6  ;;  %v4775_v17 = vcombine.high %v4679_v33, %v4679_v33 }
0x1316   : > { %v4782_v41 = vrot.slane %v4679_v33, %v9948_v26  ;;  %v4648_v60 = vadd.f32 %v9934_v40, %v4628_v31  ;;  %v5317_v14 = vmul.f32 %v9954_v1, %v10117_v9  ;;  %v4666_v24 = vmax.f32 %v4650_v52, 0.0 }
0x1317   : > { %v5668_v18 = vrot.slane %v10055_v23, %v9512_v53  ;;  %v4823_v61 = vrot.slane %v4809_v12, %v9948_v26  ;;  %v4789_v50 = vrot.slane %v4775_v17, %v9948_v26  ;;  %v5614_v2 = vsel %vm5080_vm5, %v5512_v42, %v5613_v30 }
0x1318   : > { %v4790_v22 = vcombine.high %v4782_v41, %v4782_v41  ;;  %v5697_v21 = vsel %vm5078_vm4, %v10015_v58, %v5696_v45  ;;  %v5324_v6 = vadd.f32 %v5317_v14, %v5258_v36  ;;  %v5372_v43 = vrot.slane %v4824_v7, %v9512_v53 }
0x1319   : > { %v5368_v29 = vrot.slane %v4816_v59, %v9512_v53  ;;  %v5532_v62 = vrot.slane %v4816_v59, %v9308_v47  ;;  %v4791_v27 = vcombine.high %v4789_v50, %v4789_v50  ;;  %v4664_v35 = vmax.f32 %v4648_v60, 0.0 }
0x131a   : > { %v5536_v23 = vrot.slane %v4824_v7, %v9308_v47  ;;  %v5356_v56 = vrot.slane %v4782_v41, %v9512_v53  ;;  %v5360_v4 = vrot.slane %v4790_v22, %v9512_v53  ;;  %v4682_v28 = vmin.f32 %v4666_v24, 6.0 }
0x131b   : > { %v10144_v57 = vcombine.high %v4823_v61, %v4823_v61  ;;  %v5376_v58 = vrot.slane %v4823_v61, %v9512_v53  ;;  %v5540_v49 = vrot.slane %v4823_v61, %v9308_v47  ;;  %v5364_v20 = vrot.slane %v4789_v50, %v9512_v53 }
0x131c   : > { %v5431_v8 = vsel %vm5078_vm4, %v5372_v43, %v5368_v29  ;;  %v5429_v13 = vsel %vm5078_vm4, %v5360_v4, %v5356_v56  ;;  %v5516_v0 = vrot.slane %v4782_v41, %v9308_v47  ;;  %v5520_v15 = vrot.slane %v4790_v22, %v9308_v47 }
0x131d   : > { %v5430_v10 = vsel %vm5080_vm5, %v5364_v20, %v5429_v13  ;;  %v5524_v3 = vrot.slane %v4789_v50, %v9308_v47  ;;  %v5528_v31 = vrot.slane %v4791_v27, %v9308_v47  ;;  %v5672_v5 = vrot.slane %v4791_v27, %v9512_v53 }
0x131e   : > { %v5618_v51 = vsel %vm5220_vm7, %v5536_v23, %v5532_v62  ;;  %v5451_v55 = vsel %vm5104_vm6, 0.0, %v5430_v10  ;;  %v5615_v59 = vsel %vm5220_vm7, %v5520_v15, %v5516_v0  ;;  %v5699_v33 = vsel %vm5220_vm7, %v5360_v4, %v5356_v56 }
0x131f   : > { %v5463_v52 = vmul.f32 %v9973_v38, %v5451_v55  ;;  %v5616_v42 = vsel %vm5078_vm4, %v5524_v3, %v5615_v59  ;;  %v5700_v12 = vsel %vm5078_vm4, %v5364_v20, %v5699_v33  ;;  %v4826_v30 = vcombine.high %v4682_v28, %v4682_v28 }
0x1320   : > { %v5617_v36 = vsel %vm5080_vm5, %v5528_v31, %v5616_v42  ;;  %v5701_v7 = vsel %vm5080_vm5, %v5672_v5, %v5700_v12  ;;  %v4680_v45 = vmin.f32 %v4664_v35, 6.0  ;;  %v5698_v17 = vsel %vm5080_vm5, %v5668_v18, %v5697_v21 }
0x1321   : > { %v5471_v41 = vadd.f32 %v5463_v52, %v5324_v6  ;;  %v5643_v60 = vmul.f32 %v5617_v36, %v9976_v37  ;;  %v5642_v14 = vmul.f32 %v5614_v2, %v9976_v37  ;;  %v5432_v24 = vsel %vm5080_vm5, %v5376_v58, %v5431_v8 }
0x1322   : > { %v5544_v61 = vrot.slane %v10144_v57, %v9308_v47  ;;  %v5619_v50 = vsel %vm5078_vm4, %v5540_v49, %v5618_v51  ;;  %v5727_v62 = vmul.f32 %v5701_v7, %v9985_v16  ;;  %v4833_v27 = vrot.slane %v4682_v28, %v9948_v26 }
0x1323   : > { %v5651_v22 = vadd.f32 %v5643_v60, %v5471_v41  ;;  %v10176_v35 = vrot.slane %v4826_v30, %v9948_v26  ;;  %v5726_v18 = vmul.f32 %v5698_v17, %v9985_v16  ;;  %v5702_v21 = vsel %vm5220_vm7, %v5372_v43, %v5368_v29 }
0x1324   : > { %v4792_v2 = vcombine.high %v4680_v45, %v4680_v45  ;;  %v4799_v6 = vrot.slane %v4680_v45, %v9948_v26  ;;  %v5746_v23 = vmul.f32 %v9990_v32, %v10082_v54  ;;  %v5806_v56 = vmul.f32 %v9994_v19, %v10088_v46  ;;  %v10216_v45 = vld [vmem:[#allocation11 + $0x2] ss:$0 sm:$0xff] }
0x1325   : > { %v5735_v4 = vadd.f32 %v5727_v62, %v5651_v22  ;;  %v5842_v28 = vmul.f32 %v10005_v63, %v10117_v9  ;;  %v5452_v49 = vsel %vm5104_vm6, 0.0, %v5432_v24  ;;  %v5620_v20 = vsel %vm5080_vm5, %v5544_v61, %v5619_v50 }
0x1326   : > { %v5676_v43 = vrot.slane %v10144_v57, %v9512_v53  ;;  %v4806_v29 = vrot.slane %v4792_v2, %v9948_v26  ;;  %v5703_v8 = vsel %vm5078_vm4, %v5376_v58, %v5702_v21  ;;  %v4841_v13 = vcombine.high %v4833_v27, %v4833_v27 }
0x1327   : > { %v10195_v54 = vcombine.high %v10176_v35, %v10176_v35  ;;  %v4807_v46 = vcombine.high %v4799_v6, %v4799_v6  ;;  %v5021_v0 = vrot.slane %v4833_v27, %v9512_v53  ;;  %v5029_v9 = vrot.slane %v10176_v35, %v9512_v53 }
0x1328   : > { %v4808_v15 = vcombine.high %v4806_v29, %v4806_v29  ;;  %v5009_v10 = vrot.slane %v4799_v6, %v9512_v53  ;;  %v5017_v3 = vrot.slane %v4806_v29, %v9512_v53  ;;  %v5159_v58 = vrot.slane %v4799_v6, %v9308_v47 }
0x1329   : > { %v5013_v57 = vrot.slane %v4807_v46, %v9512_v53  ;;  %v5163_v31 = vrot.slane %v4807_v46, %v9308_v47  ;;  %v5167_v5 = vrot.slane %v4806_v29, %v9308_v47  ;;  %v5650_v59 = vadd.f32 %v5642_v14, %v10122_v39 }
0x132a   : > { %v5171_v51 = vrot.slane %v4808_v15, %v9308_v47  ;;  %v5274_v55 = vrot.slane %v4808_v15, %v9512_v53  ;;  %v5025_v33 = vrot.slane %v4841_v13, %v9512_v53  ;;  %v5772_v41 = vrot.slane %v4841_v13, %v9308_v47  ;;  %v10233_v13 = vld [vmem:[#allocation11 + $0x3] ss:$0 sm:$0xff] }
0x132b   : > { %v5084_v52 = vsel %vm5078_vm4, %v5013_v57, %v5009_v10  ;;  %v5227_v42 = vsel %vm5220_vm7, %v5163_v31, %v5159_v58  ;;  %v5293_v12 = vsel %vm5220_vm7, %v5013_v57, %v5009_v10  ;;  %v5734_v17 = vadd.f32 %v5726_v18, %v5650_v59 }
0x132c   : > { %v5085_v30 = vsel %vm5080_vm5, %v5017_v3, %v5084_v52  ;;  %v5228_v36 = vsel %vm5078_vm4, %v5167_v5, %v5227_v42  ;;  %v5294_v7 = vsel %vm5078_vm4, %v5017_v3, %v5293_v12  ;;  %v5768_v24 = vrot.slane %v4833_v27, %v9308_v47 }
0x132d   : > { %v5107_v39 = vsel %vm5104_vm6, 0.0, %v5085_v30  ;;  %v5229_v60 = vsel %vm5080_vm5, %v5171_v51, %v5228_v36  ;;  %v5295_v14 = vsel %vm5080_vm5, %v5274_v55, %v5294_v7  ;;  %v5086_v62 = vsel %vm5078_vm4, %v5025_v33, %v5021_v0 }
0x132e   : > { %v5120_v61 = vmul.f32 %v9940_v25, %v5107_v39  ;;  %v5252_v50 = vmul.f32 %v9943_v11, %v5229_v60  ;;  %v5747_v22 = vmul.f32 %v9990_v32, %v5107_v39  ;;  %v5776_v18 = vrot.slane %v10176_v35, %v9308_v47 }
0x132f   : > { %v5754_v21 = vadd.f32 %v5746_v23, %v5734_v17  ;;  %v5861_v2 = vmul.f32 %v10216_v45, %v10119_v44  ;;  %v5318_v29 = vmul.f32 %v9954_v1, %v5295_v14  ;;  %v5807_v27 = vmul.f32 %v9994_v19, %v5229_v60 }
0x1330   : > { %v5259_v6 = vadd.f32 %v5252_v50, %v5120_v61  ;;  %v5755_v46 = vadd.f32 %v5747_v22, %v5735_v4  ;;  %v5464_v15 = vmul.f32 %v9973_v38, %v5452_v49  ;;  %v5704_v10 = vsel %vm5080_vm5, %v5676_v43, %v5703_v8 }
0x1331   : > { %v5797_v57 = vsel %vm5220_vm7, %v5772_v41, %v5768_v24  ;;  %v5814_v3 = vadd.f32 %v5806_v56, %v5754_v21  ;;  %v5087_v35 = vsel %vm5080_vm5, %v5029_v9, %v5086_v62  ;;  %v5843_v44 = vmul.f32 %v10005_v63, %v5295_v14 }
0x1332   : > { %v5325_v23 = vadd.f32 %v5318_v29, %v5259_v6  ;;  %v5815_v58 = vadd.f32 %v5807_v27, %v5755_v46  ;;  %v5780_v31 = vrot.slane %v10195_v54, %v9308_v47  ;;  %v5833_v5 = vsel %vm5220_vm7, %v5025_v33, %v5021_v0  ;;  %v7210_v6 = vld [vmem:[%s10629_s30 + $0x8] sm:$0xff]  }
0x1333   : > { %v5850_v51 = vadd.f32 %v5842_v28, %v5814_v3  ;;  %v5873_v4 = vadd.f32 %v10233_v13, %v5861_v2  ;;  %v5644_v49 = vmul.f32 %v5620_v20, %v9976_v37  ;;  %v5798_v43 = vsel %vm5078_vm4, %v5776_v18, %v5797_v57  ;;  %v7209_v2 = vld [vmem:[%s10629_s30] sm:$0xff]   ;;  %v7212_v3 = vld [vmem:[%s10629_s30 + $0x18] sm:$0xff]  }
0x1334   : > { %v5472_v8 = vadd.f32 %v5464_v15, %v5325_v23  ;;  %v5851_v56 = vadd.f32 %v5843_v44, %v5815_v58  ;;  %v5108_v55 = vsel %vm5104_vm6, 0.0, %v5087_v35  ;;  %v5828_v59 = vrot.slane %v10195_v54, %v9512_v53  ;;  %6978 = vmatprep.subr.bf16.mxu0 %v7209_v2  ;;  %v7211_v15 = vld [vmem:[%s10629_s30 + $0x10] sm:$0xff]  }
0x1335   : > { %v5862_v52 = vmul.f32 %v10216_v45, %v5850_v51  ;;  %v5728_v42 = vmul.f32 %v5704_v10, %v9985_v16  ;;  %v5834_v0 = vsel %vm5078_vm4, %v5029_v9, %v5833_v5  ;;  %v5799_v33 = vsel %vm5080_vm5, %v5780_v31, %v5798_v43  ;;  %6979 = vmatpush3.bf16.msra.mxu0 %v7209_v2 }
0x1336   : > { %v5652_v28 = vadd.f32 %v5644_v49, %v5472_v8  ;;  %v5881_v12 = vmax.f32 %v5873_v4, 0.0  ;;  %v5748_v30 = vmul.f32 %v9990_v32, %v5108_v55  ;;  %v5835_v7 = vsel %vm5080_vm5, %v5828_v59, %v5834_v0  ;;  %6980 = vmatprep.subr.bf16.mxu0 %v7210_v6 }
0x1337   : > { %v5874_v20 = vadd.f32 %v10233_v13, %v5862_v52  ;;  %v5808_v54 = vmul.f32 %v5799_v33, %v9994_v19  ;;  %v5863_v39 = vmul.f32 %v10216_v45, %v5851_v56  ;;  %v5844_v24 = vmul.f32 %v5835_v7, %v10005_v63 }
0x1338   : > { %v5736_v36 = vadd.f32 %v5728_v42, %v5652_v28  ;;  %v5889_v60 = vmin.f32 %v5881_v12, 6.0 }
0x1339   : > { %v5882_v17 = vmax.f32 %v5874_v20, 0.0  ;;  %v5875_v22 = vadd.f32 %v10233_v13, %v5863_v39  ;;  %6981 = vmatpush3.bf16.msra.mxu0 %v7210_v6 }
0x133a   : > { %v5756_v41 = vadd.f32 %v5748_v30, %v5736_v36  ;;  %6982 = vmatprep.subr.bf16.mxu0 %v7211_v15 }
0x133b   : > { %v5890_v14 = vmin.f32 %v5882_v17, 6.0  ;;  %v5883_v21 = vmax.f32 %v5875_v22, 0.0 }
0x133c   : > { %v5816_v9 = vadd.f32 %v5808_v54, %v5756_v41 }
0x133d   : > { %v5913_v61 = vcombine.low %v5889_v60, %v5890_v14  ;;  %v5891_v27 = vmin.f32 %v5883_v21, 6.0  ;;  %6983 = vmatpush3.bf16.msra.mxu0 %v7211_v15 }
0x133e   : > { %v5852_v50 = vadd.f32 %v5844_v24, %v5816_v9  ;;  %6984 = vmatprep.subr.bf16.mxu0 %v7212_v3 }
0x1340   : > { %v5864_v62 = vmul.f32 %v10216_v45, %v5852_v50 }
0x1341   : > { %6985 = vmatpush3.bf16.msra.mxu0 %v7212_v3 }
0x1342   : > { %v5876_v18 = vadd.f32 %v10233_v13, %v5864_v62 }
0x1344   : > { %v5884_v29 = vmax.f32 %v5876_v18, 0.0 }
0x1346   : > { %v5892_v46 = vmin.f32 %v5884_v29, 6.0 }
0x1348   : > { %v5914_v10 = vcombine.low %v5891_v27, %v5892_v46 }
0x134a   : > { %v5921_v57 = vpack.c.bf16 %v5914_v10, %v5913_v61 }
0x134c   : > { %6986 = vmatprep.mubr.msk.bf16.mxu0 %vm924_vm2, %v5921_v57 }
0x1373   : > { %v6972_v35 = vpop.f32.mrb[80].mxu1 }
0x1374   : > { %v4633_v23 = vmul.f32 %v6972_v35, %v9932_v48  ;;  %v4588_v58 = vpop.f32.mrb[81].mxu1 }
0x1375   : > { %v4631_v44 = vmul.f32 %v9932_v48, %v4588_v58  ;;  %v6973_v31 = vpop.f32.mrb[82].mxu1 }
0x1376   : > { %v4653_v5 = vadd.f32 %v9934_v40, %v4633_v23  ;;  %v4591_v51 = vpop.f32.mrb[83].mxu1  ;;  %v4634_v49 = vmul.f32 %v6973_v31, %v9932_v48 }
0x1377   : > { %v4651_v4 = vadd.f32 %v9934_v40, %v4631_v44  ;;  %v4632_v43 = vmul.f32 %v9932_v48, %v4591_v51 }
0x1378   : > { %v4669_v8 = vmax.f32 %v4653_v5, 0.0  ;;  %v4654_v52 = vadd.f32 %v9934_v40, %v4634_v49 }
0x1379   : > { %v4667_v56 = vmax.f32 %v4651_v4, 0.0  ;;  %v4652_v42 = vadd.f32 %v9934_v40, %v4632_v43 }
0x137a   : > { %v4685_v55 = vmin.f32 %v4669_v8, 6.0  ;;  %v4670_v41 = vmax.f32 %v4654_v52, 0.0 }
0x137b   : > { %v4683_v59 = vmin.f32 %v4667_v56, 6.0  ;;  %v6976_v0 = vpop.f32.mrb[84].mxu1  ;;  %v4668_v39 = vmax.f32 %v4652_v42, 0.0 }
0x137c   : > { %v4884_v28 = vrot.slane %v4685_v55, %v9948_v26  ;;  %v4604_v33 = vpop.f32.mrb[85].mxu1  ;;  %v4877_v20 = vcombine.high %v4685_v55, %v4685_v55  ;;  %v4686_v62 = vmin.f32 %v4670_v41, 6.0 }
0x137d   : > { %v4843_v12 = vcombine.high %v4683_v59, %v4683_v59  ;;  %v4850_v30 = vrot.slane %v4683_v59, %v9948_v26  ;;  %v10285_v36 = vpop.f32.mrb[86].mxu1  ;;  %v4684_v18 = vmin.f32 %v4668_v39, 6.0 }
0x137e   : > { %v10287_v7 = vpop.f32.mrb[87].mxu1  ;;  %v4892_v60 = vcombine.high %v4884_v28, %v4884_v28  ;;  %v4891_v14 = vrot.slane %v4877_v20, %v9948_v26  ;;  %v5392_v21 = vrot.slane %v4884_v28, %v9512_v53  ;;  %v5564_v46 = vrot.slane %v4884_v28, %v9308_v47 }
0x137f   : > { %v4857_v17 = vrot.slane %v4843_v12, %v9948_v26  ;;  %v4858_v54 = vcombine.high %v4850_v30, %v4850_v30  ;;  %v5380_v9 = vrot.slane %v4850_v30, %v9512_v53  ;;  %v5548_v10 = vrot.slane %v4850_v30, %v9308_v47 }
0x1380   : > { %v5396_v2 = vrot.slane %v4892_v60, %v9512_v53  ;;  %v5568_v6 = vrot.slane %v4892_v60, %v9308_v47  ;;  %v10299_v27 = vcombine.high %v4891_v14, %v4891_v14  ;;  %v5400_v57 = vrot.slane %v4891_v14, %v9512_v53 }
0x1381   : > { %v5384_v24 = vrot.slane %v4858_v54, %v9512_v53  ;;  %v5388_v61 = vrot.slane %v4857_v17, %v9512_v53  ;;  %v4859_v50 = vcombine.high %v4857_v17, %v4857_v17  ;;  %v5552_v35 = vrot.slane %v4858_v54, %v9308_v47 }
0x1382   : > { %v5556_v23 = vrot.slane %v4857_v17, %v9308_v47  ;;  %v5572_v58 = vrot.slane %v4891_v14, %v9308_v47  ;;  %v4894_v5 = vcombine.high %v4686_v62, %v4686_v62  ;;  %v5435_v51 = vsel %vm5078_vm4, %v5396_v2, %v5392_v21 }
0x1383   : > { %v5433_v22 = vsel %vm5078_vm4, %v5384_v24, %v5380_v9  ;;  %v5560_v44 = vrot.slane %v4859_v50, %v9308_v47  ;;  %v5705_v31 = vsel %vm5220_vm7, %v5384_v24, %v5380_v9  ;;  %v5624_v4 = vsel %vm5220_vm7, %v5568_v6, %v5564_v46 }
0x1384   : > { %v5434_v29 = vsel %vm5080_vm5, %v5388_v61, %v5433_v22  ;;  %v5621_v49 = vsel %vm5220_vm7, %v5552_v35, %v5548_v10  ;;  %v4901_v43 = vrot.slane %v4686_v62, %v9948_v26  ;;  %v5680_v56 = vrot.slane %v4859_v50, %v9512_v53 }
0x1385   : > { %v5453_v15 = vsel %vm5104_vm6, 0.0, %v5434_v29  ;;  %v5622_v8 = vsel %vm5078_vm4, %v5556_v23, %v5621_v49  ;;  %v4908_v55 = vrot.slane %v4894_v5, %v9948_v26  ;;  %v4860_v59 = vcombine.high %v4684_v18, %v4684_v18 }
0x1386   : > { %v5465_v3 = vmul.f32 %v9973_v38, %v5453_v15  ;;  %v5623_v42 = vsel %vm5080_vm5, %v5560_v44, %v5622_v8  ;;  %v5706_v28 = vsel %vm5078_vm4, %v5388_v61, %v5705_v31  ;;  %v4909_v20 = vcombine.high %v4901_v43, %v4901_v43 }
0x1387   : > { %v5436_v12 = vsel %vm5080_vm5, %v5400_v57, %v5435_v51  ;;  %v5576_v30 = vrot.slane %v10299_v27, %v9308_v47  ;;  %v4637_v17 = vmul.f32 %v6976_v0, %v9932_v48  ;;  %v4635_v54 = vmul.f32 %v9932_v48, %v4604_v33 }
0x1388   : > { %v5473_v52 = vadd.f32 %v5465_v3, %v9987_v34  ;;  %v5625_v41 = vsel %vm5078_vm4, %v5572_v58, %v5624_v4  ;;  %v5645_v39 = vmul.f32 %v5623_v42, %v9976_v37  ;;  %v5049_v34 = vrot.slane %v4909_v20, %v9512_v53 }
0x1389   : > { %v4867_v60 = vrot.slane %v4684_v18, %v9948_v26  ;;  %v5707_v14 = vsel %vm5080_vm5, %v5680_v56, %v5706_v28  ;;  %v10331_v9 = vcombine.high %v4908_v55, %v4908_v55  ;;  %v5195_v24 = vrot.slane %v4909_v20, %v9308_v47 }
0x138a   : > { %v4874_v61 = vrot.slane %v4860_v59, %v9948_v26  ;;  %v5708_v0 = vsel %vm5220_vm7, %v5396_v2, %v5392_v21  ;;  %v5653_v50 = vadd.f32 %v5645_v39, %v5473_v52  ;;  %v5045_v33 = vrot.slane %v4901_v43, %v9512_v53 }
0x138b   : > { %v4875_v22 = vcombine.high %v4867_v60, %v4867_v60  ;;  %v5454_v62 = vsel %vm5104_vm6, 0.0, %v5436_v12  ;;  %v5684_v6 = vrot.slane %v10299_v27, %v9512_v53  ;;  %v5053_v18 = vrot.slane %v4908_v55, %v9512_v53 }
0x138c   : > { %v5191_v29 = vrot.slane %v4901_v43, %v9308_v47  ;;  %v5626_v46 = vsel %vm5080_vm5, %v5576_v30, %v5625_v41  ;;  %v5729_v15 = vmul.f32 %v5707_v14, %v9985_v16  ;;  %v5090_v10 = vsel %vm5078_vm4, %v5049_v34, %v5045_v33 }
0x138d   : > { %v4876_v21 = vcombine.high %v4874_v61, %v4874_v61  ;;  %v5709_v2 = vsel %vm5078_vm4, %v5400_v57, %v5708_v0  ;;  %v5199_v3 = vrot.slane %v4908_v55, %v9308_v47  ;;  %v5203_v35 = vrot.slane %v10331_v9, %v9308_v47 }
0x138e   : > { %v5233_v27 = vsel %vm5220_vm7, %v5195_v24, %v5191_v29  ;;  %v5737_v23 = vadd.f32 %v5729_v15, %v5653_v50  ;;  %v5299_v58 = vsel %vm5220_vm7, %v5049_v34, %v5045_v33  ;;  %v5033_v44 = vrot.slane %v4867_v60, %v9512_v53 }
0x138f   : > { %v5037_v31 = vrot.slane %v4875_v22, %v9512_v53  ;;  %v5091_v5 = vsel %vm5080_vm5, %v5053_v18, %v5090_v10  ;;  %v5041_v51 = vrot.slane %v4874_v61, %v9512_v53  ;;  %v5175_v57 = vrot.slane %v4867_v60, %v9308_v47 }
0x1390   : > { %v5179_v4 = vrot.slane %v4875_v22, %v9308_v47  ;;  %v5183_v43 = vrot.slane %v4874_v61, %v9308_v47  ;;  %v5187_v8 = vrot.slane %v4876_v21, %v9308_v47  ;;  %v5278_v56 = vrot.slane %v4876_v21, %v9512_v53 }
0x1391   : > { %v5088_v49 = vsel %vm5078_vm4, %v5037_v31, %v5033_v44  ;;  %v5234_v55 = vsel %vm5078_vm4, %v5199_v3, %v5233_v27  ;;  %v5296_v42 = vsel %vm5220_vm7, %v5037_v31, %v5033_v44  ;;  %v4657_v30 = vadd.f32 %v9934_v40, %v4637_v17 }
0x1392   : > { %v5089_v59 = vsel %vm5080_vm5, %v5041_v51, %v5088_v49  ;;  %v5230_v52 = vsel %vm5220_vm7, %v5179_v4, %v5175_v57  ;;  %v5297_v12 = vsel %vm5078_vm4, %v5041_v51, %v5296_v42  ;;  %v5466_v14 = vmul.f32 %v9973_v38, %v5454_v62 }
0x1393   : > { %v5109_v28 = vsel %vm5104_vm6, 0.0, %v5089_v59  ;;  %v5231_v20 = vsel %vm5078_vm4, %v5183_v43, %v5230_v52  ;;  %v5298_v34 = vsel %vm5080_vm5, %v5278_v56, %v5297_v12  ;;  %v5110_v24 = vsel %vm5104_vm6, 0.0, %v5091_v5 }
0x1394   : > { %v5121_v41 = vmul.f32 %v9940_v25, %v5109_v28  ;;  %v5232_v39 = vsel %vm5080_vm5, %v5187_v8, %v5231_v20  ;;  %v5749_v60 = vmul.f32 %v9990_v32, %v5109_v28  ;;  %v5235_v61 = vsel %vm5080_vm5, %v5203_v35, %v5234_v55 }
0x1395   : > { %v5253_v0 = vmul.f32 %v9943_v11, %v5232_v39  ;;  %v5809_v33 = vmul.f32 %v9994_v19, %v5232_v39  ;;  %v4673_v17 = vmax.f32 %v4657_v30, 0.0  ;;  %v4655_v22 = vadd.f32 %v9934_v40, %v4635_v54 }
0x1396   : > { %v5757_v50 = vadd.f32 %v5749_v60, %v5737_v23  ;;  %v5282_v29 = vrot.slane %v10331_v9, %v9512_v53  ;;  %v5300_v15 = vsel %vm5078_vm4, %v5053_v18, %v5299_v58  ;;  %v5319_v62 = vmul.f32 %v9954_v1, %v5298_v34 }
0x1397   : > { %v5260_v10 = vadd.f32 %v5253_v0, %v5121_v41  ;;  %v5845_v3 = vmul.f32 %v10005_v63, %v5298_v34  ;;  %v4689_v35 = vmin.f32 %v4673_v17, 6.0  ;;  %v4671_v27 = vmax.f32 %v4655_v22, 0.0 }
0x1398   : > { %v5817_v21 = vadd.f32 %v5809_v33, %v5757_v50  ;;  %v5710_v23 = vsel %vm5080_vm5, %v5684_v6, %v5709_v2  ;;  %v5122_v44 = vmul.f32 %v9940_v25, %v5110_v24  ;;  %v5254_v31 = vmul.f32 %v9943_v11, %v5235_v61 }
0x1399   : > { %v5326_v54 = vadd.f32 %v5319_v62, %v5260_v10  ;;  %v4687_v9 = vmin.f32 %v4671_v27, 6.0  ;;  %v4638_v18 = vmul.f32 %v10285_v36, %v9932_v48  ;;  %v4636_v58 = vmul.f32 %v9932_v48, %v10287_v7 }
0x139a   : > { %v10387_v5 = vadd.f32 %v5845_v3, %v5817_v21  ;;  %v5646_v51 = vmul.f32 %v5626_v46, %v9976_v37  ;;  %v10395_v57 = vsel %vm5080_vm5, %v5282_v29, %v5300_v15  ;;  %v4952_v2 = vrot.slane %v4689_v35, %v9948_v26 }
0x139b   : > { %v5474_v6 = vadd.f32 %v5466_v14, %v5326_v54  ;;  %v5730_v4 = vmul.f32 %v5710_v23, %v9985_v16  ;;  %v5261_v49 = vadd.f32 %v5254_v31, %v5122_v44  ;;  %v4911_v8 = vcombine.high %v4687_v9, %v4687_v9 }
0x139c   : > { %v4918_v56 = vrot.slane %v4687_v9, %v9948_v26  ;;  %v5320_v36 = vmul.f32 %v9954_v1, %v10395_v57  ;;  %v4945_v55 = vcombine.high %v4689_v35, %v4689_v35  ;;  %v4658_v48 = vadd.f32 %v9934_v40, %v4638_v18 }
0x139d   : > { %v5654_v43 = vadd.f32 %v5646_v51, %v5474_v6  ;;  %v4656_v7 = vadd.f32 %v9934_v40, %v4636_v58  ;;  %v5750_v46 = vmul.f32 %v9990_v32, %v5110_v24  ;;  %v4960_v52 = vcombine.high %v4952_v2, %v4952_v2 }
0x139e   : > { %v4925_v42 = vrot.slane %v4911_v8, %v9948_v26  ;;  %v4926_v28 = vcombine.high %v4918_v56, %v4918_v56  ;;  %v5327_v20 = vadd.f32 %v5320_v36, %v5261_v49  ;;  %v5810_v12 = vmul.f32 %v9994_v19, %v5235_v61 }
0x139f   : > { %v5738_v59 = vadd.f32 %v5730_v4, %v5654_v43  ;;  %v4959_v41 = vrot.slane %v4945_v55, %v9948_v26  ;;  %v4674_v34 = vmax.f32 %v4658_v48, 0.0  ;;  %v4672_v60 = vmax.f32 %v4656_v7, 0.0 }
0x13a0   : > { %v4927_v39 = vcombine.high %v4925_v42, %v4925_v42  ;;  %v5416_v14 = vrot.slane %v4952_v2, %v9512_v53  ;;  %v5420_v40 = vrot.slane %v4960_v52, %v9512_v53  ;;  %v5596_v24 = vrot.slane %v4952_v2, %v9308_v47 }
0x13a1   : > { %v5758_v30 = vadd.f32 %v5750_v46, %v5738_v59  ;;  %v5600_v0 = vrot.slane %v4960_v52, %v9308_v47  ;;  %v5404_v50 = vrot.slane %v4918_v56, %v9512_v53  ;;  %v5408_v33 = vrot.slane %v4926_v28, %v9512_v53 }
0x13a2   : > { %v5412_v61 = vrot.slane %v4925_v42, %v9512_v53  ;;  %v5580_v17 = vrot.slane %v4918_v56, %v9308_v47  ;;  %v5584_v22 = vrot.slane %v4926_v28, %v9308_v47  ;;  %v5588_v29 = vrot.slane %v4925_v42, %v9308_v47 }
0x13a3   : > { %v5592_v15 = vrot.slane %v4927_v39, %v9308_v47  ;;  %v5688_v10 = vrot.slane %v4927_v39, %v9512_v53  ;;  %v5437_v62 = vsel %vm5078_vm4, %v5408_v33, %v5404_v50  ;;  %v5711_v21 = vsel %vm5220_vm7, %v5408_v33, %v5404_v50 }
0x13a4   : > { %v4690_v3 = vmin.f32 %v4674_v34, 6.0  ;;  %v4688_v35 = vmin.f32 %v4672_v60, 6.0  ;;  %v5438_v27 = vsel %vm5080_vm5, %v5412_v61, %v5437_v62  ;;  %v5627_v23 = vsel %vm5220_vm7, %v5584_v22, %v5580_v17 }
0x13a5   : > { %v5712_v44 = vsel %vm5078_vm4, %v5412_v61, %v5711_v21  ;;  %v5818_v31 = vadd.f32 %v5810_v12, %v5758_v30  ;;  %v10425_v54 = vcombine.high %v4959_v41, %v4959_v41  ;;  %v5424_v9 = vrot.slane %v4959_v41, %v9512_v53 }
0x13a6   : > { %v5455_v18 = vsel %vm5104_vm6, 0.0, %v5438_v27  ;;  %v5628_v58 = vsel %vm5078_vm4, %v5588_v29, %v5627_v23  ;;  %v5439_v51 = vsel %vm5078_vm4, %v5420_v40, %v5416_v14  ;;  %v5604_v6 = vrot.slane %v4959_v41, %v9308_v47 }
0x13a7   : > { %v5467_v2 = vmul.f32 %v9973_v38, %v5455_v18  ;;  %v5629_v4 = vsel %vm5080_vm5, %v5592_v15, %v5628_v58  ;;  %v5713_v49 = vsel %vm5080_vm5, %v5688_v10, %v5712_v44  ;;  %v10436_v43 = vrot.slane %v4690_v3, %v9948_v26 }
0x13a8   : > { %v4928_v8 = vcombine.high %v4688_v35, %v4688_v35  ;;  %v4935_v56 = vrot.slane %v4688_v35, %v9948_v26  ;;  %v5630_v36 = vsel %vm5220_vm7, %v5600_v0, %v5596_v24  ;;  %v5647_v48 = vmul.f32 %v5629_v4, %v9976_v37 }
0x13a9   : > { %v5475_v55 = vadd.f32 %v5467_v2, %v5327_v20  ;;  %v5440_v7 = vsel %vm5080_vm5, %v5424_v9, %v5439_v51  ;;  %v5608_v46 = vrot.slane %v10425_v54, %v9308_v47  ;;  %v5731_v42 = vmul.f32 %v5713_v49, %v9985_v16 }
0x13aa   : > { %v4942_v59 = vrot.slane %v4928_v8, %v9948_v26  ;;  %v4962_v28 = vcombine.high %v4690_v3, %v4690_v3  ;;  %v4943_v12 = vcombine.high %v4935_v56, %v4935_v56  ;;  %v5631_v30 = vsel %vm5078_vm4, %v5604_v6, %v5630_v36 }
0x13ab   : > { %v5655_v52 = vadd.f32 %v5647_v48, %v5475_v55  ;;  %v5714_v41 = vsel %vm5220_vm7, %v5420_v40, %v5416_v14  ;;  %v4977_v20 = vcombine.high %v10436_v43, %v10436_v43  ;;  %v5846_v39 = vmul.f32 %v10005_v63, %v10395_v57 }
0x13ac   : > { %v5865_v34 = vmul.f32 %v10216_v45, %v10387_v5  ;;  %v5692_v60 = vrot.slane %v10425_v54, %v9512_v53  ;;  %v5456_v0 = vsel %vm5104_vm6, 0.0, %v5440_v7  ;;  %v4944_v50 = vcombine.high %v4942_v59, %v4942_v59 }
0x13ad   : > { %v5739_v24 = vadd.f32 %v5731_v42, %v5655_v52  ;;  %v5057_v33 = vrot.slane %v4935_v56, %v9512_v53  ;;  %v5061_v14 = vrot.slane %v4943_v12, %v9512_v53  ;;  %v5632_v40 = vsel %vm5080_vm5, %v5608_v46, %v5631_v30 }
0x13ae   : > { %v5715_v61 = vsel %vm5078_vm4, %v5424_v9, %v5714_v41  ;;  %v4976_v57 = vrot.slane %v4962_v28, %v9948_v26  ;;  %v5065_v17 = vrot.slane %v4942_v59, %v9512_v53  ;;  %v5069_v5 = vrot.slane %v10436_v43, %v9512_v53 }
0x13af   : > { %v5073_v22 = vrot.slane %v4977_v20, %v9512_v53  ;;  %v5784_v29 = vrot.slane %v10436_v43, %v9308_v47  ;;  %v5092_v15 = vsel %vm5078_vm4, %v5061_v14, %v5057_v33  ;;  %v5207_v62 = vrot.slane %v4935_v56, %v9308_v47 }
0x13b0   : > { %v5093_v10 = vsel %vm5080_vm5, %v5065_v17, %v5092_v15  ;;  %v5211_v21 = vrot.slane %v4943_v12, %v9308_v47  ;;  %v5215_v26 = vrot.slane %v4942_v59, %v9308_v47  ;;  %v5219_v35 = vrot.slane %v4944_v50, %v9308_v47 }
0x13b1   : > { %v5111_v3 = vsel %vm5104_vm6, 0.0, %v5093_v10  ;;  %v5286_v27 = vrot.slane %v4944_v50, %v9512_v53  ;;  %v5302_v23 = vsel %vm5220_vm7, %v5061_v14, %v5057_v33  ;;  %v5854_v6 = vadd.f32 %v5846_v39, %v5818_v31 }
0x13b2   : > { %v5123_v44 = vmul.f32 %v9940_v25, %v5111_v3  ;;  %v5236_v54 = vsel %vm5220_vm7, %v5211_v21, %v5207_v62  ;;  %v5303_v9 = vsel %vm5078_vm4, %v5065_v17, %v5302_v23  ;;  %v5751_v18 = vmul.f32 %v9990_v32, %v5111_v3 }
0x13b3   : > { %v5237_v58 = vsel %vm5078_vm4, %v5215_v26, %v5236_v54  ;;  %v5304_v51 = vsel %vm5080_vm5, %v5286_v27, %v5303_v9  ;;  %v5877_v2 = vadd.f32 %v10233_v13, %v5865_v34  ;;  %v4978_v4 = vcombine.high %v4976_v57, %v4976_v57  ;;  %v6342_v9 = vld [vmem:[#allocation13] ss:$0 sm:$0xff] }
0x13b4   : > { %v5788_v49 = vrot.slane %v4977_v20, %v9308_v47  ;;  %v5238_v43 = vsel %vm5080_vm5, %v5219_v35, %v5237_v58  ;;  %v5759_v8 = vadd.f32 %v5751_v18, %v5739_v24  ;;  %v5077_v25 = vrot.slane %v4976_v57, %v9512_v53 }
0x13b5   : > { %v5255_v56 = vmul.f32 %v9943_v11, %v5238_v43  ;;  %v5811_v36 = vmul.f32 %v9994_v19, %v5238_v43  ;;  %v5866_v55 = vmul.f32 %v10216_v45, %v5854_v6  ;;  %v5094_v48 = vsel %vm5078_vm4, %v5073_v22, %v5069_v5 }
0x13b6   : > { %v5792_v31 = vrot.slane %v4976_v57, %v9308_v47  ;;  %v5321_v7 = vmul.f32 %v9954_v1, %v5304_v51  ;;  %v5847_v46 = vmul.f32 %v10005_v63, %v5304_v51  ;;  %v5885_v28 = vmax.f32 %v5877_v2, 0.0 }
0x13b7   : > { %v5262_v59 = vadd.f32 %v5255_v56, %v5123_v44  ;;  %v5819_v52 = vadd.f32 %v5811_v36, %v5759_v8  ;;  %v5878_v42 = vadd.f32 %v10233_v13, %v5866_v55  ;;  %v5468_v12 = vmul.f32 %v9973_v38, %v5456_v0 }
0x13b8   : > { %v5800_v11 = vsel %vm5220_vm7, %v5788_v49, %v5784_v29  ;;  %v5095_v30 = vsel %vm5080_vm5, %v5077_v25, %v5094_v48  ;;  %v5648_v34 = vmul.f32 %v5632_v40, %v9976_v37  ;;  %v5716_v1 = vsel %vm5080_vm5, %v5692_v60, %v5715_v61 }
0x13b9   : > { %v5328_v41 = vadd.f32 %v5321_v7, %v5262_v59  ;;  %v5855_v20 = vadd.f32 %v5847_v46, %v5819_v52  ;;  %v5886_v39 = vmax.f32 %v5878_v42, 0.0  ;;  %v5796_v24 = vrot.slane %v4978_v4, %v9308_v47 }
0x13ba   : > { %v5836_v50 = vsel %vm5220_vm7, %v5073_v22, %v5069_v5  ;;  %v5801_v33 = vsel %vm5078_vm4, %v5792_v31, %v5800_v11  ;;  %v5893_v57 = vmin.f32 %v5885_v28, 6.0  ;;  %v5112_v0 = vsel %vm5104_vm6, 0.0, %v5095_v30 }
0x13bb   : > { %v5476_v14 = vadd.f32 %v5468_v12, %v5328_v41  ;;  %v5894_v38 = vmin.f32 %v5886_v39, 6.0  ;;  %v5832_v17 = vrot.slane %v4978_v4, %v9512_v53  ;;  %v5732_v29 = vmul.f32 %v5716_v1, %v9985_v16 }
0x13bc   : > { %v5837_v15 = vsel %vm5078_vm4, %v5077_v25, %v5836_v50  ;;  %v5802_v60 = vsel %vm5080_vm5, %v5796_v24, %v5801_v33  ;;  %v5752_v47 = vmul.f32 %v9990_v32, %v5112_v0  ;;  %v5867_v62 = vmul.f32 %v10216_v45, %v5855_v20 }
0x13bd   : > { %v5656_v37 = vadd.f32 %v5648_v34, %v5476_v14  ;;  %v5915_v40 = vcombine.low %v5893_v57, %v5894_v38  ;;  %v5838_v5 = vsel %vm5080_vm5, %v5832_v17, %v5837_v15  ;;  %v5812_v22 = vmul.f32 %v5802_v60, %v9994_v19 }
0x13be   : > { %v5848_v53 = vmul.f32 %v5838_v5, %v10005_v63  ;;  %v5879_v26 = vadd.f32 %v10233_v13, %v5867_v62  ;;  %v6343_v63 = vld [vmem:[#allocation13 + $0x1] ss:$0 sm:$0xff] }
0x13bf   : > { %v5740_v61 = vadd.f32 %v5732_v29, %v5656_v37 }
0x13c0   : > { %v5887_v32 = vmax.f32 %v5879_v26, 0.0 }
0x13c1   : > { %v5760_v10 = vadd.f32 %v5752_v47, %v5740_v61 }
0x13c2   : > { %v5895_v23 = vmin.f32 %v5887_v32, 6.0 }
0x13c3   : > { %v5820_v16 = vadd.f32 %v5812_v22, %v5760_v10 }
0x13c5   : > { %v5856_v21 = vadd.f32 %v5848_v53, %v5820_v16 }
0x13c7   : > { %v5868_v3 = vmul.f32 %v10216_v45, %v5856_v21 }
0x13c9   : > { %v5880_v35 = vadd.f32 %v10233_v13, %v5868_v3 }
0x13cb   : > { %v5888_v27 = vmax.f32 %v5880_v35, 0.0 }
0x13cd   : > { %v5896_v44 = vmin.f32 %v5888_v27, 6.0 }
0x13cf   : > { %v5916_v19 = vcombine.low %v5895_v23, %v5896_v44 }
0x13d1   : > { %v5922_v54 = vpack.c.bf16 %v5916_v19, %v5915_v40 }
0x13d3   : > { %6987 = vmatmul.mubr.msk.bf16.vlgmr.msra.gmra.mrb[120].mxu0 %vm924_vm2, %v5922_v54 }
0x14a6   : > { %v6988_v18 = vpop.f32.mrb[120].mxu0 }
0x14a7   : > { %v6008_v58 = vmul.f32 %v6988_v18, %v6342_v9  ;;  %v5987_v51 = vpop.f32.mrb[121].mxu0 }
0x14a8   : > { %v6006_v45 = vmul.f32 %v6342_v9, %v5987_v51  ;;  %v6989_v13 = vpop.f32.mrb[122].mxu0 }
0x14a9   : > { %v6016_v6 = vadd.f32 %v6343_v63, %v6008_v58  ;;  %v6009_v2 = vmul.f32 %v6989_v13, %v6342_v9  ;;  %v5990_v4 = vpop.f32.mrb[123].mxu0 }
0x14aa   : > { %v6014_v49 = vadd.f32 %v6343_v63, %v6006_v45  ;;  %v6007_v43 = vmul.f32 %v6342_v9, %v5990_v4 }
0x14ab   : > { %6020 = vst [vmem:[%s538_s5 + $0x10] sm:$0xff] %v6016_v6  ;;  %v6017_v8 = vadd.f32 %v6343_v63, %v6009_v2 }
0x14ac   : > { %6018 = vst [vmem:[%s538_s5] sm:$0xff] %v6014_v49  ;;  %v6015_v25 = vadd.f32 %v6343_v63, %v6007_v43 }
0x14ad   : > { %6021 = vst [vmem:[%s538_s5 + $0x18] sm:$0xff] %v6017_v8 }
0x14ae   : > { %6019 = vst [vmem:[%s538_s5 + $0x8] sm:$0xff] %v6015_v25 }
0x14af   : > { %7777 = shalt.err (!%p7774_p8)
}
0x14b0   : > { %s7778_s5 = scalar_lea.hbm %s10524_s19, 512  ;;  %s7782_s17 = scalar_lea.hbm %s10630_s8, 1024 }
0x14b1   : > { %p7779_p10 = scmp.ne.s32.totalorder %s10524_s19, %s7778_s5  ;;  %p7783_p3 = scmp.lt.u32.totalorder %s10524_s19, %s10630_s8 }
0x14b2   : > { %p7784_p5 = scmp.lt.u32.totalorder %s7782_s17, %s7778_s5  ;;  %p7786_p6 = scmp.lt.u32.totalorder %s7778_s5, %s10524_s19 }
0x14b3   : > { %p7780_p11 = pnand %p7779_p10, %p10631_p9 }
0x14b4   : > { %p7785_p7 = por %p7784_p5, %p7783_p3 }
0x14b5   : > { %p7781_p12 = pneg %p7780_p11 }
0x14b6   : > { %p7787_p4 = por %p7786_p6, %p7785_p7 }
0x14b8   : > { %p7788_p1 = pnand %p7787_p4, %p7781_p12 }
0x14ba   : > { %7791 = shalt.err (!%p7788_p1)
}
0x14bb   : > { %s7868_s1 = smov 128   ;;  %s7869_s22 = smov 8  }
0x14bc   : > { %7100 = dma.vmem_to_hbm [thread:$0]  (%p10631_p9), %s10519_s21, 512, %s10524_s19, %s6023_s14, %s7868_s1, %s7868_s1, %s7869_s22  }
0x14bd PF: > { %s6052_s15 = sand.u32 1, %s7830_s25   ;;  %p10632_p13 = scmp.ne.s32.totalorder %s10604_s23, 0 }
0x14be   : > { %p10633_p0 = scmp.ge.s32.totalorder %s7842_s28, 2  ;;  %s6053_s5 = scalar_lea.sflag [#allocation4], %s6052_s15 }
0x14c0   : > { %p7126_p2 = pnand %p10633_p0, %p10632_p13 }
0x14c2   : > { %7825 = dma.done.wait (!%p7126_p2), %s6053_s5, 512  }
0x14c3   : > { %7827 = vsyncadd (!%p7126_p2), %s6053_s5, 4294966784  ;;  %p29_p8 = scmp.ge.s32.totalorder %s8128_s18, 4   ;;  %s10634_s25 = smov %s7834_s26 }
0x14c4   : > { %s10635_s26 = smov %s7838_s27  ;;  %s10636_s27 = smov %s8139_s10 }
0x14c5   : > { %s10637_s28 = smov %s8128_s18  ;;  %31 = sbr.rel (!%p29_p8) target bundleno = 16 (0x10), region = 144 }
0x14cc   :  { %6058 = vsyncpa [#allocation3], 1 }
0x14cd   :  { %6060 = vsyncpa [#allocation3 + $0x1], 1 }
0x14ce   :  { %6061 = vsyncpa [#allocation6], 1 }
0x14cf   :  { %6062 = vsyncpa [#allocation9], 1 }
0x14d0   :  { %6063 = vsyncpa [#allocation12], 1 }
0x14d1   :  { %6064 = vsyncpa [#allocation4], 1 }
0x14d2   :  { %6066 = vsyncpa [#allocation4 + $0x1], 1 }

</bundles_post_ra>
